<compile_context>
chip_gen: v6e
topology: v6e:2x2x1
jax: 0.10.0
libtpu: 0.0.40
codegen_flags: <defaults>
</compile_context>

<pallas_src>
import math

import jax
import jax.numpy as jnp
from jax.experimental import pallas as pl
from jax.experimental.pallas import tpu as pltpu

BN_EPS = 1e-5


# --------------------------------------------------------------------------
# Kernel: one invocation, all T timestep-batches at once.
# --------------------------------------------------------------------------
def net_kernel(
    x_ref, temb_ref,                 # [T, B, D] f32, [T, B, E] f32
    w_in_ref, b_in_ref,              # [D, E] f32, [1, E] f32
    w1_ref, gb1_ref,                 # [L, E, 2E] bf16, [L, 2, 2E] f32 (gamma;beta)
    w2_ref, gb2_ref,                 # [L, 2E, 2E] bf16, [L, 2, 2E] f32
    w3_ref, gb3_ref,                 # [L, 2E, E] bf16, [L, 2, E] f32
    wf_t_ref, bf_ref,                # [D, E] f32 (W_f transposed), [1, D] f32
    out_ref,                         # [T, B, D] f32
):
    x = x_ref[...]                                            # [T, B, D]
    t_emb = temb_ref[...]                                     # [T, B, E]
    T, B, D = x.shape
    inv_b = jnp.float32(1.0 / B)

    def dot_bf16(h, w):
        # [T,B,K] @ [K,N] -> [T,B,N]; fold T into the M dim for the MXU.
        hf = h.reshape(T * B, h.shape[-1]).astype(jnp.bfloat16)
        z = jnp.dot(hf, w, preferred_element_type=jnp.float32)
        return z.reshape(T, B, z.shape[-1])

    def bn_relu(z, gb):
        # per-timestep batch statistics over axis=1 (the B axis), f32 throughout
        gamma = gb[0:1, :]                                    # [1, N]
        beta = gb[1:2, :]                                     # [1, N]
        s = jnp.sum(z, axis=1, keepdims=True)                 # [T, 1, N]
        ss = jnp.sum(z * z, axis=1, keepdims=True)            # [T, 1, N]
        mean = s * inv_b
        var = jnp.maximum(ss * inv_b - mean * mean, 0.0)      # clamp cancellation
        scale = gamma * jax.lax.rsqrt(var + BN_EPS)           # [T, 1, N]
        shift = beta - mean * scale                           # [T, 1, N]
        return jnp.maximum(z * scale + shift, 0.0)            # 2 wide VPU ops

    # ---- input layer: degenerate K=D matmul done on the VPU ----
    w_in = w_in_ref[...]                                      # [D, E]
    acc = x[:, :, 0:1] * w_in[0:1, :] + b_in_ref[...]
    for d in range(1, D):
        acc = acc + x[:, :, d:d + 1] * w_in[d:d + 1, :]
    x_emb = jnp.maximum(acc, 0.0)                             # [T, B, E]

    # ---- residual blocks: MXU matmuls on flattened [T*B, K] ----
    n_layers = w1_ref.shape[0]
    for l in range(n_layers):                                 # static unroll
        h = t_emb + x_emb
        # NOTE: b1/b2/b3 omitted — a pre-BN per-column constant cancels exactly.
        h = bn_relu(dot_bf16(h, w1_ref[l]), gb1_ref[l])       # [T, B, 2E]
        h = bn_relu(dot_bf16(h, w2_ref[l]), gb2_ref[l])       # [T, B, 2E]
        h = bn_relu(dot_bf16(h, w3_ref[l]), gb3_ref[l])       # [T, B, E]
        x_emb = x_emb + h

    # ---- final layer: degenerate N=D matmul as D lane reductions on VPU/XLU ----
    wf_t = wf_t_ref[...]                                      # [D, E]
    lane = jax.lax.broadcasted_iota(jnp.int32, (T, B, D), 2)
    y = jnp.zeros((T, B, D), jnp.float32)
    for j in range(D):
        col = jnp.sum(x_emb * wf_t[j:j + 1, :], axis=-1, keepdims=True)  # [T,B,1]
        y = jnp.where(lane == j, col, y)
    out_ref[...] = y + bf_ref[...] - x                        # single store


# --------------------------------------------------------------------------
# Parameters / positional encoding
# --------------------------------------------------------------------------
def make_positional_encoding(d_model, max_len=5000):
    position = jnp.arange(max_len, dtype=jnp.float32)[:, None]
    div_term = jnp.exp(
        jnp.arange(0, d_model, 2, dtype=jnp.float32) * (-math.log(10000.0) / d_model)
    )
    angles = position * div_term                               # [max_len, d_model/2]
    pe = jnp.zeros((max_len, d_model), dtype=jnp.float32)
    pe = pe.at[:, 0::2].set(jnp.sin(angles))
    pe = pe.at[:, 1::2].set(jnp.cos(angles))
    return pe


def init_params(key, dim_input, dim_embedding, n_layers):
    E, D = dim_embedding, dim_input
    ks = jax.random.split(key, 2 + 6 * n_layers)
    ki = iter(range(len(ks)))

    def lin(k, fan_in, fan_out):
        bound = 1.0 / math.sqrt(fan_in)
        w = jax.random.uniform(k, (fan_in, fan_out), jnp.float32, -bound, bound)
        b = jax.random.uniform(jax.random.fold_in(k, 1), (1, fan_out),
                               jnp.float32, -bound, bound)
        return w, b

    w_in, b_in = lin(ks[next(ki)], D, E)
    wf, bf = lin(ks[next(ki)], E, D)

    def bn_pack(k, n):
        g = 1.0 + 0.1 * jax.random.normal(jax.random.fold_in(k, 0), (1, n))
        b = 0.1 * jax.random.normal(jax.random.fold_in(k, 1), (1, n))
        return jnp.concatenate([g, b], axis=0)                # [2, n]

    w1s, b1s, gb1s = [], [], []
    w2s, b2s, gb2s = [], [], []
    w3s, b3s, gb3s = [], [], []
    for _ in range(n_layers):
        w1, b1 = lin(ks[next(ki)], E, 2 * E)
        w2, b2 = lin(ks[next(ki)], 2 * E, 2 * E)
        w3, b3 = lin(ks[next(ki)], 2 * E, E)
        gb1 = bn_pack(ks[next(ki)], 2 * E)
        gb2 = bn_pack(ks[next(ki)], 2 * E)
        gb3 = bn_pack(ks[next(ki)], E)
        w1s.append(w1); b1s.append(b1); gb1s.append(gb1)
        w2s.append(w2); b2s.append(b2); gb2s.append(gb2)
        w3s.append(w3); b3s.append(b3); gb3s.append(gb3)

    stack = lambda xs: jnp.stack(xs, axis=0)
    bf16 = lambda a: a.astype(jnp.bfloat16)     # big weight matrices stored in bf16
    return dict(
        w_in=w_in, b_in=b_in,                  # f32: used on the VPU (K=D tiny)
        wf_t=wf.T, bf=bf,                      # f32, W_f transposed to [D, E]
        w1s=bf16(stack(w1s)), b1s=stack(b1s), gb1s=stack(gb1s),
        w2s=bf16(stack(w2s)), b2s=stack(b2s), gb2s=stack(gb2s),
        w3s=bf16(stack(w3s)), b3s=stack(b3s), gb3s=stack(gb3s),
    )


# --------------------------------------------------------------------------
# Wrapper: single kernel invocation (no grid); every array is one resident
# VMEM block.  Total weight footprint ~16*L*E^2 bytes (<1 MB here).
# --------------------------------------------------------------------------
@jax.jit
def net_forward(params, pe, x, t):
    T, B, D = x.shape
    # positional-encoding gather (plain-JAX glue, outside the kernel)
    t_emb = pe[t.astype(jnp.int32)]                            # [T, B, E]
    return pl.pallas_call(
        net_kernel,
        out_shape=jax.ShapeDtypeStruct((T, B, D), jnp.float32),
        compiler_params=pltpu.CompilerParams(
            vmem_limit_bytes=32 * 1024 * 1024),
    )(x, t_emb,
      params["w_in"], params["b_in"],
      params["w1s"], params["gb1s"],
      params["w2s"], params["gb2s"],
      params["w3s"], params["gb3s"],
      params["wf_t"], params["bf"])


# --------------------------------------------------------------------------
# Pure-JAX reference (full module math, including the b1/b2/b3 biases that the
# kernel omits — they cancel under BatchNorm; two-pass variance).  Uses the
# same bf16-at-dot casting for w1/w2/w3 so the comparison isolates kernel
# correctness.
# --------------------------------------------------------------------------
def net_forward_ref(params, pe, x, t):
    t_emb_all = pe[t.astype(jnp.int32)]                        # [T, B, E]
    wf = params["wf_t"].T                                      # [E, D]

    def bn_relu(z, gb):
        g, b = gb[0:1, :], gb[1:2, :]
        m = jnp.mean(z, axis=0, keepdims=True)
        v = jnp.mean((z - m) ** 2, axis=0, keepdims=True)
        return jnp.maximum((z - m) / jnp.sqrt(v + BN_EPS) * g + b, 0.0)

    def dot_bf16(a, w):
        return jnp.dot(a.astype(jnp.bfloat16), w,
                       preferred_element_type=jnp.float32)

    outs = []
    n_layers = params["w1s"].shape[0]
    for s in range(x.shape[0]):
        xs, ts = x[s], t_emb_all[s]
        x_emb = jnp.maximum(xs @ params["w_in"] + params["b_in"], 0.0)
        for l in range(n_layers):
            h = ts + x_emb
            h = bn_relu(dot_bf16(h, params["w1s"][l]) + params["b1s"][l],
                        params["gb1s"][l])
            h = bn_relu(dot_bf16(h, params["w2s"][l]) + params["b2s"][l],
                        params["gb2s"][l])
            h = bn_relu(dot_bf16(h, params["w3s"][l]) + params["b3s"][l],
                        params["gb3s"][l])
            x_emb = h + x_emb
        outs.append(x_emb @ wf + params["bf"] - xs)
    return jnp.stack(outs, axis=0)


# --------------------------------------------------------------------------
if __name__ == "__main__":
    T = 4            # independent (x, t) batches handled by one kernel call
    B = 8            # batch per timestep (BatchNorm statistics are per-timestep)
    D_IN = 4         # dim_input (funnel dimensionality)
    E = 128          # dim_embedding (lane-aligned)
    N_LAYERS = 3

    key = jax.random.PRNGKey(0)
    k_p, k_x, k_t = jax.random.split(key, 3)

    params = init_params(k_p, D_IN, E, N_LAYERS)
    pe = make_positional_encoding(E, max_len=5000)

    x = jax.random.normal(k_x, (T, B, D_IN), dtype=jnp.float32)
    t = jax.random.randint(k_t, (T, B), 0, 1000, dtype=jnp.int32)

    out = jax.block_until_ready(net_forward(params, pe, x, t))
    ref = net_forward_ref(params, pe, x, t)

    assert out.shape == (T, B, D_IN)
    # Tolerance covers bf16-at-dot rounding (present in both paths), the exact
    # bias cancellation, and single-pass (clamped) vs two-pass BN variance.
    assert jnp.allclose(out, ref, rtol=1e-2, atol=1e-2), (
        "mismatch vs pure-JAX reference; max abs err = %f"
        % float(jnp.max(jnp.abs(out - ref))))

    print("KERNEL_OK")
</pallas_src>

<mosaic_0001>
module attributes {stable_mosaic.version = 11 : i64} {
  func.func @net_kernel(%arg0: memref<4x8x4xf32, #tpu.memory_space<vmem>>, %arg1: memref<4x8x128xf32, #tpu.memory_space<vmem>>, %arg2: memref<4x128xf32, #tpu.memory_space<vmem>>, %arg3: memref<1x128xf32, #tpu.memory_space<vmem>>, %arg4: memref<3x128x256xbf16, #tpu.memory_space<vmem>>, %arg5: memref<3x2x256xf32, #tpu.memory_space<vmem>>, %arg6: memref<3x256x256xbf16, #tpu.memory_space<vmem>>, %arg7: memref<3x2x256xf32, #tpu.memory_space<vmem>>, %arg8: memref<3x256x128xbf16, #tpu.memory_space<vmem>>, %arg9: memref<3x2x128xf32, #tpu.memory_space<vmem>>, %arg10: memref<4x128xf32, #tpu.memory_space<vmem>>, %arg11: memref<1x4xf32, #tpu.memory_space<vmem>>, %arg12: memref<4x8x4xf32, #tpu.memory_space<vmem>>) attributes {dimension_semantics = [], scalar_prefetch = 0 : i64, scratch_operands = 0 : i64, tpu.core_type = #tpu.core_type<tc>} {
    %c0 = arith.constant 0 : index
    %c0_0 = arith.constant 0 : index
    %c0_1 = arith.constant 0 : index
    %0 = vector.load %arg0[%c0, %c0_0, %c0_1] : memref<4x8x4xf32, #tpu.memory_space<vmem>>, vector<4x8x4xf32>
    %c0_2 = arith.constant 0 : index
    %c0_3 = arith.constant 0 : index
    %c0_4 = arith.constant 0 : index
    %1 = vector.load %arg1[%c0_2, %c0_3, %c0_4] : memref<4x8x128xf32, #tpu.memory_space<vmem>>, vector<4x8x128xf32>
    %c0_5 = arith.constant 0 : index
    %c0_6 = arith.constant 0 : index
    %2 = vector.load %arg2[%c0_5, %c0_6] : memref<4x128xf32, #tpu.memory_space<vmem>>, vector<4x128xf32>
    %3 = vector.extract_strided_slice %0 {offsets = [0, 0, 0], sizes = [4, 8, 1], strides = [1, 1, 1]} : vector<4x8x4xf32> to vector<4x8x1xf32>
    %4 = vector.extract_strided_slice %2 {offsets = [0, 0], sizes = [1, 128], strides = [1, 1]} : vector<4x128xf32> to vector<1x128xf32>
    %5 = vector.shape_cast %4 : vector<1x128xf32> to vector<1x1x128xf32>
    %6 = vector.broadcast %3 : vector<4x8x1xf32> to vector<4x8x128xf32>
    %7 = vector.broadcast %5 : vector<1x1x128xf32> to vector<4x8x128xf32>
    %8 = arith.mulf %6, %7 : vector<4x8x128xf32>
    %c0_7 = arith.constant 0 : index
    %c0_8 = arith.constant 0 : index
    %9 = vector.load %arg3[%c0_7, %c0_8] : memref<1x128xf32, #tpu.memory_space<vmem>>, vector<1x128xf32>
    %10 = vector.shape_cast %9 : vector<1x128xf32> to vector<1x1x128xf32>
    %11 = vector.broadcast %10 : vector<1x1x128xf32> to vector<4x8x128xf32>
    %12 = arith.addf %8, %11 : vector<4x8x128xf32>
    %13 = vector.extract_strided_slice %0 {offsets = [0, 0, 1], sizes = [4, 8, 1], strides = [1, 1, 1]} : vector<4x8x4xf32> to vector<4x8x1xf32>
    %14 = vector.extract_strided_slice %2 {offsets = [1, 0], sizes = [1, 128], strides = [1, 1]} : vector<4x128xf32> to vector<1x128xf32>
    %15 = vector.shape_cast %14 : vector<1x128xf32> to vector<1x1x128xf32>
    %16 = vector.broadcast %13 : vector<4x8x1xf32> to vector<4x8x128xf32>
    %17 = vector.broadcast %15 : vector<1x1x128xf32> to vector<4x8x128xf32>
    %18 = arith.mulf %16, %17 : vector<4x8x128xf32>
    %19 = arith.addf %12, %18 : vector<4x8x128xf32>
    %20 = vector.extract_strided_slice %0 {offsets = [0, 0, 2], sizes = [4, 8, 1], strides = [1, 1, 1]} : vector<4x8x4xf32> to vector<4x8x1xf32>
    %21 = vector.extract_strided_slice %2 {offsets = [2, 0], sizes = [1, 128], strides = [1, 1]} : vector<4x128xf32> to vector<1x128xf32>
    %22 = vector.shape_cast %21 : vector<1x128xf32> to vector<1x1x128xf32>
    %23 = vector.broadcast %20 : vector<4x8x1xf32> to vector<4x8x128xf32>
    %24 = vector.broadcast %22 : vector<1x1x128xf32> to vector<4x8x128xf32>
    %25 = arith.mulf %23, %24 : vector<4x8x128xf32>
    %26 = arith.addf %19, %25 : vector<4x8x128xf32>
    %27 = vector.extract_strided_slice %0 {offsets = [0, 0, 3], sizes = [4, 8, 1], strides = [1, 1, 1]} : vector<4x8x4xf32> to vector<4x8x1xf32>
    %28 = vector.extract_strided_slice %2 {offsets = [3, 0], sizes = [1, 128], strides = [1, 1]} : vector<4x128xf32> to vector<1x128xf32>
    %29 = vector.shape_cast %28 : vector<1x128xf32> to vector<1x1x128xf32>
    %30 = vector.broadcast %27 : vector<4x8x1xf32> to vector<4x8x128xf32>
    %31 = vector.broadcast %29 : vector<1x1x128xf32> to vector<4x8x128xf32>
    %32 = arith.mulf %30, %31 : vector<4x8x128xf32>
    %33 = arith.addf %26, %32 : vector<4x8x128xf32>
    %cst = arith.constant 0.000000e+00 : f32
    %34 = vector.broadcast %cst : f32 to vector<4x8x128xf32>
    %35 = arith.maximumf %33, %34 : vector<4x8x128xf32>
    %36 = arith.addf %1, %35 : vector<4x8x128xf32>
    %c0_9 = arith.constant 0 : index
    %c0_10 = arith.constant 0 : index
    %c0_11 = arith.constant 0 : index
    %37 = vector.load %arg4[%c0_9, %c0_10, %c0_11] : memref<3x128x256xbf16, #tpu.memory_space<vmem>>, vector<1x128x256xbf16>
    %38 = vector.shape_cast %37 : vector<1x128x256xbf16> to vector<128x256xbf16>
    %39 = vector.shape_cast %36 : vector<4x8x128xf32> to vector<32x128xf32>
    %40 = arith.truncf %39 : vector<32x128xf32> to vector<32x128xbf16>
    %cst_12 = arith.constant dense<0.000000e+00> : vector<32x256xf32>
    %41 = tpu.matmul %40, %38, %cst_12 {dimension_numbers = #tpu.dot_dimension_numbers<[1], [0], [0], [1], [0, 0, 1, 1], [], []>} : vector<32x128xbf16>, vector<128x256xbf16>, vector<32x256xf32> -> vector<32x256xf32>
    %42 = vector.shape_cast %41 : vector<32x256xf32> to vector<4x8x256xf32>
    %c0_13 = arith.constant 0 : index
    %c0_14 = arith.constant 0 : index
    %c0_15 = arith.constant 0 : index
    %43 = vector.load %arg5[%c0_13, %c0_14, %c0_15] : memref<3x2x256xf32, #tpu.memory_space<vmem>>, vector<1x2x256xf32>
    %44 = vector.shape_cast %43 : vector<1x2x256xf32> to vector<2x256xf32>
    %45 = vector.extract_strided_slice %44 {offsets = [0, 0], sizes = [1, 256], strides = [1, 1]} : vector<2x256xf32> to vector<1x256xf32>
    %46 = vector.extract_strided_slice %44 {offsets = [1, 0], sizes = [1, 256], strides = [1, 1]} : vector<2x256xf32> to vector<1x256xf32>
    %cst_16 = arith.constant dense<0.000000e+00> : vector<4x256xf32>
    %47 = vector.multi_reduction <add>, %42, %cst_16 [1] : vector<4x8x256xf32> to vector<4x256xf32>
    %48 = vector.shape_cast %47 : vector<4x256xf32> to vector<4x1x256xf32>
    %49 = arith.mulf %42, %42 : vector<4x8x256xf32>
    %cst_17 = arith.constant dense<0.000000e+00> : vector<4x256xf32>
    %50 = vector.multi_reduction <add>, %49, %cst_17 [1] : vector<4x8x256xf32> to vector<4x256xf32>
    %51 = vector.shape_cast %50 : vector<4x256xf32> to vector<4x1x256xf32>
    %cst_18 = arith.constant 1.250000e-01 : f32
    %52 = vector.broadcast %cst_18 : f32 to vector<4x1x256xf32>
    %53 = arith.mulf %48, %52 : vector<4x1x256xf32>
    %cst_19 = arith.constant 1.250000e-01 : f32
    %54 = vector.broadcast %cst_19 : f32 to vector<4x1x256xf32>
    %55 = arith.mulf %51, %54 : vector<4x1x256xf32>
    %56 = arith.mulf %53, %53 : vector<4x1x256xf32>
    %57 = arith.subf %55, %56 : vector<4x1x256xf32>
    %cst_20 = arith.constant 0.000000e+00 : f32
    %58 = vector.broadcast %cst_20 : f32 to vector<4x1x256xf32>
    %59 = arith.maximumf %57, %58 : vector<4x1x256xf32>
    %cst_21 = arith.constant 9.99999974E-6 : f32
    %60 = vector.broadcast %cst_21 : f32 to vector<4x1x256xf32>
    %61 = arith.addf %59, %60 : vector<4x1x256xf32>
    %62 = math.rsqrt %61 : vector<4x1x256xf32>
    %63 = vector.shape_cast %45 : vector<1x256xf32> to vector<1x1x256xf32>
    %64 = vector.broadcast %63 : vector<1x1x256xf32> to vector<4x1x256xf32>
    %65 = arith.mulf %64, %62 : vector<4x1x256xf32>
    %66 = arith.mulf %53, %65 : vector<4x1x256xf32>
    %67 = vector.shape_cast %46 : vector<1x256xf32> to vector<1x1x256xf32>
    %68 = vector.broadcast %67 : vector<1x1x256xf32> to vector<4x1x256xf32>
    %69 = arith.subf %68, %66 : vector<4x1x256xf32>
    %70 = vector.broadcast %65 : vector<4x1x256xf32> to vector<4x8x256xf32>
    %71 = arith.mulf %42, %70 : vector<4x8x256xf32>
    %72 = vector.broadcast %69 : vector<4x1x256xf32> to vector<4x8x256xf32>
    %73 = arith.addf %71, %72 : vector<4x8x256xf32>
    %cst_22 = arith.constant 0.000000e+00 : f32
    %74 = vector.broadcast %cst_22 : f32 to vector<4x8x256xf32>
    %75 = arith.maximumf %73, %74 : vector<4x8x256xf32>
    %c0_23 = arith.constant 0 : index
    %c0_24 = arith.constant 0 : index
    %c0_25 = arith.constant 0 : index
    %76 = vector.load %arg6[%c0_23, %c0_24, %c0_25] : memref<3x256x256xbf16, #tpu.memory_space<vmem>>, vector<1x256x256xbf16>
    %77 = vector.shape_cast %76 : vector<1x256x256xbf16> to vector<256x256xbf16>
    %78 = vector.shape_cast %75 : vector<4x8x256xf32> to vector<32x256xf32>
    %79 = arith.truncf %78 : vector<32x256xf32> to vector<32x256xbf16>
    %cst_26 = arith.constant dense<0.000000e+00> : vector<32x256xf32>
    %80 = tpu.matmul %79, %77, %cst_26 {dimension_numbers = #tpu.dot_dimension_numbers<[1], [0], [0], [1], [0, 0, 1, 1], [], []>} : vector<32x256xbf16>, vector<256x256xbf16>, vector<32x256xf32> -> vector<32x256xf32>
    %81 = vector.shape_cast %80 : vector<32x256xf32> to vector<4x8x256xf32>
    %c0_27 = arith.constant 0 : index
    %c0_28 = arith.constant 0 : index
    %c0_29 = arith.constant 0 : index
    %82 = vector.load %arg7[%c0_27, %c0_28, %c0_29] : memref<3x2x256xf32, #tpu.memory_space<vmem>>, vector<1x2x256xf32>
    %83 = vector.shape_cast %82 : vector<1x2x256xf32> to vector<2x256xf32>
    %84 = vector.extract_strided_slice %83 {offsets = [0, 0], sizes = [1, 256], strides = [1, 1]} : vector<2x256xf32> to vector<1x256xf32>
    %85 = vector.extract_strided_slice %83 {offsets = [1, 0], sizes = [1, 256], strides = [1, 1]} : vector<2x256xf32> to vector<1x256xf32>
    %cst_30 = arith.constant dense<0.000000e+00> : vector<4x256xf32>
    %86 = vector.multi_reduction <add>, %81, %cst_30 [1] : vector<4x8x256xf32> to vector<4x256xf32>
    %87 = vector.shape_cast %86 : vector<4x256xf32> to vector<4x1x256xf32>
    %88 = arith.mulf %81, %81 : vector<4x8x256xf32>
    %cst_31 = arith.constant dense<0.000000e+00> : vector<4x256xf32>
    %89 = vector.multi_reduction <add>, %88, %cst_31 [1] : vector<4x8x256xf32> to vector<4x256xf32>
    %90 = vector.shape_cast %89 : vector<4x256xf32> to vector<4x1x256xf32>
    %cst_32 = arith.constant 1.250000e-01 : f32
    %91 = vector.broadcast %cst_32 : f32 to vector<4x1x256xf32>
    %92 = arith.mulf %87, %91 : vector<4x1x256xf32>
    %cst_33 = arith.constant 1.250000e-01 : f32
    %93 = vector.broadcast %cst_33 : f32 to vector<4x1x256xf32>
    %94 = arith.mulf %90, %93 : vector<4x1x256xf32>
    %95 = arith.mulf %92, %92 : vector<4x1x256xf32>
    %96 = arith.subf %94, %95 : vector<4x1x256xf32>
    %cst_34 = arith.constant 0.000000e+00 : f32
    %97 = vector.broadcast %cst_34 : f32 to vector<4x1x256xf32>
    %98 = arith.maximumf %96, %97 : vector<4x1x256xf32>
    %cst_35 = arith.constant 9.99999974E-6 : f32
    %99 = vector.broadcast %cst_35 : f32 to vector<4x1x256xf32>
    %100 = arith.addf %98, %99 : vector<4x1x256xf32>
    %101 = math.rsqrt %100 : vector<4x1x256xf32>
    %102 = vector.shape_cast %84 : vector<1x256xf32> to vector<1x1x256xf32>
    %103 = vector.broadcast %102 : vector<1x1x256xf32> to vector<4x1x256xf32>
    %104 = arith.mulf %103, %101 : vector<4x1x256xf32>
    %105 = arith.mulf %92, %104 : vector<4x1x256xf32>
    %106 = vector.shape_cast %85 : vector<1x256xf32> to vector<1x1x256xf32>
    %107 = vector.broadcast %106 : vector<1x1x256xf32> to vector<4x1x256xf32>
    %108 = arith.subf %107, %105 : vector<4x1x256xf32>
    %109 = vector.broadcast %104 : vector<4x1x256xf32> to vector<4x8x256xf32>
    %110 = arith.mulf %81, %109 : vector<4x8x256xf32>
    %111 = vector.broadcast %108 : vector<4x1x256xf32> to vector<4x8x256xf32>
    %112 = arith.addf %110, %111 : vector<4x8x256xf32>
    %cst_36 = arith.constant 0.000000e+00 : f32
    %113 = vector.broadcast %cst_36 : f32 to vector<4x8x256xf32>
    %114 = arith.maximumf %112, %113 : vector<4x8x256xf32>
    %c0_37 = arith.constant 0 : index
    %c0_38 = arith.constant 0 : index
    %c0_39 = arith.constant 0 : index
    %115 = vector.load %arg8[%c0_37, %c0_38, %c0_39] : memref<3x256x128xbf16, #tpu.memory_space<vmem>>, vector<1x256x128xbf16>
    %116 = vector.shape_cast %115 : vector<1x256x128xbf16> to vector<256x128xbf16>
    %117 = vector.shape_cast %114 : vector<4x8x256xf32> to vector<32x256xf32>
    %118 = arith.truncf %117 : vector<32x256xf32> to vector<32x256xbf16>
    %cst_40 = arith.constant dense<0.000000e+00> : vector<32x128xf32>
    %119 = tpu.matmul %118, %116, %cst_40 {dimension_numbers = #tpu.dot_dimension_numbers<[1], [0], [0], [1], [0, 0, 1, 1], [], []>} : vector<32x256xbf16>, vector<256x128xbf16>, vector<32x128xf32> -> vector<32x128xf32>
    %120 = vector.shape_cast %119 : vector<32x128xf32> to vector<4x8x128xf32>
    %c0_41 = arith.constant 0 : index
    %c0_42 = arith.constant 0 : index
    %c0_43 = arith.constant 0 : index
    %121 = vector.load %arg9[%c0_41, %c0_42, %c0_43] : memref<3x2x128xf32, #tpu.memory_space<vmem>>, vector<1x2x128xf32>
    %122 = vector.shape_cast %121 : vector<1x2x128xf32> to vector<2x128xf32>
    %123 = vector.extract_strided_slice %122 {offsets = [0, 0], sizes = [1, 128], strides = [1, 1]} : vector<2x128xf32> to vector<1x128xf32>
    %124 = vector.extract_strided_slice %122 {offsets = [1, 0], sizes = [1, 128], strides = [1, 1]} : vector<2x128xf32> to vector<1x128xf32>
    %cst_44 = arith.constant dense<0.000000e+00> : vector<4x128xf32>
    %125 = vector.multi_reduction <add>, %120, %cst_44 [1] : vector<4x8x128xf32> to vector<4x128xf32>
    %126 = vector.shape_cast %125 : vector<4x128xf32> to vector<4x1x128xf32>
    %127 = arith.mulf %120, %120 : vector<4x8x128xf32>
    %cst_45 = arith.constant dense<0.000000e+00> : vector<4x128xf32>
    %128 = vector.multi_reduction <add>, %127, %cst_45 [1] : vector<4x8x128xf32> to vector<4x128xf32>
    %129 = vector.shape_cast %128 : vector<4x128xf32> to vector<4x1x128xf32>
    %cst_46 = arith.constant 1.250000e-01 : f32
    %130 = vector.broadcast %cst_46 : f32 to vector<4x1x128xf32>
    %131 = arith.mulf %126, %130 : vector<4x1x128xf32>
    %cst_47 = arith.constant 1.250000e-01 : f32
    %132 = vector.broadcast %cst_47 : f32 to vector<4x1x128xf32>
    %133 = arith.mulf %129, %132 : vector<4x1x128xf32>
    %134 = arith.mulf %131, %131 : vector<4x1x128xf32>
    %135 = arith.subf %133, %134 : vector<4x1x128xf32>
    %cst_48 = arith.constant 0.000000e+00 : f32
    %136 = vector.broadcast %cst_48 : f32 to vector<4x1x128xf32>
    %137 = arith.maximumf %135, %136 : vector<4x1x128xf32>
    %cst_49 = arith.constant 9.99999974E-6 : f32
    %138 = vector.broadcast %cst_49 : f32 to vector<4x1x128xf32>
    %139 = arith.addf %137, %138 : vector<4x1x128xf32>
    %140 = math.rsqrt %139 : vector<4x1x128xf32>
    %141 = vector.shape_cast %123 : vector<1x128xf32> to vector<1x1x128xf32>
    %142 = vector.broadcast %141 : vector<1x1x128xf32> to vector<4x1x128xf32>
    %143 = arith.mulf %142, %140 : vector<4x1x128xf32>
    %144 = arith.mulf %131, %143 : vector<4x1x128xf32>
    %145 = vector.shape_cast %124 : vector<1x128xf32> to vector<1x1x128xf32>
    %146 = vector.broadcast %145 : vector<1x1x128xf32> to vector<4x1x128xf32>
    %147 = arith.subf %146, %144 : vector<4x1x128xf32>
    %148 = vector.broadcast %143 : vector<4x1x128xf32> to vector<4x8x128xf32>
    %149 = arith.mulf %120, %148 : vector<4x8x128xf32>
    %150 = vector.broadcast %147 : vector<4x1x128xf32> to vector<4x8x128xf32>
    %151 = arith.addf %149, %150 : vector<4x8x128xf32>
    %cst_50 = arith.constant 0.000000e+00 : f32
    %152 = vector.broadcast %cst_50 : f32 to vector<4x8x128xf32>
    %153 = arith.maximumf %151, %152 : vector<4x8x128xf32>
    %154 = arith.addf %35, %153 : vector<4x8x128xf32>
    %155 = arith.addf %1, %154 : vector<4x8x128xf32>
    %c1 = arith.constant 1 : index
    %c0_51 = arith.constant 0 : index
    %c0_52 = arith.constant 0 : index
    %156 = vector.load %arg4[%c1, %c0_51, %c0_52] : memref<3x128x256xbf16, #tpu.memory_space<vmem>>, vector<1x128x256xbf16>
    %157 = vector.shape_cast %156 : vector<1x128x256xbf16> to vector<128x256xbf16>
    %158 = vector.shape_cast %155 : vector<4x8x128xf32> to vector<32x128xf32>
    %159 = arith.truncf %158 : vector<32x128xf32> to vector<32x128xbf16>
    %cst_53 = arith.constant dense<0.000000e+00> : vector<32x256xf32>
    %160 = tpu.matmul %159, %157, %cst_53 {dimension_numbers = #tpu.dot_dimension_numbers<[1], [0], [0], [1], [0, 0, 1, 1], [], []>} : vector<32x128xbf16>, vector<128x256xbf16>, vector<32x256xf32> -> vector<32x256xf32>
    %161 = vector.shape_cast %160 : vector<32x256xf32> to vector<4x8x256xf32>
    %c1_54 = arith.constant 1 : index
    %c0_55 = arith.constant 0 : index
    %c0_56 = arith.constant 0 : index
    %162 = vector.load %arg5[%c1_54, %c0_55, %c0_56] : memref<3x2x256xf32, #tpu.memory_space<vmem>>, vector<1x2x256xf32>
    %163 = vector.shape_cast %162 : vector<1x2x256xf32> to vector<2x256xf32>
    %164 = vector.extract_strided_slice %163 {offsets = [0, 0], sizes = [1, 256], strides = [1, 1]} : vector<2x256xf32> to vector<1x256xf32>
    %165 = vector.extract_strided_slice %163 {offsets = [1, 0], sizes = [1, 256], strides = [1, 1]} : vector<2x256xf32> to vector<1x256xf32>
    %cst_57 = arith.constant dense<0.000000e+00> : vector<4x256xf32>
    %166 = vector.multi_reduction <add>, %161, %cst_57 [1] : vector<4x8x256xf32> to vector<4x256xf32>
    %167 = vector.shape_cast %166 : vector<4x256xf32> to vector<4x1x256xf32>
    %168 = arith.mulf %161, %161 : vector<4x8x256xf32>
    %cst_58 = arith.constant dense<0.000000e+00> : vector<4x256xf32>
    %169 = vector.multi_reduction <add>, %168, %cst_58 [1] : vector<4x8x256xf32> to vector<4x256xf32>
    %170 = vector.shape_cast %169 : vector<4x256xf32> to vector<4x1x256xf32>
    %cst_59 = arith.constant 1.250000e-01 : f32
    %171 = vector.broadcast %cst_59 : f32 to vector<4x1x256xf32>
    %172 = arith.mulf %167, %171 : vector<4x1x256xf32>
    %cst_60 = arith.constant 1.250000e-01 : f32
    %173 = vector.broadcast %cst_60 : f32 to vector<4x1x256xf32>
    %174 = arith.mulf %170, %173 : vector<4x1x256xf32>
    %175 = arith.mulf %172, %172 : vector<4x1x256xf32>
    %176 = arith.subf %174, %175 : vector<4x1x256xf32>
    %cst_61 = arith.constant 0.000000e+00 : f32
    %177 = vector.broadcast %cst_61 : f32 to vector<4x1x256xf32>
    %178 = arith.maximumf %176, %177 : vector<4x1x256xf32>
    %cst_62 = arith.constant 9.99999974E-6 : f32
    %179 = vector.broadcast %cst_62 : f32 to vector<4x1x256xf32>
    %180 = arith.addf %178, %179 : vector<4x1x256xf32>
    %181 = math.rsqrt %180 : vector<4x1x256xf32>
    %182 = vector.shape_cast %164 : vector<1x256xf32> to vector<1x1x256xf32>
    %183 = vector.broadcast %182 : vector<1x1x256xf32> to vector<4x1x256xf32>
    %184 = arith.mulf %183, %181 : vector<4x1x256xf32>
    %185 = arith.mulf %172, %184 : vector<4x1x256xf32>
    %186 = vector.shape_cast %165 : vector<1x256xf32> to vector<1x1x256xf32>
    %187 = vector.broadcast %186 : vector<1x1x256xf32> to vector<4x1x256xf32>
    %188 = arith.subf %187, %185 : vector<4x1x256xf32>
    %189 = vector.broadcast %184 : vector<4x1x256xf32> to vector<4x8x256xf32>
    %190 = arith.mulf %161, %189 : vector<4x8x256xf32>
    %191 = vector.broadcast %188 : vector<4x1x256xf32> to vector<4x8x256xf32>
    %192 = arith.addf %190, %191 : vector<4x8x256xf32>
    %cst_63 = arith.constant 0.000000e+00 : f32
    %193 = vector.broadcast %cst_63 : f32 to vector<4x8x256xf32>
    %194 = arith.maximumf %192, %193 : vector<4x8x256xf32>
    %c1_64 = arith.constant 1 : index
    %c0_65 = arith.constant 0 : index
    %c0_66 = arith.constant 0 : index
    %195 = vector.load %arg6[%c1_64, %c0_65, %c0_66] : memref<3x256x256xbf16, #tpu.memory_space<vmem>>, vector<1x256x256xbf16>
    %196 = vector.shape_cast %195 : vector<1x256x256xbf16> to vector<256x256xbf16>
    %197 = vector.shape_cast %194 : vector<4x8x256xf32> to vector<32x256xf32>
    %198 = arith.truncf %197 : vector<32x256xf32> to vector<32x256xbf16>
    %cst_67 = arith.constant dense<0.000000e+00> : vector<32x256xf32>
    %199 = tpu.matmul %198, %196, %cst_67 {dimension_numbers = #tpu.dot_dimension_numbers<[1], [0], [0], [1], [0, 0, 1, 1], [], []>} : vector<32x256xbf16>, vector<256x256xbf16>, vector<32x256xf32> -> vector<32x256xf32>
    %200 = vector.shape_cast %199 : vector<32x256xf32> to vector<4x8x256xf32>
    %c1_68 = arith.constant 1 : index
    %c0_69 = arith.constant 0 : index
    %c0_70 = arith.constant 0 : index
    %201 = vector.load %arg7[%c1_68, %c0_69, %c0_70] : memref<3x2x256xf32, #tpu.memory_space<vmem>>, vector<1x2x256xf32>
    %202 = vector.shape_cast %201 : vector<1x2x256xf32> to vector<2x256xf32>
    %203 = vector.extract_strided_slice %202 {offsets = [0, 0], sizes = [1, 256], strides = [1, 1]} : vector<2x256xf32> to vector<1x256xf32>
    %204 = vector.extract_strided_slice %202 {offsets = [1, 0], sizes = [1, 256], strides = [1, 1]} : vector<2x256xf32> to vector<1x256xf32>
    %cst_71 = arith.constant dense<0.000000e+00> : vector<4x256xf32>
    %205 = vector.multi_reduction <add>, %200, %cst_71 [1] : vector<4x8x256xf32> to vector<4x256xf32>
    %206 = vector.shape_cast %205 : vector<4x256xf32> to vector<4x1x256xf32>
    %207 = arith.mulf %200, %200 : vector<4x8x256xf32>
    %cst_72 = arith.constant dense<0.000000e+00> : vector<4x256xf32>
    %208 = vector.multi_reduction <add>, %207, %cst_72 [1] : vector<4x8x256xf32> to vector<4x256xf32>
    %209 = vector.shape_cast %208 : vector<4x256xf32> to vector<4x1x256xf32>
    %cst_73 = arith.constant 1.250000e-01 : f32
    %210 = vector.broadcast %cst_73 : f32 to vector<4x1x256xf32>
    %211 = arith.mulf %206, %210 : vector<4x1x256xf32>
    %cst_74 = arith.constant 1.250000e-01 : f32
    %212 = vector.broadcast %cst_74 : f32 to vector<4x1x256xf32>
    %213 = arith.mulf %209, %212 : vector<4x1x256xf32>
    %214 = arith.mulf %211, %211 : vector<4x1x256xf32>
    %215 = arith.subf %213, %214 : vector<4x1x256xf32>
    %cst_75 = arith.constant 0.000000e+00 : f32
    %216 = vector.broadcast %cst_75 : f32 to vector<4x1x256xf32>
    %217 = arith.maximumf %215, %216 : vector<4x1x256xf32>
    %cst_76 = arith.constant 9.99999974E-6 : f32
    %218 = vector.broadcast %cst_76 : f32 to vector<4x1x256xf32>
    %219 = arith.addf %217, %218 : vector<4x1x256xf32>
    %220 = math.rsqrt %219 : vector<4x1x256xf32>
    %221 = vector.shape_cast %203 : vector<1x256xf32> to vector<1x1x256xf32>
    %222 = vector.broadcast %221 : vector<1x1x256xf32> to vector<4x1x256xf32>
    %223 = arith.mulf %222, %220 : vector<4x1x256xf32>
    %224 = arith.mulf %211, %223 : vector<4x1x256xf32>
    %225 = vector.shape_cast %204 : vector<1x256xf32> to vector<1x1x256xf32>
    %226 = vector.broadcast %225 : vector<1x1x256xf32> to vector<4x1x256xf32>
    %227 = arith.subf %226, %224 : vector<4x1x256xf32>
    %228 = vector.broadcast %223 : vector<4x1x256xf32> to vector<4x8x256xf32>
    %229 = arith.mulf %200, %228 : vector<4x8x256xf32>
    %230 = vector.broadcast %227 : vector<4x1x256xf32> to vector<4x8x256xf32>
    %231 = arith.addf %229, %230 : vector<4x8x256xf32>
    %cst_77 = arith.constant 0.000000e+00 : f32
    %232 = vector.broadcast %cst_77 : f32 to vector<4x8x256xf32>
    %233 = arith.maximumf %231, %232 : vector<4x8x256xf32>
    %c1_78 = arith.constant 1 : index
    %c0_79 = arith.constant 0 : index
    %c0_80 = arith.constant 0 : index
    %234 = vector.load %arg8[%c1_78, %c0_79, %c0_80] : memref<3x256x128xbf16, #tpu.memory_space<vmem>>, vector<1x256x128xbf16>
    %235 = vector.shape_cast %234 : vector<1x256x128xbf16> to vector<256x128xbf16>
    %236 = vector.shape_cast %233 : vector<4x8x256xf32> to vector<32x256xf32>
    %237 = arith.truncf %236 : vector<32x256xf32> to vector<32x256xbf16>
    %cst_81 = arith.constant dense<0.000000e+00> : vector<32x128xf32>
    %238 = tpu.matmul %237, %235, %cst_81 {dimension_numbers = #tpu.dot_dimension_numbers<[1], [0], [0], [1], [0, 0, 1, 1], [], []>} : vector<32x256xbf16>, vector<256x128xbf16>, vector<32x128xf32> -> vector<32x128xf32>
    %239 = vector.shape_cast %238 : vector<32x128xf32> to vector<4x8x128xf32>
    %c1_82 = arith.constant 1 : index
    %c0_83 = arith.constant 0 : index
    %c0_84 = arith.constant 0 : index
    %240 = vector.load %arg9[%c1_82, %c0_83, %c0_84] : memref<3x2x128xf32, #tpu.memory_space<vmem>>, vector<1x2x128xf32>
    %241 = vector.shape_cast %240 : vector<1x2x128xf32> to vector<2x128xf32>
    %242 = vector.extract_strided_slice %241 {offsets = [0, 0], sizes = [1, 128], strides = [1, 1]} : vector<2x128xf32> to vector<1x128xf32>
    %243 = vector.extract_strided_slice %241 {offsets = [1, 0], sizes = [1, 128], strides = [1, 1]} : vector<2x128xf32> to vector<1x128xf32>
    %cst_85 = arith.constant dense<0.000000e+00> : vector<4x128xf32>
    %244 = vector.multi_reduction <add>, %239, %cst_85 [1] : vector<4x8x128xf32> to vector<4x128xf32>
    %245 = vector.shape_cast %244 : vector<4x128xf32> to vector<4x1x128xf32>
    %246 = arith.mulf %239, %239 : vector<4x8x128xf32>
    %cst_86 = arith.constant dense<0.000000e+00> : vector<4x128xf32>
    %247 = vector.multi_reduction <add>, %246, %cst_86 [1] : vector<4x8x128xf32> to vector<4x128xf32>
    %248 = vector.shape_cast %247 : vector<4x128xf32> to vector<4x1x128xf32>
    %cst_87 = arith.constant 1.250000e-01 : f32
    %249 = vector.broadcast %cst_87 : f32 to vector<4x1x128xf32>
    %250 = arith.mulf %245, %249 : vector<4x1x128xf32>
    %cst_88 = arith.constant 1.250000e-01 : f32
    %251 = vector.broadcast %cst_88 : f32 to vector<4x1x128xf32>
    %252 = arith.mulf %248, %251 : vector<4x1x128xf32>
    %253 = arith.mulf %250, %250 : vector<4x1x128xf32>
    %254 = arith.subf %252, %253 : vector<4x1x128xf32>
    %cst_89 = arith.constant 0.000000e+00 : f32
    %255 = vector.broadcast %cst_89 : f32 to vector<4x1x128xf32>
    %256 = arith.maximumf %254, %255 : vector<4x1x128xf32>
    %cst_90 = arith.constant 9.99999974E-6 : f32
    %257 = vector.broadcast %cst_90 : f32 to vector<4x1x128xf32>
    %258 = arith.addf %256, %257 : vector<4x1x128xf32>
    %259 = math.rsqrt %258 : vector<4x1x128xf32>
    %260 = vector.shape_cast %242 : vector<1x128xf32> to vector<1x1x128xf32>
    %261 = vector.broadcast %260 : vector<1x1x128xf32> to vector<4x1x128xf32>
    %262 = arith.mulf %261, %259 : vector<4x1x128xf32>
    %263 = arith.mulf %250, %262 : vector<4x1x128xf32>
    %264 = vector.shape_cast %243 : vector<1x128xf32> to vector<1x1x128xf32>
    %265 = vector.broadcast %264 : vector<1x1x128xf32> to vector<4x1x128xf32>
    %266 = arith.subf %265, %263 : vector<4x1x128xf32>
    %267 = vector.broadcast %262 : vector<4x1x128xf32> to vector<4x8x128xf32>
    %268 = arith.mulf %239, %267 : vector<4x8x128xf32>
    %269 = vector.broadcast %266 : vector<4x1x128xf32> to vector<4x8x128xf32>
    %270 = arith.addf %268, %269 : vector<4x8x128xf32>
    %cst_91 = arith.constant 0.000000e+00 : f32
    %271 = vector.broadcast %cst_91 : f32 to vector<4x8x128xf32>
    %272 = arith.maximumf %270, %271 : vector<4x8x128xf32>
    %273 = arith.addf %154, %272 : vector<4x8x128xf32>
    %274 = arith.addf %1, %273 : vector<4x8x128xf32>
    %c2 = arith.constant 2 : index
    %c0_92 = arith.constant 0 : index
    %c0_93 = arith.constant 0 : index
    %275 = vector.load %arg4[%c2, %c0_92, %c0_93] : memref<3x128x256xbf16, #tpu.memory_space<vmem>>, vector<1x128x256xbf16>
    %276 = vector.shape_cast %275 : vector<1x128x256xbf16> to vector<128x256xbf16>
    %277 = vector.shape_cast %274 : vector<4x8x128xf32> to vector<32x128xf32>
    %278 = arith.truncf %277 : vector<32x128xf32> to vector<32x128xbf16>
    %cst_94 = arith.constant dense<0.000000e+00> : vector<32x256xf32>
    %279 = tpu.matmul %278, %276, %cst_94 {dimension_numbers = #tpu.dot_dimension_numbers<[1], [0], [0], [1], [0, 0, 1, 1], [], []>} : vector<32x128xbf16>, vector<128x256xbf16>, vector<32x256xf32> -> vector<32x256xf32>
    %280 = vector.shape_cast %279 : vector<32x256xf32> to vector<4x8x256xf32>
    %c2_95 = arith.constant 2 : index
    %c0_96 = arith.constant 0 : index
    %c0_97 = arith.constant 0 : index
    %281 = vector.load %arg5[%c2_95, %c0_96, %c0_97] : memref<3x2x256xf32, #tpu.memory_space<vmem>>, vector<1x2x256xf32>
    %282 = vector.shape_cast %281 : vector<1x2x256xf32> to vector<2x256xf32>
    %283 = vector.extract_strided_slice %282 {offsets = [0, 0], sizes = [1, 256], strides = [1, 1]} : vector<2x256xf32> to vector<1x256xf32>
    %284 = vector.extract_strided_slice %282 {offsets = [1, 0], sizes = [1, 256], strides = [1, 1]} : vector<2x256xf32> to vector<1x256xf32>
    %cst_98 = arith.constant dense<0.000000e+00> : vector<4x256xf32>
    %285 = vector.multi_reduction <add>, %280, %cst_98 [1] : vector<4x8x256xf32> to vector<4x256xf32>
    %286 = vector.shape_cast %285 : vector<4x256xf32> to vector<4x1x256xf32>
    %287 = arith.mulf %280, %280 : vector<4x8x256xf32>
    %cst_99 = arith.constant dense<0.000000e+00> : vector<4x256xf32>
    %288 = vector.multi_reduction <add>, %287, %cst_99 [1] : vector<4x8x256xf32> to vector<4x256xf32>
    %289 = vector.shape_cast %288 : vector<4x256xf32> to vector<4x1x256xf32>
    %cst_100 = arith.constant 1.250000e-01 : f32
    %290 = vector.broadcast %cst_100 : f32 to vector<4x1x256xf32>
    %291 = arith.mulf %286, %290 : vector<4x1x256xf32>
    %cst_101 = arith.constant 1.250000e-01 : f32
    %292 = vector.broadcast %cst_101 : f32 to vector<4x1x256xf32>
    %293 = arith.mulf %289, %292 : vector<4x1x256xf32>
    %294 = arith.mulf %291, %291 : vector<4x1x256xf32>
    %295 = arith.subf %293, %294 : vector<4x1x256xf32>
    %cst_102 = arith.constant 0.000000e+00 : f32
    %296 = vector.broadcast %cst_102 : f32 to vector<4x1x256xf32>
    %297 = arith.maximumf %295, %296 : vector<4x1x256xf32>
    %cst_103 = arith.constant 9.99999974E-6 : f32
    %298 = vector.broadcast %cst_103 : f32 to vector<4x1x256xf32>
    %299 = arith.addf %297, %298 : vector<4x1x256xf32>
    %300 = math.rsqrt %299 : vector<4x1x256xf32>
    %301 = vector.shape_cast %283 : vector<1x256xf32> to vector<1x1x256xf32>
    %302 = vector.broadcast %301 : vector<1x1x256xf32> to vector<4x1x256xf32>
    %303 = arith.mulf %302, %300 : vector<4x1x256xf32>
    %304 = arith.mulf %291, %303 : vector<4x1x256xf32>
    %305 = vector.shape_cast %284 : vector<1x256xf32> to vector<1x1x256xf32>
    %306 = vector.broadcast %305 : vector<1x1x256xf32> to vector<4x1x256xf32>
    %307 = arith.subf %306, %304 : vector<4x1x256xf32>
    %308 = vector.broadcast %303 : vector<4x1x256xf32> to vector<4x8x256xf32>
    %309 = arith.mulf %280, %308 : vector<4x8x256xf32>
    %310 = vector.broadcast %307 : vector<4x1x256xf32> to vector<4x8x256xf32>
    %311 = arith.addf %309, %310 : vector<4x8x256xf32>
    %cst_104 = arith.constant 0.000000e+00 : f32
    %312 = vector.broadcast %cst_104 : f32 to vector<4x8x256xf32>
    %313 = arith.maximumf %311, %312 : vector<4x8x256xf32>
    %c2_105 = arith.constant 2 : index
    %c0_106 = arith.constant 0 : index
    %c0_107 = arith.constant 0 : index
    %314 = vector.load %arg6[%c2_105, %c0_106, %c0_107] : memref<3x256x256xbf16, #tpu.memory_space<vmem>>, vector<1x256x256xbf16>
    %315 = vector.shape_cast %314 : vector<1x256x256xbf16> to vector<256x256xbf16>
    %316 = vector.shape_cast %313 : vector<4x8x256xf32> to vector<32x256xf32>
    %317 = arith.truncf %316 : vector<32x256xf32> to vector<32x256xbf16>
    %cst_108 = arith.constant dense<0.000000e+00> : vector<32x256xf32>
    %318 = tpu.matmul %317, %315, %cst_108 {dimension_numbers = #tpu.dot_dimension_numbers<[1], [0], [0], [1], [0, 0, 1, 1], [], []>} : vector<32x256xbf16>, vector<256x256xbf16>, vector<32x256xf32> -> vector<32x256xf32>
    %319 = vector.shape_cast %318 : vector<32x256xf32> to vector<4x8x256xf32>
    %c2_109 = arith.constant 2 : index
    %c0_110 = arith.constant 0 : index
    %c0_111 = arith.constant 0 : index
    %320 = vector.load %arg7[%c2_109, %c0_110, %c0_111] : memref<3x2x256xf32, #tpu.memory_space<vmem>>, vector<1x2x256xf32>
    %321 = vector.shape_cast %320 : vector<1x2x256xf32> to vector<2x256xf32>
    %322 = vector.extract_strided_slice %321 {offsets = [0, 0], sizes = [1, 256], strides = [1, 1]} : vector<2x256xf32> to vector<1x256xf32>
    %323 = vector.extract_strided_slice %321 {offsets = [1, 0], sizes = [1, 256], strides = [1, 1]} : vector<2x256xf32> to vector<1x256xf32>
    %cst_112 = arith.constant dense<0.000000e+00> : vector<4x256xf32>
    %324 = vector.multi_reduction <add>, %319, %cst_112 [1] : vector<4x8x256xf32> to vector<4x256xf32>
    %325 = vector.shape_cast %324 : vector<4x256xf32> to vector<4x1x256xf32>
    %326 = arith.mulf %319, %319 : vector<4x8x256xf32>
    %cst_113 = arith.constant dense<0.000000e+00> : vector<4x256xf32>
    %327 = vector.multi_reduction <add>, %326, %cst_113 [1] : vector<4x8x256xf32> to vector<4x256xf32>
    %328 = vector.shape_cast %327 : vector<4x256xf32> to vector<4x1x256xf32>
    %cst_114 = arith.constant 1.250000e-01 : f32
    %329 = vector.broadcast %cst_114 : f32 to vector<4x1x256xf32>
    %330 = arith.mulf %325, %329 : vector<4x1x256xf32>
    %cst_115 = arith.constant 1.250000e-01 : f32
    %331 = vector.broadcast %cst_115 : f32 to vector<4x1x256xf32>
    %332 = arith.mulf %328, %331 : vector<4x1x256xf32>
    %333 = arith.mulf %330, %330 : vector<4x1x256xf32>
    %334 = arith.subf %332, %333 : vector<4x1x256xf32>
    %cst_116 = arith.constant 0.000000e+00 : f32
    %335 = vector.broadcast %cst_116 : f32 to vector<4x1x256xf32>
    %336 = arith.maximumf %334, %335 : vector<4x1x256xf32>
    %cst_117 = arith.constant 9.99999974E-6 : f32
    %337 = vector.broadcast %cst_117 : f32 to vector<4x1x256xf32>
    %338 = arith.addf %336, %337 : vector<4x1x256xf32>
    %339 = math.rsqrt %338 : vector<4x1x256xf32>
    %340 = vector.shape_cast %322 : vector<1x256xf32> to vector<1x1x256xf32>
    %341 = vector.broadcast %340 : vector<1x1x256xf32> to vector<4x1x256xf32>
    %342 = arith.mulf %341, %339 : vector<4x1x256xf32>
    %343 = arith.mulf %330, %342 : vector<4x1x256xf32>
    %344 = vector.shape_cast %323 : vector<1x256xf32> to vector<1x1x256xf32>
    %345 = vector.broadcast %344 : vector<1x1x256xf32> to vector<4x1x256xf32>
    %346 = arith.subf %345, %343 : vector<4x1x256xf32>
    %347 = vector.broadcast %342 : vector<4x1x256xf32> to vector<4x8x256xf32>
    %348 = arith.mulf %319, %347 : vector<4x8x256xf32>
    %349 = vector.broadcast %346 : vector<4x1x256xf32> to vector<4x8x256xf32>
    %350 = arith.addf %348, %349 : vector<4x8x256xf32>
    %cst_118 = arith.constant 0.000000e+00 : f32
    %351 = vector.broadcast %cst_118 : f32 to vector<4x8x256xf32>
    %352 = arith.maximumf %350, %351 : vector<4x8x256xf32>
    %c2_119 = arith.constant 2 : index
    %c0_120 = arith.constant 0 : index
    %c0_121 = arith.constant 0 : index
    %353 = vector.load %arg8[%c2_119, %c0_120, %c0_121] : memref<3x256x128xbf16, #tpu.memory_space<vmem>>, vector<1x256x128xbf16>
    %354 = vector.shape_cast %353 : vector<1x256x128xbf16> to vector<256x128xbf16>
    %355 = vector.shape_cast %352 : vector<4x8x256xf32> to vector<32x256xf32>
    %356 = arith.truncf %355 : vector<32x256xf32> to vector<32x256xbf16>
    %cst_122 = arith.constant dense<0.000000e+00> : vector<32x128xf32>
    %357 = tpu.matmul %356, %354, %cst_122 {dimension_numbers = #tpu.dot_dimension_numbers<[1], [0], [0], [1], [0, 0, 1, 1], [], []>} : vector<32x256xbf16>, vector<256x128xbf16>, vector<32x128xf32> -> vector<32x128xf32>
    %358 = vector.shape_cast %357 : vector<32x128xf32> to vector<4x8x128xf32>
    %c2_123 = arith.constant 2 : index
    %c0_124 = arith.constant 0 : index
    %c0_125 = arith.constant 0 : index
    %359 = vector.load %arg9[%c2_123, %c0_124, %c0_125] : memref<3x2x128xf32, #tpu.memory_space<vmem>>, vector<1x2x128xf32>
    %360 = vector.shape_cast %359 : vector<1x2x128xf32> to vector<2x128xf32>
    %361 = vector.extract_strided_slice %360 {offsets = [0, 0], sizes = [1, 128], strides = [1, 1]} : vector<2x128xf32> to vector<1x128xf32>
    %362 = vector.extract_strided_slice %360 {offsets = [1, 0], sizes = [1, 128], strides = [1, 1]} : vector<2x128xf32> to vector<1x128xf32>
    %cst_126 = arith.constant dense<0.000000e+00> : vector<4x128xf32>
    %363 = vector.multi_reduction <add>, %358, %cst_126 [1] : vector<4x8x128xf32> to vector<4x128xf32>
    %364 = vector.shape_cast %363 : vector<4x128xf32> to vector<4x1x128xf32>
    %365 = arith.mulf %358, %358 : vector<4x8x128xf32>
    %cst_127 = arith.constant dense<0.000000e+00> : vector<4x128xf32>
    %366 = vector.multi_reduction <add>, %365, %cst_127 [1] : vector<4x8x128xf32> to vector<4x128xf32>
    %367 = vector.shape_cast %366 : vector<4x128xf32> to vector<4x1x128xf32>
    %cst_128 = arith.constant 1.250000e-01 : f32
    %368 = vector.broadcast %cst_128 : f32 to vector<4x1x128xf32>
    %369 = arith.mulf %364, %368 : vector<4x1x128xf32>
    %cst_129 = arith.constant 1.250000e-01 : f32
    %370 = vector.broadcast %cst_129 : f32 to vector<4x1x128xf32>
    %371 = arith.mulf %367, %370 : vector<4x1x128xf32>
    %372 = arith.mulf %369, %369 : vector<4x1x128xf32>
    %373 = arith.subf %371, %372 : vector<4x1x128xf32>
    %cst_130 = arith.constant 0.000000e+00 : f32
    %374 = vector.broadcast %cst_130 : f32 to vector<4x1x128xf32>
    %375 = arith.maximumf %373, %374 : vector<4x1x128xf32>
    %cst_131 = arith.constant 9.99999974E-6 : f32
    %376 = vector.broadcast %cst_131 : f32 to vector<4x1x128xf32>
    %377 = arith.addf %375, %376 : vector<4x1x128xf32>
    %378 = math.rsqrt %377 : vector<4x1x128xf32>
    %379 = vector.shape_cast %361 : vector<1x128xf32> to vector<1x1x128xf32>
    %380 = vector.broadcast %379 : vector<1x1x128xf32> to vector<4x1x128xf32>
    %381 = arith.mulf %380, %378 : vector<4x1x128xf32>
    %382 = arith.mulf %369, %381 : vector<4x1x128xf32>
    %383 = vector.shape_cast %362 : vector<1x128xf32> to vector<1x1x128xf32>
    %384 = vector.broadcast %383 : vector<1x1x128xf32> to vector<4x1x128xf32>
    %385 = arith.subf %384, %382 : vector<4x1x128xf32>
    %386 = vector.broadcast %381 : vector<4x1x128xf32> to vector<4x8x128xf32>
    %387 = arith.mulf %358, %386 : vector<4x8x128xf32>
    %388 = vector.broadcast %385 : vector<4x1x128xf32> to vector<4x8x128xf32>
    %389 = arith.addf %387, %388 : vector<4x8x128xf32>
    %cst_132 = arith.constant 0.000000e+00 : f32
    %390 = vector.broadcast %cst_132 : f32 to vector<4x8x128xf32>
    %391 = arith.maximumf %389, %390 : vector<4x8x128xf32>
    %392 = arith.addf %273, %391 : vector<4x8x128xf32>
    %c0_133 = arith.constant 0 : index
    %c0_134 = arith.constant 0 : index
    %393 = vector.load %arg10[%c0_133, %c0_134] : memref<4x128xf32, #tpu.memory_space<vmem>>, vector<4x128xf32>
    %394 = tpu.iota {dimensions = array<i32: 2>} : vector<4x8x4xi32>
    %cst_135 = arith.constant 0.000000e+00 : f32
    %395 = vector.broadcast %cst_135 : f32 to vector<4x8x4xf32>
    %396 = vector.extract_strided_slice %393 {offsets = [0, 0], sizes = [1, 128], strides = [1, 1]} : vector<4x128xf32> to vector<1x128xf32>
    %397 = vector.shape_cast %396 : vector<1x128xf32> to vector<1x1x128xf32>
    %398 = vector.broadcast %397 : vector<1x1x128xf32> to vector<4x8x128xf32>
    %399 = arith.mulf %392, %398 : vector<4x8x128xf32>
    %cst_136 = arith.constant dense<0.000000e+00> : vector<4x8xf32>
    %400 = vector.multi_reduction <add>, %399, %cst_136 [2] : vector<4x8x128xf32> to vector<4x8xf32>
    %401 = vector.shape_cast %400 : vector<4x8xf32> to vector<4x8x1xf32>
    %c0_i32 = arith.constant 0 : i32
    %402 = vector.broadcast %c0_i32 : i32 to vector<4x8x4xi32>
    %403 = arith.cmpi eq, %394, %402 : vector<4x8x4xi32>
    %404 = vector.shape_cast %401 : vector<4x8x1xf32> to vector<4x8x1xf32>
    %405 = vector.broadcast %404 : vector<4x8x1xf32> to vector<4x8x4xf32>
    %406 = arith.select %403, %405, %395 : vector<4x8x4xi1>, vector<4x8x4xf32>
    %407 = vector.extract_strided_slice %393 {offsets = [1, 0], sizes = [1, 128], strides = [1, 1]} : vector<4x128xf32> to vector<1x128xf32>
    %408 = vector.shape_cast %407 : vector<1x128xf32> to vector<1x1x128xf32>
    %409 = vector.broadcast %408 : vector<1x1x128xf32> to vector<4x8x128xf32>
    %410 = arith.mulf %392, %409 : vector<4x8x128xf32>
    %cst_137 = arith.constant dense<0.000000e+00> : vector<4x8xf32>
    %411 = vector.multi_reduction <add>, %410, %cst_137 [2] : vector<4x8x128xf32> to vector<4x8xf32>
    %412 = vector.shape_cast %411 : vector<4x8xf32> to vector<4x8x1xf32>
    %c1_i32 = arith.constant 1 : i32
    %413 = vector.broadcast %c1_i32 : i32 to vector<4x8x4xi32>
    %414 = arith.cmpi eq, %394, %413 : vector<4x8x4xi32>
    %415 = vector.shape_cast %412 : vector<4x8x1xf32> to vector<4x8x1xf32>
    %416 = vector.broadcast %415 : vector<4x8x1xf32> to vector<4x8x4xf32>
    %417 = arith.select %414, %416, %406 : vector<4x8x4xi1>, vector<4x8x4xf32>
    %418 = vector.extract_strided_slice %393 {offsets = [2, 0], sizes = [1, 128], strides = [1, 1]} : vector<4x128xf32> to vector<1x128xf32>
    %419 = vector.shape_cast %418 : vector<1x128xf32> to vector<1x1x128xf32>
    %420 = vector.broadcast %419 : vector<1x1x128xf32> to vector<4x8x128xf32>
    %421 = arith.mulf %392, %420 : vector<4x8x128xf32>
    %cst_138 = arith.constant dense<0.000000e+00> : vector<4x8xf32>
    %422 = vector.multi_reduction <add>, %421, %cst_138 [2] : vector<4x8x128xf32> to vector<4x8xf32>
    %423 = vector.shape_cast %422 : vector<4x8xf32> to vector<4x8x1xf32>
    %c2_i32 = arith.constant 2 : i32
    %424 = vector.broadcast %c2_i32 : i32 to vector<4x8x4xi32>
    %425 = arith.cmpi eq, %394, %424 : vector<4x8x4xi32>
    %426 = vector.shape_cast %423 : vector<4x8x1xf32> to vector<4x8x1xf32>
    %427 = vector.broadcast %426 : vector<4x8x1xf32> to vector<4x8x4xf32>
    %428 = arith.select %425, %427, %417 : vector<4x8x4xi1>, vector<4x8x4xf32>
    %429 = vector.extract_strided_slice %393 {offsets = [3, 0], sizes = [1, 128], strides = [1, 1]} : vector<4x128xf32> to vector<1x128xf32>
    %430 = vector.shape_cast %429 : vector<1x128xf32> to vector<1x1x128xf32>
    %431 = vector.broadcast %430 : vector<1x1x128xf32> to vector<4x8x128xf32>
    %432 = arith.mulf %392, %431 : vector<4x8x128xf32>
    %cst_139 = arith.constant dense<0.000000e+00> : vector<4x8xf32>
    %433 = vector.multi_reduction <add>, %432, %cst_139 [2] : vector<4x8x128xf32> to vector<4x8xf32>
    %434 = vector.shape_cast %433 : vector<4x8xf32> to vector<4x8x1xf32>
    %c3_i32 = arith.constant 3 : i32
    %435 = vector.broadcast %c3_i32 : i32 to vector<4x8x4xi32>
    %436 = arith.cmpi eq, %394, %435 : vector<4x8x4xi32>
    %437 = vector.shape_cast %434 : vector<4x8x1xf32> to vector<4x8x1xf32>
    %438 = vector.broadcast %437 : vector<4x8x1xf32> to vector<4x8x4xf32>
    %439 = arith.select %436, %438, %428 : vector<4x8x4xi1>, vector<4x8x4xf32>
    %c0_140 = arith.constant 0 : index
    %c0_141 = arith.constant 0 : index
    %440 = vector.load %arg11[%c0_140, %c0_141] : memref<1x4xf32, #tpu.memory_space<vmem>>, vector<1x4xf32>
    %441 = vector.shape_cast %440 : vector<1x4xf32> to vector<1x1x4xf32>
    %442 = vector.broadcast %441 : vector<1x1x4xf32> to vector<4x8x4xf32>
    %443 = arith.addf %439, %442 : vector<4x8x4xf32>
    %444 = arith.subf %443, %0 : vector<4x8x4xf32>
    %c0_142 = arith.constant 0 : index
    %c0_143 = arith.constant 0 : index
    %c0_144 = arith.constant 0 : index
    %445 = vector.load %arg12[%c0_142, %c0_143, %c0_144] : memref<4x8x4xf32, #tpu.memory_space<vmem>>, vector<4x8x4xf32>
    tpu.vector_store %arg12[%c0_142, %c0_143, %c0_144], %444 {strides = array<i32>} : memref<4x8x4xf32, #tpu.memory_space<vmem>>, vector<4x8x4xf32>,
    return
  }
}

</mosaic_0001>

<bundles_post_ra>
// kernel: net_forward.1
= control target key start
LH: loop header
LB: loop body
LE: loop exit
PB: predicated region body
PF: predicated region fallthrough
CT: control target
= control target key end

     0   :  { %17 = vsyncpa [#allocation3], 0  ;;  %s7568_s0 = inlined_call_operand.vmem [shape: f32[4,8,4], index: 0, kind: input, shape index: {}]   ;;  %s7569_s1 = inlined_call_operand.vmem [shape: f32[4,8,128], index: 1, kind: input, shape index: {}]   ;;  %s7570_s2 = inlined_call_operand.hbm [shape: f32[4,128], index: 2, kind: input, shape index: {}]   ;;  %s7571_s3 = inlined_call_operand.hbm [shape: f32[1,128], index: 3, kind: input, shape index: {}]   ;;  %s7572_s4 = inlined_call_operand.hbm [shape: bf16[3,128,256], index: 4, kind: input, shape index: {}]   ;;  %s7573_s5 = inlined_call_operand.hbm [shape: f32[3,2,256], index: 5, kind: input, shape index: {}]   ;;  %s7574_s6 = inlined_call_operand.hbm [shape: bf16[3,256,256], index: 6, kind: input, shape index: {}]   ;;  %s7575_s7 = inlined_call_operand.hbm [shape: f32[3,2,256], index: 7, kind: input, shape index: {}]   ;;  %s7576_s8 = inlined_call_operand.hbm [shape: bf16[3,256,128], index: 8, kind: input, shape index: {}]   ;;  %s7577_s9 = inlined_call_operand.hbm [shape: f32[3,2,128], index: 9, kind: input, shape index: {}]   ;;  %s7578_s10 = inlined_call_operand.hbm [shape: f32[4,128], index: 10, kind: input, shape index: {}]   ;;  %s7579_s11 = inlined_call_operand.hbm [shape: f32[1,4], index: 11, kind: input, shape index: {}]   ;;  %s7580_s12 = inlined_call_operand.vmem [shape: f32[4,8,4], index: 12, kind: output, shape index: {}]  }
   0x1   :  { %18 = vsyncpa [#allocation5], 0 }
   0x2   :  { %19 = vsyncpa [#allocation8], 0 }
   0x3   :  { %20 = vsyncpa [#allocation11], 0 }
   0x4   :  { %21 = vsyncpa [#allocation14], 0 }
   0x5   :  { %22 = vsyncpa [#allocation17], 0  ;;  %s6239_s21 = smov [#allocation4]   ;;  %s6240_s23 = smov [#allocation7]  }
   0x6   :  { %s43_s22 = sshll.u32 %s6239_s21, 4  ;;  %s64_s24 = sshll.u32 %s6240_s23, 4  ;;  %s44_s22 = int_to_ptr.vmem [resolvable:$true] %s43_s22  ;;  %s65_s24 = int_to_ptr.vmem [resolvable:$true] %s64_s24 }
   0x7   :  { %s6035_s25 = scalar_lea.vmem %s44_s22, 16  ;;  %s6039_s26 = scalar_lea.vmem %s44_s22, 32 }
   0x8   :  { %p6036_p0 = scmp.ne.s32.totalorder %s44_s22, %s6035_s25  ;;  %p6040_p1 = scmp.lt.s32.totalorder %s44_s22, %s44_s22 }
   0x9   :  { %p6041_p2 = scmp.lt.s32.totalorder %s6039_s26, %s6035_s25 }
   0xb   :  { %p6042_p3 = por %p6041_p2, %p6040_p1 }
   0xd   :  { %p6043_p4 = pnand %p6042_p3, %p6036_p0 }
   0xf   :  { %6046 = shalt.err (!%p6043_p4)
}
  0x10   :  { %46 = dma.hbm_to_vmem [thread:$0]  %s7571_s3, 16, %s44_s22, [#allocation5]  }
  0x11   :  { %s6055_s29 = scalar_lea.vmem %s65_s24, 192  ;;  %p6060_p6 = scmp.lt.s32.totalorder %s65_s24, %s65_s24 }
  0x12   :  { %p6056_p5 = scmp.ne.s32.totalorder %s65_s24, %s6055_s29  ;;  %p6061_p7 = scmp.lt.s32.totalorder %s6055_s29, %s6055_s29 }
  0x14   :  { %p6062_p8 = por %p6061_p7, %p6060_p6 }
  0x16   :  { %p6063_p9 = pnand %p6062_p8, %p6056_p5 }
  0x18   :  { %6066 = shalt.err (!%p6063_p9)
}
  0x19   :  { %s6241_s30 = smov 64   ;;  %s6242_s13 = smov 4  }
  0x1a   :  { %70 = dma.hbm_to_vmem [thread:$0]  %s7573_s5, 192, %s65_s24, [#allocation8], %s6241_s30, %s6241_s30, %s6242_s13  }
  0x1b   :  { %s6243_s16 = smov [#allocation10]   ;;  %s6244_s18 = smov [#allocation13]  }
  0x1c   :  { %s88_s17 = sshll.u32 %s6243_s16, 4  ;;  %s112_s3 = sshll.u32 %s6244_s18, 4  ;;  %s89_s17 = int_to_ptr.vmem [resolvable:$true] %s88_s17  ;;  %s113_s3 = int_to_ptr.vmem [resolvable:$true] %s112_s3 }
  0x1d   :  { %s6075_s19 = scalar_lea.vmem %s89_s17, 192  ;;  %p6080_p11 = scmp.lt.s32.totalorder %s89_s17, %s89_s17 }
  0x1e   :  { %p6076_p10 = scmp.ne.s32.totalorder %s89_s17, %s6075_s19  ;;  %p6081_p12 = scmp.lt.s32.totalorder %s6075_s19, %s6075_s19 }
  0x20   :  { %p6082_p13 = por %p6081_p12, %p6080_p11 }
  0x22   :  { %p6083_p0 = pnand %p6082_p13, %p6076_p10 }
  0x24   :  { %6086 = shalt.err (!%p6083_p0)
}
  0x25   :  { %94 = dma.hbm_to_vmem [thread:$0]  %s7575_s7, 192, %s89_s17, [#allocation11], %s6241_s30, %s6241_s30, %s6242_s13  }
  0x26   :  { %s6095_s5 = scalar_lea.vmem %s113_s3, 96  ;;  %p6100_p2 = scmp.lt.s32.totalorder %s113_s3, %s113_s3 }
  0x27   :  { %p6096_p1 = scmp.ne.s32.totalorder %s113_s3, %s6095_s5  ;;  %p6101_p3 = scmp.lt.s32.totalorder %s6095_s5, %s6095_s5 }
  0x29   :  { %p6102_p4 = por %p6101_p3, %p6100_p2 }
  0x2b   :  { %p6103_p5 = pnand %p6102_p4, %p6096_p1 }
  0x2d   :  { %6106 = shalt.err (!%p6103_p5)
}
  0x2e   :  { %s6245_s22 = smov 32   ;;  %s6246_s23 = smov 2  }
  0x2f   :  { %118 = dma.hbm_to_vmem [thread:$0]  %s7577_s9, 96, %s113_s3, [#allocation14], %s6245_s22, %s6245_s22, %s6246_s23  }
  0x30   :  { %s6247_s26 = smov [#allocation2]   ;;  %s6248_s28 = smov [#allocation6]  }
  0x31   :  { %s33_s27 = sshll.u32 %s6247_s26, 4  ;;  %s52_s29 = sshll.u32 %s6248_s28, 4  ;;  %s34_s27 = int_to_ptr.vmem [resolvable:$true] %s33_s27  ;;  %s53_s29 = int_to_ptr.vmem [resolvable:$true] %s52_s29 }
  0x32   :  { %s6115_s7 = scalar_lea.vmem %s34_s27, 64  ;;  %p6120_p7 = scmp.lt.s32.totalorder %s34_s27, %s34_s27 }
  0x33   :  { %p6116_p6 = scmp.ne.s32.totalorder %s34_s27, %s6115_s7  ;;  %p6121_p8 = scmp.lt.s32.totalorder %s6115_s7, %s6115_s7 }
  0x35   :  { %p6122_p9 = por %p6121_p8, %p6120_p7 }
  0x37   :  { %p6123_p10 = pnand %p6122_p9, %p6116_p6 }
  0x39   :  { %6126 = shalt.err (!%p6123_p10)
}
  0x3a   :  { %36 = dma.hbm_to_vmem [thread:$0]  %s7570_s2, 64, %s34_s27, [#allocation3]  }
  0x3b   :  { %s6135_s16 = scalar_lea.vmem %s53_s29, 6144  ;;  %p6140_p12 = scmp.lt.s32.totalorder %s53_s29, %s53_s29 }
  0x3c   :  { %p6136_p11 = scmp.ne.s32.totalorder %s53_s29, %s6135_s16  ;;  %p6141_p13 = scmp.lt.s32.totalorder %s6135_s16, %s6135_s16 }
  0x3e   :  { %p6142_p0 = por %p6141_p13, %p6140_p12 }
  0x40   :  { %p6143_p1 = pnand %p6142_p0, %p6136_p11 }
  0x42   :  { %6146 = shalt.err (!%p6143_p1)
}
  0x43   :  { %s6249_s9 = smov 128   ;;  %s6250_s17 = smov 8  }
  0x44   :  { %58 = dma.hbm_to_vmem [thread:$0]  %s7572_s4, 6144, %s53_s29, [#allocation5], %s6249_s9, %s6249_s9, %s6250_s17  }
  0x45   :  { %s6251_s19 = smov [#allocation9]   ;;  %s6252_s21 = smov [#allocation12]  }
  0x46   :  { %s76_s20 = sshll.u32 %s6251_s19, 4  ;;  %s100_s5 = sshll.u32 %s6252_s21, 4  ;;  %s77_s20 = int_to_ptr.vmem [resolvable:$true] %s76_s20  ;;  %s101_s5 = int_to_ptr.vmem [resolvable:$true] %s100_s5 }
  0x47   :  { %s6155_s2 = scalar_lea.vmem %s77_s20, 12288  ;;  %p6160_p3 = scmp.lt.s32.totalorder %s77_s20, %s77_s20 }
  0x48   :  { %p6156_p2 = scmp.ne.s32.totalorder %s77_s20, %s6155_s2  ;;  %p6161_p4 = scmp.lt.s32.totalorder %s6155_s2, %s6155_s2 }
  0x4a   :  { %p6162_p5 = por %p6161_p4, %p6160_p3 }
  0x4c   :  { %p6163_p6 = pnand %p6162_p5, %p6156_p2 }
  0x4e   :  { %6166 = shalt.err (!%p6163_p6)
}
  0x4f   :  { %82 = dma.hbm_to_vmem [thread:$0]  %s7574_s6, 12288, %s77_s20, [#allocation8], %s6249_s9, %s6249_s9, %s6250_s17  }
  0x50   :  { %s6175_s24 = scalar_lea.vmem %s101_s5, 6144  ;;  %p6180_p8 = scmp.lt.s32.totalorder %s101_s5, %s101_s5 }
  0x51   :  { %p6176_p7 = scmp.ne.s32.totalorder %s101_s5, %s6175_s24  ;;  %p6181_p9 = scmp.lt.s32.totalorder %s6175_s24, %s6175_s24 }
  0x53   :  { %p6182_p10 = por %p6181_p9, %p6180_p8 }
  0x55   :  { %p6183_p11 = pnand %p6182_p10, %p6176_p7 }
  0x57   :  { %6186 = shalt.err (!%p6183_p11)
}
  0x58   :  { %106 = dma.hbm_to_vmem [thread:$0]  %s7576_s8, 6144, %s101_s5, [#allocation11], %s6241_s30, %s6241_s30, %s6242_s13  }
  0x59   :  { %s6253_s26 = smov [#allocation15]   ;;  %s6254_s28 = smov [#allocation16]  }
  0x5a   :  { %s125_s27 = sshll.u32 %s6253_s26, 4  ;;  %s135_s29 = sshll.u32 %s6254_s28, 4  ;;  %s126_s27 = int_to_ptr.vmem [resolvable:$true] %s125_s27  ;;  %s136_s29 = int_to_ptr.vmem [resolvable:$true] %s135_s29 }
  0x5b   :  { %s6195_s6 = scalar_lea.vmem %s126_s27, 64  ;;  %p6200_p13 = scmp.lt.s32.totalorder %s126_s27, %s126_s27 }
  0x5c   :  { %p6196_p12 = scmp.ne.s32.totalorder %s126_s27, %s6195_s6  ;;  %p6201_p0 = scmp.lt.s32.totalorder %s6195_s6, %s6195_s6 }
  0x5e   :  { %p6202_p1 = por %p6201_p0, %p6200_p13 }
  0x60   :  { %p6203_p2 = pnand %p6202_p1, %p6196_p12 }
  0x62   :  { %6206 = shalt.err (!%p6203_p2)
}
  0x63   :  { %128 = dma.hbm_to_vmem [thread:$0]  %s7578_s10, 64, %s126_s27, [#allocation14]  }
  0x64   :  { %s6215_s15 = scalar_lea.vmem %s136_s29, 16  ;;  %s6219_s8 = scalar_lea.vmem %s136_s29, 32 }
  0x65   :  { %p6216_p3 = scmp.ne.s32.totalorder %s136_s29, %s6215_s15  ;;  %p6220_p4 = scmp.lt.s32.totalorder %s136_s29, %s136_s29 }
  0x66   :  { %p6221_p5 = scmp.lt.s32.totalorder %s6219_s8, %s6215_s15 }
  0x68   :  { %p6222_p6 = por %p6221_p5, %p6220_p4 }
  0x6a   :  { %p6223_p7 = pnand %p6222_p6, %p6216_p3 }
  0x6c   :  { %6226 = shalt.err (!%p6223_p7)
}
  0x6d   :  { %138 = dma.hbm_to_vmem [thread:$0]  %s7579_s11, 16, %s136_s29, [#allocation17]  }
  0x6e   :  { %6227 = dma.done.wait [#allocation3], 64  }
  0x6f   :  { %6228 = vsyncadd [#allocation3], 4294967232 }
  0x70   :  { %6229 = dma.done.wait [#allocation5], 6160  }
  0x71   :  { %6230 = vsyncadd [#allocation5], 4294961136 }
  0x72   :  { %6231 = dma.done.wait [#allocation8], 12480  }
  0x73   :  { %6232 = vsyncadd [#allocation8], 4294954816 }
  0x74   :  { %6233 = dma.done.wait [#allocation11], 6336  }
  0x75   :  { %6234 = vsyncadd [#allocation11], 4294960960 }
  0x76   :  { %6235 = dma.done.wait [#allocation14], 160  }
  0x77   :  { %6236 = vsyncadd [#allocation14], 4294967136 }
  0x78   :  { %6237 = dma.done.wait [#allocation17], 16  }
  0x79   :  { %6238 = vsyncadd [#allocation17], 4294967280  ;;  %v6255_v0 = vmov 1   ;;  %v6256_v1 = vmov 0   ;;  %v170_v2 = vld [vmem:[%s7568_s0] sm:$0xff]  ;;  %v171_v3 = vld [vmem:[%s7568_s0 + $0x8] sm:$0xff]  ;;  %v199_v24 = vlaneseq }
  0x7a   :  { %5619 = vset.pattern.permute.xlu1 %v6255_v0  ;;  %5618 = vset.pattern.permute.xlu0 %v6256_v1  ;;  %v5631_v4 = vld [vmem:[#allocation6 + $0x74] ss:$8 sps:$4 sm:$0xff]   ;;  %v5633_v5 = vld [vmem:[#allocation6 + $0x70] ss:$8 sps:$4 sm:$0xff]   ;;  %v5634_v6 = vld [vmem:[#allocation6 + $0x64] ss:$8 sps:$4 sm:$0xff]  }
  0x7b   :  { %440 = vmatprep.mubr.bf16.mxu0 %v6256_v1  ;;  %219 = vperm.xlu1 %5619, %v170_v2   ;;  %v5636_v7 = vld [vmem:[#allocation6 + $0x60] ss:$8 sps:$4 sm:$0xff]   ;;  %v5637_v8 = vld [vmem:[#allocation6 + $0x54] ss:$8 sps:$4 sm:$0xff]   ;;  %v6257_v9 = vmov 2   ;;  %v6258_v12 = vmov 3  }
  0x7c   :  { %181 = vperm.xlu0 %5618, %v170_v2   ;;  %408 = vmatprep.subr.bf16.mxu0 %v5631_v4  ;;  %v5639_v10 = vld [vmem:[#allocation6 + $0x50] ss:$8 sps:$4 sm:$0xff]   ;;  %v5640_v11 = vld [vmem:[#allocation6 + $0x44] ss:$8 sps:$4 sm:$0xff]   ;;  %v5642_v14 = vld [vmem:[#allocation6 + $0x40] ss:$8 sps:$4 sm:$0xff]  }
  0x7d   :  { %409 = vmatpush1.bf16.msra.mxu0 %v5633_v5  ;;  %v172_v13 = vld [vmem:[%s7568_s0 + $0x10] sm:$0xff]  ;;  %v5643_v15 = vld [vmem:[#allocation6 + $0x34] ss:$8 sps:$4 sm:$0xff]   ;;  %v6380_v25 = vshrl.u32 %v199_v24, 7  ;;  %v175_v61 = vld [vmem:[%s7569_s1 + $0x8] sm:$0xff]  ;;  %vm5304_vm4 = vcmask 31744  }
  0x7e   :  { %410 = vmatprep.subr.bf16.mxu0 %v5634_v6  ;;  %v173_v16 = vld [vmem:[%s7568_s0 + $0x18] sm:$0xff]  ;;  %v5646_v18 = vld [vmem:[#allocation6 + $0x24] ss:$8 sps:$4 sm:$0xff]   ;;  %v5648_v19 = vld [vmem:[#allocation6 + $0x20] ss:$8 sps:$4 sm:$0xff]  }
  0x7f   :  { %223 = vperm.xlu1 %5619, %v171_v3   ;;  %v5645_v17 = vld [vmem:[#allocation6 + $0x30] ss:$8 sps:$4 sm:$0xff]   ;;  %v5649_v20 = vld [vmem:[#allocation6 + $0x14] ss:$8 sps:$4 sm:$0xff]   ;;  %v5652_v22 = vld [vmem:[#allocation6 + $0x4] ss:$8 sps:$4 sm:$0xff]  }
  0x80   :  { %186 = vperm.xlu0 %5618, %v171_v3   ;;  %v5651_v21 = vld [vmem:[#allocation6 + $0x10] ss:$8 sps:$4 sm:$0xff]   ;;  %v5654_v23 = vld [vmem:[#allocation6] ss:$8 sps:$4 sm:$0xff]   ;;  %v6383_v26 = vsub.s32 0, %v6380_v25  ;;  %v6387_v31 = vsub.s32 1, %v6380_v25 }
  0x81   :  { %411 = vmatpush1.bf16.msra.mxu0 %v5636_v7  ;;  %v178_v27 = vld [vmem:[#allocation2] sm:$0xf]  ;;  %v6390_v32 = vsub.s32 2, %v6380_v25  ;;  %v5319_v37 = vld [vmem:[#allocation4] ss:$0 sm:$0xff]  ;;  %v6393_v38 = vsub.s32 3, %v6380_v25 }
  0x82   :  { %412 = vmatprep.subr.bf16.mxu0 %v5637_v8  ;;  %v202_v30 = vrot.slane %v178_v27, %v6383_v26  ;;  %v237_v39 = vrot.slane %v178_v27, %v6387_v31  ;;  %v174_v60 = vld [vmem:[%s7569_s1] sm:$0xff] }
  0x83   :  { %5621 = vset.pattern.permute.xlu1 %v6257_v9  ;;  %v265_v41 = vrot.slane %v178_v27, %v6390_v32  ;;  %v293_v46 = vrot.slane %v178_v27, %v6393_v38 }
  0x84   :  { %5620 = vset.pattern.permute.xlu0 %v6257_v9  ;;  %251 = vperm.xlu1 %5621, %v171_v3  }
  0x85   :  { %247 = vperm.xlu0 %5620, %v170_v2   ;;  %413 = vmatpush1.bf16.msra.mxu0 %v5639_v10 }
  0x86   :  { %414 = vmatprep.subr.bf16.mxu0 %v5640_v11 }
  0x88   :  { %5622 = vset.pattern.permute.xlu1 %v6258_v12 }
  0x89   :  { %5623 = vset.pattern.permute.xlu0 %v6258_v12  ;;  %275 = vperm.xlu1 %5622, %v170_v2  }
  0x8a   :  { %279 = vperm.xlu0 %5623, %v171_v3   ;;  %415 = vmatpush1.bf16.msra.mxu0 %v5642_v14 }
  0x8b   :  { %416 = vmatprep.subr.bf16.mxu0 %v5643_v15 }
  0x8d   :  { %5624 = vset.pattern.permute.xlu1 %v6256_v1 }
  0x8e   :  { %5625 = vset.pattern.permute.xlu0 %v6255_v0  ;;  %191 = vperm.xlu1 %5624, %v172_v13  }
  0x8f   :  { %227 = vperm.xlu0 %5625, %v172_v13   ;;  %417 = vmatpush1.bf16.msra.mxu0 %v5645_v17 }
  0x90   :  { %418 = vmatprep.subr.bf16.mxu0 %v5646_v18 }
  0x92   :  { %196 = vperm.xlu1 %5624, %v173_v16  }
  0x93   :  { %5628 = vset.pattern.permute.xlu0 %v6257_v9  ;;  %419 = vmatpush1.bf16.msra.mxu0 %v5648_v19 }
  0x94   :  { %259 = vperm.xlu0 %5628, %v173_v16   ;;  %420 = vmatprep.subr.bf16.mxu0 %v5649_v20 }
  0x96   :  { %5626 = vset.pattern.permute.xlu1 %v6255_v0 }
  0x97   :  { %231 = vperm.xlu1 %5626, %v173_v16   ;;  %421 = vmatpush1.bf16.msra.mxu0 %v5651_v21 }
  0x98   :  { %5630 = vset.pattern.permute.xlu0 %v6258_v12  ;;  %422 = vmatprep.subr.bf16.mxu0 %v5652_v22 }
  0x9b   :  { %5627 = vset.pattern.permute.xlu1 %v6257_v9  ;;  %423 = vmatpush1.bf16.msra.mxu0 %v5654_v23 }
  0x9c   :  { %255 = vperm.xlu1 %5627, %v172_v13  }
  0xa0   :  { %5629 = vset.pattern.permute.xlu1 %v6258_v12 }
  0xa1   :  { %283 = vperm.xlu1 %5629, %v172_v13  }
  0xa5   :  { %287 = vperm.xlu1 %5629, %v173_v16  }
  0xf6   :  { %v220_v28 = vpop.permute.xlu1 %219 }
  0xf7   :  { %v182_v29 = vpop.permute.xlu0 %181  ;;  %v238_v47 = vmul.f32 %v237_v39, %v220_v28 }
  0xf8   :  { %v203_v35 = vmul.f32 %v202_v30, %v182_v29 }
  0xfa   :  { %v224_v33 = vpop.permute.xlu1 %223  ;;  %v214_v42 = vadd.f32 %v5319_v37, %v203_v35  ;;  %v177_v35 = vld [vmem:[%s7569_s1 + $0x18] sm:$0xff] }
  0xfb   :  { %v187_v34 = vpop.permute.xlu0 %186  ;;  %v239_v43 = vmul.f32 %v237_v39, %v224_v33 }
  0xfc   :  { %v204_v36 = vmul.f32 %v202_v30, %v187_v34  ;;  %v242_v51 = vadd.f32 %v238_v47, %v214_v42  ;;  %v5657_v42 = vld [vmem:[#allocation9 + $0x70] ss:$8 sps:$4 sm:$0xff]   ;;  %v5664_v47 = vld [vmem:[#allocation9 + $0x44] ss:$8 sps:$4 sm:$0xff]  }
  0xfe   :  { %v215_v40 = vadd.f32 %v5319_v37, %v204_v36 }
  0xff   :  { %v252_v44 = vpop.permute.xlu1 %251 }
 0x100   :  { %v248_v45 = vpop.permute.xlu0 %247  ;;  %v243_v48 = vadd.f32 %v239_v43, %v215_v40  ;;  %v267_v49 = vmul.f32 %v265_v41, %v252_v44  ;;  %v5658_v43 = vld [vmem:[#allocation9 + $0x64] ss:$8 sps:$4 sm:$0xff]   ;;  %v5660_v44 = vld [vmem:[#allocation9 + $0x60] ss:$8 sps:$4 sm:$0xff]  }
 0x101   :  { %v266_v50 = vmul.f32 %v265_v41, %v248_v45  ;;  %v5661_v45 = vld [vmem:[#allocation9 + $0x54] ss:$8 sps:$4 sm:$0xff]  }
 0x102   :  { %v271_v54 = vadd.f32 %v267_v49, %v243_v48  ;;  %v5666_v48 = vld [vmem:[#allocation9 + $0x40] ss:$8 sps:$4 sm:$0xff]   ;;  %v5667_v49 = vld [vmem:[#allocation9 + $0x34] ss:$8 sps:$4 sm:$0xff]  }
 0x103   :  { %v270_v55 = vadd.f32 %v266_v50, %v242_v51  ;;  %v5669_v50 = vld [vmem:[#allocation9 + $0x30] ss:$8 sps:$4 sm:$0xff]   ;;  %v5670_v51 = vld [vmem:[#allocation9 + $0x24] ss:$8 sps:$4 sm:$0xff]  }
 0x104   :  { %v276_v52 = vpop.permute.xlu1 %275 }
 0x105   :  { %v280_v53 = vpop.permute.xlu0 %279  ;;  %v294_v56 = vmul.f32 %v293_v46, %v276_v52  ;;  %v5672_v52 = vld [vmem:[#allocation9 + $0x20] ss:$8 sps:$4 sm:$0xff]  }
 0x106   :  { %v295_v57 = vmul.f32 %v293_v46, %v280_v53  ;;  %v5673_v53 = vld [vmem:[#allocation9 + $0x14] ss:$8 sps:$4 sm:$0xff]  }
 0x107   :  { %v6398_v58 = vadd.f32 %v294_v56, %v270_v55  ;;  %v5676_v55 = vld [vmem:[#allocation9 + $0x4] ss:$8 sps:$4 sm:$0xff]   ;;  %v5678_v56 = vld [vmem:[#allocation9] ss:$8 sps:$4 sm:$0xff]  }
 0x108   :  { %v6400_v59 = vadd.f32 %v295_v57, %v271_v54  ;;  %v5675_v54 = vld [vmem:[#allocation9 + $0x10] ss:$8 sps:$4 sm:$0xff]   ;;  %v5679_v57 = vld [vmem:[#allocation9 + $0xf4] ss:$8 sps:$4 sm:$0xff]  }
 0x109   :  { %v302_v62 = vmax.f32 %v6398_v58, 0.0  ;;  %v192_v0 = vpop.permute.xlu1 %191 }
 0x10a   :  { %v303_v63 = vmax.f32 %v6400_v59, 0.0  ;;  %v205_v7 = vmul.f32 %v202_v30, %v192_v0  ;;  %v228_v8 = vpop.permute.xlu0 %227  ;;  %v5684_v0 = vld [vmem:[#allocation9 + $0xe0] ss:$8 sps:$4 sm:$0xff]  }
 0x10b   :  { %v306_v2 = vadd.f32 %v302_v62, %v174_v60  ;;  %v240_v10 = vmul.f32 %v237_v39, %v228_v8  ;;  %v5681_v60 = vld [vmem:[#allocation9 + $0xf0] ss:$8 sps:$4 sm:$0xff]   ;;  %v5694_v8 = vld [vmem:[#allocation9 + $0xa4] ss:$8 sps:$4 sm:$0xff]  }
 0x10c   :  { %v307_v3 = vadd.f32 %v303_v63, %v175_v61  ;;  %v216_v9 = vadd.f32 %v5319_v37, %v205_v7  ;;  %v5682_v61 = vld [vmem:[#allocation9 + $0xe4] ss:$8 sps:$4 sm:$0xff]   ;;  %v5693_v7 = vld [vmem:[#allocation9 + $0xb0] ss:$8 sps:$4 sm:$0xff]  }
 0x10d   :  { %v197_v4 = vpop.permute.xlu1 %196 }
 0x10e   :  { %v326_v5 = vpack.c.bf16 %v307_v3, %v306_v2  ;;  %v206_v11 = vmul.f32 %v202_v30, %v197_v4  ;;  %v244_v16 = vadd.f32 %v240_v10, %v216_v9  ;;  %v176_v30 = vld [vmem:[%s7569_s1 + $0x10] sm:$0xff]  ;;  %v5687_v3 = vld [vmem:[#allocation9 + $0xd0] ss:$8 sps:$4 sm:$0xff]  }
 0x10f   :  { %v260_v15 = vpop.permute.xlu0 %259  ;;  %v5685_v2 = vld [vmem:[#allocation9 + $0xd4] ss:$8 sps:$4 sm:$0xff]   ;;  %v5688_v4 = vld [vmem:[#allocation9 + $0xc4] ss:$8 sps:$4 sm:$0xff]   ;;  %v5696_v9 = vld [vmem:[#allocation9 + $0xa0] ss:$8 sps:$4 sm:$0xff]  }
 0x110   :  { %441 = vmatmul.mubr.bf16.vlgmr.msra.gmra.mxu0 %v326_v5  ;;  %v217_v17 = vadd.f32 %v5319_v37, %v206_v11  ;;  %v269_v20 = vmul.f32 %v265_v41, %v260_v15  ;;  %v5690_v5 = vld [vmem:[#allocation9 + $0xc0] ss:$8 sps:$4 sm:$0xff]   ;;  %v5697_v10 = vld [vmem:[#allocation9 + $0x94] ss:$8 sps:$4 sm:$0xff]   ;;  %v5699_v11 = vld [vmem:[#allocation9 + $0x90] ss:$8 sps:$4 sm:$0xff]  }
 0x111   :  { %450 = vmatprep.mubr.bf16.mxu0 %v6256_v1 }
 0x112   :  { %v232_v6 = vpop.permute.xlu1 %231 }
 0x113   :  { %v241_v13 = vmul.f32 %v237_v39, %v232_v6  ;;  %v5691_v6 = vld [vmem:[#allocation9 + $0xb4] ss:$8 sps:$4 sm:$0xff]  }
 0x115   :  { %v245_v19 = vadd.f32 %v241_v13, %v217_v17  ;;  %v5702_v13 = vld [vmem:[#allocation9 + $0x80] ss:$8 sps:$4 sm:$0xff]  }
 0x117   :  { %v256_v12 = vpop.permute.xlu1 %255  ;;  %v273_v28 = vadd.f32 %v269_v20, %v245_v19 }
 0x118   :  { %v268_v14 = vmul.f32 %v265_v41, %v256_v12  ;;  %v5655_v41 = vld [vmem:[#allocation9 + $0x74] ss:$8 sps:$4 sm:$0xff]   ;;  %v5700_v12 = vld [vmem:[#allocation9 + $0x84] ss:$8 sps:$4 sm:$0xff]  }
 0x119   :  { %1102 = vmatprep.subr.bf16.mxu1 %v5655_v41 }
 0x11a   :  { %v272_v21 = vadd.f32 %v268_v14, %v244_v16  ;;  %1103 = vmatpush1.bf16.msra.mxu1 %v5657_v42 }
 0x11b   :  { %1104 = vmatprep.subr.bf16.mxu1 %v5658_v43 }
 0x11c   :  { %v284_v18 = vpop.permute.xlu1 %283 }
 0x11d   :  { %v296_v22 = vmul.f32 %v293_v46, %v284_v18 }
 0x11e   :  { %1105 = vmatpush1.bf16.msra.mxu1 %v5660_v44 }
 0x11f   :  { %v6415_v23 = vadd.f32 %v296_v22, %v272_v21  ;;  %1106 = vmatprep.subr.bf16.mxu1 %v5661_v45 }
 0x120   :  { %v288_v27 = vpop.permute.xlu1 %287 }
 0x121   :  { %v297_v29 = vmul.f32 %v293_v46, %v288_v27  ;;  %v304_v33 = vmax.f32 %v6415_v23, 0.0  ;;  %v5663_v46 = vld [vmem:[#allocation9 + $0x50] ss:$8 sps:$4 sm:$0xff]   ;;  %v5745_v23 = vld [vmem:[#allocation9 + $0x174] ss:$8 sps:$4 sm:$0xff]  }
 0x122   :  { %1107 = vmatpush1.bf16.msra.mxu1 %v5663_v46 }
 0x123   :  { %v6418_v34 = vadd.f32 %v297_v29, %v273_v28  ;;  %v308_v37 = vadd.f32 %v304_v33, %v176_v30  ;;  %1108 = vmatprep.subr.bf16.mxu1 %v5664_v47 }
 0x125   :  { %v305_v36 = vmax.f32 %v6418_v34, 0.0  ;;  %v5748_v34 = vld [vmem:[#allocation9 + $0x164] ss:$8 sps:$4 sm:$0xff]  }
 0x126   :  { %1109 = vmatpush1.bf16.msra.mxu1 %v5666_v48 }
 0x127   :  { %v309_v39 = vadd.f32 %v305_v36, %v177_v35  ;;  %1110 = vmatprep.subr.bf16.mxu1 %v5667_v49 }
 0x129   :  { %v327_v40 = vpack.c.bf16 %v309_v39, %v308_v37 }
 0x12a   :  { %1111 = vmatpush1.bf16.msra.mxu1 %v5669_v50 }
 0x12b   :  { %451 = vmatmul.mubr.bf16.gmra.mxu0 %v327_v40  ;;  %1112 = vmatprep.subr.bf16.mxu1 %v5670_v51 }
 0x12e   :  { %1113 = vmatpush1.bf16.msra.mxu1 %v5672_v52 }
 0x12f   :  { %1114 = vmatprep.subr.bf16.mxu1 %v5673_v53 }
 0x132   :  { %1115 = vmatpush1.bf16.msra.mxu1 %v5675_v54 }
 0x133   :  { %1116 = vmatprep.subr.bf16.mxu1 %v5676_v55 }
 0x136   :  { %1117 = vmatpush1.bf16.msra.mxu1 %v5678_v56 }
 0x137   :  { %1118 = vmatprep.subr.bf16.mxu1 %v5679_v57 }
 0x13a   :  { %1119 = vmatpush2.bf16.msra.mxu1 %v5681_v60 }
 0x13b   :  { %1120 = vmatprep.subr.bf16.mxu1 %v5682_v61 }
 0x13e   :  { %1121 = vmatpush2.bf16.msra.mxu1 %v5684_v0 }
 0x13f   :  { %1122 = vmatprep.subr.bf16.mxu1 %v5685_v2 }
 0x142   :  { %1123 = vmatpush2.bf16.msra.mxu1 %v5687_v3 }
 0x143   :  { %1124 = vmatprep.subr.bf16.mxu1 %v5688_v4 }
 0x146   :  { %1125 = vmatpush2.bf16.msra.mxu1 %v5690_v5 }
 0x147   :  { %1126 = vmatprep.subr.bf16.mxu1 %v5691_v6 }
 0x14a   :  { %1127 = vmatpush2.bf16.msra.mxu1 %v5693_v7 }
 0x14b   :  { %1128 = vmatprep.subr.bf16.mxu1 %v5694_v8 }
 0x14e   :  { %1129 = vmatpush2.bf16.msra.mxu1 %v5696_v9 }
 0x14f   :  { %1130 = vmatprep.subr.bf16.mxu1 %v5697_v10 }
 0x152   :  { %1131 = vmatpush2.bf16.msra.mxu1 %v5699_v11 }
 0x153   :  { %1132 = vmatprep.subr.bf16.mxu1 %v5700_v12 }
 0x156   :  { %1133 = vmatpush2.bf16.msra.mxu1 %v5702_v13 }
 0x157   :  { %2733 = vmatprep.subr.bf16.mxu1 %v5745_v23 }
 0x1d0   :  { %v6431_v14 = vpop.f32.mrf.mxu0 }
 0x1d1   :  { %v462_v15 = vrot.slane %v6431_v14, 4  ;;  %v510_v16 = vmul.f32 %v6431_v14, %v6431_v14 }
 0x1d2   :  { %v6436_v17 = vpop.f32.mrf.mxu0 }
 0x1d3   :  { %v463_v18 = vadd.f32 %v462_v15, %v6431_v14  ;;  %v518_v19 = vrot.slane %v510_v16, 4  ;;  %v468_v20 = vrot.slane %v6436_v17, 4  ;;  %v511_v21 = vmul.f32 %v6436_v17, %v6436_v17 }
 0x1d4   :  { %v6442_v22 = vpop.f32.mrf.mxu0 }
 0x1d5   :  { %v464_v27 = vrot.slane %v463_v18, 2  ;;  %v519_v28 = vadd.f32 %v518_v19, %v510_v16  ;;  %v469_v29 = vadd.f32 %v468_v20, %v6436_v17  ;;  %v524_v30 = vrot.slane %v511_v21, 4 }
 0x1d6   :  { %v474_v35 = vrot.slane %v6442_v22, 4  ;;  %v512_v37 = vmul.f32 %v6442_v22, %v6442_v22  ;;  %v6448_v39 = vpop.f32.mrf.mxu0 }
 0x1d7   :  { %v465_v40 = vadd.f32 %v464_v27, %v463_v18  ;;  %v520_v41 = vrot.slane %v519_v28, 2  ;;  %v470_v42 = vrot.slane %v469_v29, 2  ;;  %v525_v43 = vadd.f32 %v524_v30, %v511_v21 }
 0x1d8   :  { %v475_v44 = vadd.f32 %v474_v35, %v6442_v22  ;;  %v530_v45 = vrot.slane %v512_v37, 4  ;;  %v480_v46 = vrot.slane %v6448_v39, 4  ;;  %v513_v47 = vmul.f32 %v6448_v39, %v6448_v39 }
 0x1d9   :  { %v466_v48 = vrot.slane %v465_v40, 1  ;;  %v521_v49 = vadd.f32 %v520_v41, %v519_v28  ;;  %v471_v50 = vadd.f32 %v470_v42, %v469_v29  ;;  %v526_v51 = vrot.slane %v525_v43, 2 }
 0x1da   :  { %v476_v52 = vrot.slane %v475_v44, 2  ;;  %v531_v53 = vadd.f32 %v530_v45, %v512_v37  ;;  %v481_v54 = vadd.f32 %v480_v46, %v6448_v39  ;;  %v536_v55 = vrot.slane %v513_v47, 4 }
 0x1db   :  { %v467_v56 = vadd.f32 %v466_v48, %v465_v40  ;;  %v522_v57 = vrot.slane %v521_v49, 1  ;;  %v472_v60 = vrot.slane %v471_v50, 1  ;;  %v527_v61 = vadd.f32 %v526_v51, %v525_v43 }
 0x1dc   :  { %v477_v0 = vadd.f32 %v476_v52, %v475_v44  ;;  %v532_v2 = vrot.slane %v531_v53, 2  ;;  %v482_v3 = vrot.slane %v481_v54, 2  ;;  %v537_v4 = vadd.f32 %v536_v55, %v513_v47 }
 0x1dd   :  { %v523_v5 = vadd.f32 %v522_v57, %v521_v49  ;;  %v6455_v6 = vmul.f32 0.125, %v467_v56  ;;  %v473_v7 = vadd.f32 %v472_v60, %v471_v50  ;;  %v528_v8 = vrot.slane %v527_v61, 1 }
 0x1de   :  { %v478_v9 = vrot.slane %v477_v0, 1  ;;  %v533_v10 = vadd.f32 %v532_v2, %v531_v53  ;;  %v483_v11 = vadd.f32 %v482_v3, %v481_v54  ;;  %v538_v12 = vrot.slane %v537_v4, 2 }
 0x1df   :  { %v574_v13 = vmul.f32 0.125, %v523_v5  ;;  %v582_v15 = vmul.f32 %v6455_v6, %v6455_v6  ;;  %v529_v16 = vadd.f32 %v528_v8, %v527_v61  ;;  %v6459_v18 = vmul.f32 0.125, %v473_v7 }
 0x1e0   :  { %v479_v19 = vadd.f32 %v478_v9, %v477_v0  ;;  %v534_v20 = vrot.slane %v533_v10, 1  ;;  %v484_v21 = vrot.slane %v483_v11, 1  ;;  %v539_v27 = vadd.f32 %v538_v12, %v537_v4 }
 0x1e1   :  { %v590_v28 = vsub.f32 %v574_v13, %v582_v15  ;;  %v575_v29 = vmul.f32 0.125, %v529_v16  ;;  %v583_v30 = vmul.f32 %v6459_v18, %v6459_v18  ;;  %v6259_v56 = vmov 1983009808  }
 0x1e2   :  { %v535_v35 = vadd.f32 %v534_v20, %v533_v10  ;;  %v6463_v37 = vmul.f32 0.125, %v479_v19  ;;  %v485_v40 = vadd.f32 %v484_v21, %v483_v11  ;;  %v540_v41 = vrot.slane %v539_v27, 1 }
 0x1e3   :  { %v598_v42 = vmax.f32 %v590_v28, 0.0  ;;  %v591_v43 = vsub.f32 %v575_v29, %v583_v30  ;;  %v632_v57 = vunpack.c.l.s4 %v6259_v56 }
 0x1e4   :  { %v576_v44 = vmul.f32 0.125, %v535_v35  ;;  %v584_v45 = vmul.f32 %v6463_v37, %v6463_v37  ;;  %v541_v46 = vadd.f32 %v540_v41, %v539_v27  ;;  %v6467_v47 = vmul.f32 0.125, %v485_v40 }
 0x1e5   :  { %v599_v48 = vmax.f32 %v591_v43, 0.0  ;;  %v606_v52 = vadd.f32 1e-05, %v598_v42  ;;  %v633_v5 = vunpack.c.0.s8 %v632_v57 }
 0x1e6   :  { %v592_v49 = vsub.f32 %v576_v44, %v584_v45  ;;  %v577_v50 = vmul.f32 0.125, %v541_v46  ;;  %v585_v51 = vmul.f32 %v6467_v47, %v6467_v47 }
 0x1e7   :  { %v607_v55 = vadd.f32 1e-05, %v599_v48  ;;  %5895 = vrsqrt.f32 %v606_v52  ;;  %v6486_v20 = vsub.s32 %v633_v5, %v6380_v25 }
 0x1e8   :  { %v600_v53 = vmax.f32 %v592_v49, 0.0  ;;  %v593_v54 = vsub.f32 %v577_v50, %v585_v51 }
 0x1e9   :  { %5897 = vrsqrt.f32 %v607_v55 }
 0x1ea   :  { %v601_v60 = vmax.f32 %v593_v54, 0.0  ;;  %v608_v61 = vadd.f32 1e-05, %v600_v53 }
 0x1eb   :  { %v6471_v2 = vpop.f32.mrf.mxu0 }
 0x1ec   :  { %v609_v0 = vadd.f32 1e-05, %v601_v60  ;;  %v486_v3 = vrot.slane %v6471_v2, 4  ;;  %v514_v4 = vmul.f32 %v6471_v2, %v6471_v2 }
 0x1ed   :  { %v6476_v7 = vpop.f32.mrf.mxu0 }
 0x1ee   :  { %5899 = vrsqrt.f32 %v609_v0  ;;  %v487_v8 = vadd.f32 %v486_v3, %v6471_v2  ;;  %v542_v9 = vrot.slane %v514_v4, 4  ;;  %v492_v10 = vrot.slane %v6476_v7, 4 }
 0x1ef   :  { %v515_v11 = vmul.f32 %v6476_v7, %v6476_v7  ;;  %5901 = vrsqrt.f32 %v608_v61  ;;  %v6482_v12 = vpop.f32.mrf.mxu0 }
 0x1f0   :  { %v488_v13 = vrot.slane %v487_v8, 2  ;;  %v543_v15 = vadd.f32 %v542_v9, %v514_v4  ;;  %v493_v16 = vadd.f32 %v492_v10, %v6476_v7  ;;  %v498_v21 = vrot.slane %v6482_v12, 4 }
 0x1f1   :  { %v548_v19 = vrot.slane %v515_v11, 4  ;;  %v516_v27 = vmul.f32 %v6482_v12, %v6482_v12  ;;  %v6491_v28 = vpop.f32.mrf.mxu0 }
 0x1f2   :  { %v489_v29 = vadd.f32 %v488_v13, %v487_v8  ;;  %v544_v30 = vrot.slane %v543_v15, 2  ;;  %v494_v35 = vrot.slane %v493_v16, 2  ;;  %v499_v41 = vadd.f32 %v498_v21, %v6482_v12 }
 0x1f3   :  { %v549_v40 = vadd.f32 %v548_v19, %v515_v11  ;;  %v554_v42 = vrot.slane %v516_v27, 4  ;;  %v504_v43 = vrot.slane %v6491_v28, 4  ;;  %v517_v25 = vmul.f32 %v6491_v28, %v6491_v28 }
 0x1f4   :  { %v490_v44 = vrot.slane %v489_v29, 1  ;;  %v545_v45 = vadd.f32 %v544_v30, %v543_v15  ;;  %v495_v46 = vadd.f32 %v494_v35, %v493_v16  ;;  %v500_v49 = vrot.slane %v499_v41, 2  ;;  %v5896_v3 = vpop.eup %5895 }
 0x1f5   :  { %v550_v48 = vrot.slane %v549_v40, 2  ;;  %v555_v50 = vadd.f32 %v554_v42, %v516_v27  ;;  %v505_v51 = vadd.f32 %v504_v43, %v6491_v28  ;;  %v560_v52 = vrot.slane %v517_v25, 4 }
 0x1f6   :  { %v491_v53 = vadd.f32 %v490_v44, %v489_v29  ;;  %v546_v54 = vrot.slane %v545_v45, 1  ;;  %v496_v55 = vrot.slane %v495_v46, 1  ;;  %v501_v57 = vadd.f32 %v500_v49, %v499_v41  ;;  %v5898_v10 = vpop.eup %5897 }
 0x1f7   :  { %v551_v56 = vadd.f32 %v550_v48, %v549_v40  ;;  %v556_v60 = vrot.slane %v555_v50, 2  ;;  %v506_v61 = vrot.slane %v505_v51, 2  ;;  %v561_v0 = vadd.f32 %v560_v52, %v517_v25  ;;  %v6506_v48 = vld [vmem:[#allocation7] sm:$0xf] }
 0x1f8   :  { %v547_v4 = vadd.f32 %v546_v54, %v545_v45  ;;  %v6498_v5 = vmul.f32 0.125, %v491_v53  ;;  %v497_v8 = vadd.f32 %v496_v55, %v495_v46  ;;  %v502_v11 = vrot.slane %v501_v57, 1 }
 0x1f9   :  { %v552_v9 = vrot.slane %v551_v56, 1  ;;  %v557_v13 = vadd.f32 %v556_v60, %v555_v50  ;;  %v507_v15 = vadd.f32 %v506_v61, %v505_v51  ;;  %v562_v16 = vrot.slane %v561_v0, 2 }
 0x1fa   :  { %v578_v21 = vmul.f32 0.125, %v547_v4  ;;  %v586_v27 = vmul.f32 %v6498_v5, %v6498_v5  ;;  %v6502_v30 = vmul.f32 0.125, %v497_v8  ;;  %v503_v35 = vadd.f32 %v502_v11, %v501_v57 }
 0x1fb   :  { %v5900_v19 = vpop.eup %5899  ;;  %v553_v29 = vadd.f32 %v552_v9, %v551_v56  ;;  %v558_v40 = vrot.slane %v557_v13, 1  ;;  %v508_v41 = vrot.slane %v507_v15, 1  ;;  %v563_v42 = vadd.f32 %v562_v16, %v561_v0 }
 0x1fc   :  { %v5902_v43 = vpop.eup %5901  ;;  %v594_v25 = vsub.f32 %v578_v21, %v586_v27  ;;  %v587_v45 = vmul.f32 %v6502_v30, %v6502_v30  ;;  %v630_v46 = vcombine.low %v5896_v3, %v5898_v10  ;;  %v6508_v50 = vmul.f32 0.125, %v503_v35 }
 0x1fd   :  { %v579_v44 = vmul.f32 0.125, %v553_v29  ;;  %v559_v49 = vadd.f32 %v558_v40, %v557_v13  ;;  %v509_v51 = vadd.f32 %v508_v41, %v507_v15  ;;  %v564_v52 = vrot.slane %v563_v42, 1 }
 0x1fe   :  { %v602_v53 = vmax.f32 %v594_v25, 0.0  ;;  %v637_v55 = vrot.slane %v630_v46, %v6486_v20  ;;  %v638_v56 = vcombine.low %v5902_v43, %v5900_v19  ;;  %v588_v60 = vmul.f32 %v6508_v50, %v6508_v50 }
 0x1ff   :  { %v595_v54 = vsub.f32 %v579_v44, %v587_v45  ;;  %v580_v57 = vmul.f32 0.125, %v559_v49  ;;  %v565_v61 = vadd.f32 %v564_v52, %v563_v42  ;;  %v6513_v0 = vmul.f32 0.125, %v509_v51 }
 0x200   :  { %v610_v3 = vadd.f32 1e-05, %v602_v53  ;;  %v645_v8 = vrot.slane %v638_v56, %v6486_v20  ;;  %v666_v9 = vmul.f32 %v637_v55, %v6506_v48 }
 0x201   :  { %v603_v4 = vmax.f32 %v595_v54, 0.0  ;;  %v596_v10 = vsub.f32 %v580_v57, %v588_v60  ;;  %v581_v11 = vmul.f32 0.125, %v565_v61  ;;  %v589_v13 = vmul.f32 %v6513_v0, %v6513_v0 }
 0x202   :  { %v667_v16 = vmul.f32 %v645_v8, %v6506_v48  ;;  %v677_v19 = vrot.slane %v666_v9, %v6383_v26  ;;  %5903 = vrsqrt.f32 %v610_v3  ;;  %v681_v29 = vrot.slane %v666_v9, %v6390_v32 }
 0x203   :  { %v611_v15 = vadd.f32 1e-05, %v603_v4  ;;  %v604_v21 = vmax.f32 %v596_v10, 0.0  ;;  %v597_v27 = vsub.f32 %v581_v11, %v589_v13 }
 0x204   :  { %v685_v35 = vrot.slane %v667_v16, %v6383_v26  ;;  %v689_v40 = vrot.slane %v667_v16, %v6390_v32  ;;  %v714_v41 = vmul.f32 %v677_v19, %v6455_v6  ;;  %v715_v25 = vmul.f32 %v681_v29, %v6459_v18 }
 0x205   :  { %5905 = vrsqrt.f32 %v611_v15  ;;  %v612_v42 = vadd.f32 1e-05, %v604_v21  ;;  %v605_v43 = vmax.f32 %v597_v27, 0.0  ;;  %v781_v6 = vrot.slane %v681_v29, %v6383_v26 }
 0x206   :  { %v716_v44 = vmul.f32 %v685_v35, %v6463_v37  ;;  %v717_v45 = vmul.f32 %v689_v40, %v6467_v47  ;;  %v730_v49 = vcombine.low %v714_v41, %v715_v25  ;;  %v789_v18 = vrot.slane %v689_v40, %v6383_v26 }
 0x207   :  { %v613_v46 = vadd.f32 1e-05, %v605_v43  ;;  %5907 = vrsqrt.f32 %v612_v42  ;;  %v777_v37 = vrot.slane %v677_v19, %v6383_v26  ;;  %v785_v57 = vrot.slane %v685_v35, %v6383_v26 }
 0x208   :  { %v738_v51 = vcombine.low %v716_v44, %v717_v45  ;;  %v737_v52 = vrot.slane %v730_v49, %v6486_v20  ;;  %v807_v4 = vmul.f32 %v781_v6, %v6436_v17  ;;  %v809_v11 = vmul.f32 %v789_v18, %v6448_v39 }
 0x209   :  { %5909 = vrsqrt.f32 %v613_v46  ;;  %v806_v15 = vmul.f32 %v777_v37, %v6431_v14  ;;  %v808_v27 = vmul.f32 %v785_v57, %v6442_v22 }
 0x20a   :  { %v745_v53 = vrot.slane %v738_v51, %v6486_v20  ;;  %v762_v54 = vrot.slane %v737_v52, 7 }
 0x20c   :  { %v763_v55 = vrot.slane %v745_v53, 7  ;;  %v770_v56 = vsub.f32 %v6506_v48, %v762_v54 }
 0x20e   :  { %v771_v47 = vsub.f32 %v6506_v48, %v763_v55  ;;  %v825_v60 = vrot.slane %v770_v56, %v6393_v38  ;;  %v821_v61 = vrot.slane %v770_v56, %v6387_v31 }
 0x20f   :  { %v5904_v3 = vpop.eup %5903 }
 0x210   :  { %v833_v8 = vrot.slane %v771_v47, %v6393_v38  ;;  %v829_v9 = vrot.slane %v771_v47, %v6387_v31  ;;  %v865_v13 = vrot.slane %v825_v60, %v6387_v31  ;;  %v861_v16 = vrot.slane %v821_v61, %v6387_v31 }
 0x212   :  { %v5906_v10 = vpop.eup %5905  ;;  %v873_v21 = vrot.slane %v833_v8, %v6387_v31  ;;  %v869_v17 = vrot.slane %v829_v9, %v6387_v31  ;;  %v891_v29 = vadd.f32 %v865_v13, %v807_v4  ;;  %v890_v35 = vadd.f32 %v861_v16, %v806_v15 }
 0x213   :  { %v646_v19 = vcombine.low %v5904_v3, %v5906_v10 }
 0x214   :  { %v893_v41 = vadd.f32 %v873_v21, %v809_v11  ;;  %v892_v42 = vadd.f32 %v869_v17, %v808_v27  ;;  %v5908_v39 = vpop.eup %5907  ;;  %v899_v43 = vmax.f32 %v891_v29, 0.0  ;;  %v898_v45 = vmax.f32 %v890_v35, 0.0 }
 0x215   :  { %v653_v40 = vrot.slane %v646_v19, %v6486_v20 }
 0x216   :  { %v5910_v25 = vpop.eup %5909  ;;  %v901_v44 = vmax.f32 %v893_v41, 0.0  ;;  %v900_v46 = vmax.f32 %v892_v42, 0.0 }
 0x217   :  { %v668_v14 = vmul.f32 %v653_v40, %v6506_v48  ;;  %v654_v49 = vcombine.low %v5908_v39, %v5910_v25 }
 0x218   :  { %v939_v52 = vpack.c.bf16 %v901_v44, %v899_v43  ;;  %v938_v53 = vpack.c.bf16 %v900_v46, %v898_v45 }
 0x219   :  { %v693_v51 = vrot.slane %v668_v14, %v6383_v26  ;;  %v697_v22 = vrot.slane %v668_v14, %v6390_v32  ;;  %v661_v54 = vrot.slane %v654_v49, %v6486_v20  ;;  %v5703_v49 = vld [vmem:[#allocation12 + $0x78] sm:$0xff]  }
 0x21a   :  { %1134 = vmatprep.mubr.bf16.mxu1 %v939_v52  ;;  %5513 = vmatprep.subr.bf16.mxu0 %v5703_v49  ;;  %v5708_v52 = vld [vmem:[#allocation12 + $0x28] sm:$0xff]  }
 0x21b   :  { %v718_v55 = vmul.f32 %v693_v51, %v6498_v5  ;;  %v719_v6 = vmul.f32 %v697_v22, %v6502_v30  ;;  %v669_v56 = vmul.f32 %v661_v54, %v6506_v48  ;;  %1135 = vmatmul.mubr.bf16.vlgmr.msra.gmra.mxu1 %v938_v53  ;;  %v797_v10 = vrot.slane %v697_v22, %v6383_v26  ;;  %v5707_v22 = vld [vmem:[#allocation12 + $0x68] sm:$0xff]   ;;  %v5709_v53 = vld [vmem:[#allocation12 + $0x60] sm:$0xff]  }
 0x21c   :  { %v793_v13 = vrot.slane %v693_v51, %v6383_v26  ;;  %v5706_v51 = vld [vmem:[#allocation12 + $0x30] sm:$0xff]   ;;  %v5710_v54 = vld [vmem:[#allocation12 + $0x20] sm:$0xff]  }
 0x21d   :  { %v746_v18 = vcombine.low %v718_v55, %v719_v6  ;;  %v701_v37 = vrot.slane %v669_v56, %v6383_v26  ;;  %v705_v47 = vrot.slane %v669_v56, %v6390_v32  ;;  %v811_v21 = vmul.f32 %v797_v10, %v6476_v7  ;;  %v5711_v55 = vld [vmem:[#allocation12 + $0x58] sm:$0xff]   ;;  %v5713_v56 = vld [vmem:[#allocation12 + $0x50] sm:$0xff]  }
 0x21e   :  { %v810_v17 = vmul.f32 %v793_v13, %v6471_v2  ;;  %v5712_v6 = vld [vmem:[#allocation12 + $0x18] sm:$0xff]  }
 0x21f   :  { %v753_v57 = vrot.slane %v746_v18, %v6486_v20  ;;  %v720_v60 = vmul.f32 %v701_v37, %v6508_v50  ;;  %v721_v61 = vmul.f32 %v705_v47, %v6513_v0  ;;  %v805_v15 = vrot.slane %v705_v47, %v6383_v26  ;;  %v5714_v18 = vld [vmem:[#allocation12 + $0x10] sm:$0xff]   ;;  %v5716_v47 = vld [vmem:[#allocation12 + $0x8] sm:$0xff]  }
 0x220   :  { %v801_v50 = vrot.slane %v701_v37, %v6383_v26  ;;  %v5715_v37 = vld [vmem:[#allocation12 + $0x48] sm:$0xff]  }
 0x221   :  { %v764_v3 = vrot.slane %v753_v57, 7  ;;  %v754_v4 = vcombine.low %v720_v60, %v721_v61  ;;  %v813_v35 = vmul.f32 %v805_v15, %v6491_v28  ;;  %v5704_v28 = vld [vmem:[#allocation12 + $0x38] sm:$0xff]   ;;  %v5717_v57 = vld [vmem:[#allocation12 + $0x40] sm:$0xff]  }
 0x222   :  { %v812_v40 = vmul.f32 %v801_v50, %v6482_v12  ;;  %5514 = vmatpush3.bf16.msra.mxu0 %v5704_v28  ;;  %v5705_v12 = vld [vmem:[#allocation12 + $0x70] sm:$0xff]   ;;  %v5718_v60 = vld [vmem:[#allocation12] sm:$0xff]  }
 0x223   :  { %v772_v5 = vsub.f32 %v6506_v48, %v764_v3  ;;  %v761_v30 = vrot.slane %v754_v4, %v6486_v20  ;;  %5515 = vmatprep.subr.bf16.mxu0 %v5705_v12 }
 0x225   :  { %v841_v8 = vrot.slane %v772_v5, %v6393_v38  ;;  %v837_v9 = vrot.slane %v772_v5, %v6387_v31  ;;  %v765_v11 = vrot.slane %v761_v30, 7 }
 0x226   :  { %5516 = vmatpush3.bf16.msra.mxu0 %v5706_v51 }
 0x227   :  { %v773_v0 = vsub.f32 %v6506_v48, %v765_v11  ;;  %v881_v16 = vrot.slane %v841_v8, %v6387_v31  ;;  %v877_v19 = vrot.slane %v837_v9, %v6387_v31  ;;  %5517 = vmatprep.subr.bf16.mxu0 %v5707_v22 }
 0x229   :  { %v849_v27 = vrot.slane %v773_v0, %v6393_v38  ;;  %v845_v29 = vrot.slane %v773_v0, %v6387_v31  ;;  %v895_v42 = vadd.f32 %v881_v16, %v811_v21  ;;  %v894_v39 = vadd.f32 %v877_v19, %v810_v17 }
 0x22a   :  { %5518 = vmatpush3.bf16.msra.mxu0 %v5708_v52 }
 0x22b   :  { %v889_v41 = vrot.slane %v849_v27, %v6387_v31  ;;  %v885_v48 = vrot.slane %v845_v29, %v6387_v31  ;;  %v903_v14 = vmax.f32 %v895_v42, 0.0  ;;  %v902_v44 = vmax.f32 %v894_v39, 0.0  ;;  %5519 = vmatprep.subr.bf16.mxu0 %v5709_v53 }
 0x22d   :  { %v897_v43 = vadd.f32 %v889_v41, %v813_v35  ;;  %v896_v25 = vadd.f32 %v885_v48, %v812_v40 }
 0x22e   :  { %5520 = vmatpush3.bf16.msra.mxu0 %v5710_v54 }
 0x22f   :  { %v905_v7 = vmax.f32 %v897_v43, 0.0  ;;  %v904_v45 = vmax.f32 %v896_v25, 0.0  ;;  %5521 = vmatprep.subr.bf16.mxu0 %v5711_v55 }
 0x231   :  { %v941_v46 = vpack.c.bf16 %v905_v7, %v903_v14  ;;  %v940_v2 = vpack.c.bf16 %v904_v45, %v902_v44 }
 0x232   :  { %5522 = vmatpush3.bf16.msra.mxu0 %v5712_v6 }
 0x233   :  { %1144 = vmatprep.mubr.bf16.mxu1 %v941_v46  ;;  %5523 = vmatprep.subr.bf16.mxu0 %v5713_v56 }
 0x234   :  { %1145 = vmatmul.mubr.bf16.gmra.mxu1 %v940_v2 }
 0x236   :  { %5524 = vmatpush3.bf16.msra.mxu0 %v5714_v18 }
 0x237   :  { %5525 = vmatprep.subr.bf16.mxu0 %v5715_v37 }
 0x23a   :  { %5526 = vmatpush3.bf16.msra.mxu0 %v5716_v47 }
 0x23b   :  { %5527 = vmatprep.subr.bf16.mxu0 %v5717_v57 }
 0x23e   :  { %5528 = vmatpush3.bf16.msra.mxu0 %v5718_v60 }
 0x2db   :  { %v6580_v61 = vpop.f32.mrf.mxu1 }
 0x2dc   :  { %v1156_v3 = vrot.slane %v6580_v61, 4  ;;  %v1204_v4 = vmul.f32 %v6580_v61, %v6580_v61 }
 0x2dd   :  { %v6585_v5 = vpop.f32.mrf.mxu1 }
 0x2de   :  { %v1157_v30 = vadd.f32 %v1156_v3, %v6580_v61  ;;  %v1212_v8 = vrot.slane %v1204_v4, 4  ;;  %v1162_v9 = vrot.slane %v6585_v5, 4  ;;  %v1205_v10 = vmul.f32 %v6585_v5, %v6585_v5 }
 0x2df   :  { %v6591_v11 = vpop.f32.mrf.mxu1 }
 0x2e0   :  { %v1158_v13 = vrot.slane %v1157_v30, 2  ;;  %v1213_v15 = vadd.f32 %v1212_v8, %v1204_v4  ;;  %v1163_v50 = vadd.f32 %v1162_v9, %v6585_v5  ;;  %v1218_v0 = vrot.slane %v1205_v10, 4 }
 0x2e1   :  { %v1168_v16 = vrot.slane %v6591_v11, 4  ;;  %v1206_v19 = vmul.f32 %v6591_v11, %v6591_v11  ;;  %v6597_v21 = vpop.f32.mrf.mxu1 }
 0x2e2   :  { %v1159_v27 = vadd.f32 %v1158_v13, %v1157_v30  ;;  %v1214_v17 = vrot.slane %v1213_v15, 2  ;;  %v1164_v29 = vrot.slane %v1163_v50, 2  ;;  %v1219_v35 = vadd.f32 %v1218_v0, %v1205_v10 }
 0x2e3   :  { %v1169_v40 = vadd.f32 %v1168_v16, %v6591_v11  ;;  %v1224_v41 = vrot.slane %v1206_v19, 4  ;;  %v1174_v42 = vrot.slane %v6597_v21, 4  ;;  %v1207_v48 = vmul.f32 %v6597_v21, %v6597_v21 }
 0x2e4   :  { %v1160_v39 = vrot.slane %v1159_v27, 1  ;;  %v1215_v43 = vadd.f32 %v1214_v17, %v1213_v15  ;;  %v1165_v25 = vadd.f32 %v1164_v29, %v1163_v50  ;;  %v1220_v14 = vrot.slane %v1219_v35, 2 }
 0x2e5   :  { %v1170_v7 = vrot.slane %v1169_v40, 2  ;;  %v1225_v44 = vadd.f32 %v1224_v41, %v1206_v19  ;;  %v1175_v45 = vadd.f32 %v1174_v42, %v6597_v21  ;;  %v1230_v46 = vrot.slane %v1207_v48, 4 }
 0x2e6   :  { %v1161_v2 = vadd.f32 %v1160_v39, %v1159_v27  ;;  %v1216_v49 = vrot.slane %v1215_v43, 1  ;;  %v1166_v28 = vrot.slane %v1165_v25, 1  ;;  %v1221_v12 = vadd.f32 %v1220_v14, %v1219_v35 }
 0x2e7   :  { %v1171_v51 = vadd.f32 %v1170_v7, %v1169_v40  ;;  %v1226_v22 = vrot.slane %v1225_v44, 2  ;;  %v1176_v52 = vrot.slane %v1175_v45, 2  ;;  %v1231_v53 = vadd.f32 %v1230_v46, %v1207_v48 }
 0x2e8   :  { %v1217_v54 = vadd.f32 %v1216_v49, %v1215_v43  ;;  %v6604_v55 = vmul.f32 0.125, %v1161_v2  ;;  %v1167_v6 = vadd.f32 %v1166_v28, %v1165_v25  ;;  %v1222_v56 = vrot.slane %v1221_v12, 1 }
 0x2e9   :  { %v1172_v18 = vrot.slane %v1171_v51, 1  ;;  %v1227_v37 = vadd.f32 %v1226_v22, %v1225_v44  ;;  %v1177_v47 = vadd.f32 %v1176_v52, %v1175_v45  ;;  %v1232_v57 = vrot.slane %v1231_v53, 2 }
 0x2ea   :  { %v1268_v60 = vmul.f32 0.125, %v1217_v54  ;;  %v1276_v3 = vmul.f32 %v6604_v55, %v6604_v55  ;;  %v1223_v4 = vadd.f32 %v1222_v56, %v1221_v12  ;;  %v6608_v30 = vmul.f32 0.125, %v1167_v6 }
 0x2eb   :  { %v1173_v8 = vadd.f32 %v1172_v18, %v1171_v51  ;;  %v1228_v9 = vrot.slane %v1227_v37, 1  ;;  %v1178_v10 = vrot.slane %v1177_v47, 1  ;;  %v1233_v13 = vadd.f32 %v1232_v57, %v1231_v53 }
 0x2ec   :  { %v1284_v15 = vsub.f32 %v1268_v60, %v1276_v3  ;;  %v1269_v50 = vmul.f32 0.125, %v1223_v4  ;;  %v1277_v0 = vmul.f32 %v6608_v30, %v6608_v30 }
 0x2ed   :  { %v1229_v16 = vadd.f32 %v1228_v9, %v1227_v37  ;;  %v6612_v19 = vmul.f32 0.125, %v1173_v8  ;;  %v1179_v27 = vadd.f32 %v1178_v10, %v1177_v47  ;;  %v1234_v17 = vrot.slane %v1233_v13, 1 }
 0x2ee   :  { %v1292_v29 = vmax.f32 %v1284_v15, 0.0  ;;  %v1285_v35 = vsub.f32 %v1269_v50, %v1277_v0 }
 0x2ef   :  { %v1270_v40 = vmul.f32 0.125, %v1229_v16  ;;  %v1278_v41 = vmul.f32 %v6612_v19, %v6612_v19  ;;  %v1235_v42 = vadd.f32 %v1234_v17, %v1233_v13  ;;  %v6616_v48 = vmul.f32 0.125, %v1179_v27 }
 0x2f0   :  { %v1300_v39 = vadd.f32 1e-05, %v1292_v29  ;;  %v1293_v43 = vmax.f32 %v1285_v35, 0.0 }
 0x2f1   :  { %v1286_v25 = vsub.f32 %v1270_v40, %v1278_v41  ;;  %v1271_v14 = vmul.f32 0.125, %v1235_v42  ;;  %v1279_v7 = vmul.f32 %v6616_v48, %v6616_v48 }
 0x2f2   :  { %v1301_v44 = vadd.f32 1e-05, %v1293_v43  ;;  %5911 = vrsqrt.f32 %v1300_v39 }
 0x2f3   :  { %v1294_v45 = vmax.f32 %v1286_v25, 0.0  ;;  %v1287_v46 = vsub.f32 %v1271_v14, %v1279_v7 }
 0x2f4   :  { %5913 = vrsqrt.f32 %v1301_v44  ;;  %v6620_v2 = vpop.f32.mrf.mxu1 }
 0x2f5   :  { %v1302_v49 = vadd.f32 1e-05, %v1294_v45  ;;  %v1295_v28 = vmax.f32 %v1287_v46, 0.0  ;;  %v1180_v12 = vrot.slane %v6620_v2, 4  ;;  %v1208_v51 = vmul.f32 %v6620_v2, %v6620_v2 }
 0x2f6   :  { %v6625_v22 = vpop.f32.mrf.mxu1 }
 0x2f7   :  { %v1303_v52 = vadd.f32 1e-05, %v1295_v28  ;;  %v1181_v53 = vadd.f32 %v1180_v12, %v6620_v2  ;;  %v1236_v54 = vrot.slane %v1208_v51, 4  ;;  %5915 = vrsqrt.f32 %v1302_v49 }
 0x2f8   :  { %v1186_v6 = vrot.slane %v6625_v22, 4  ;;  %v1209_v56 = vmul.f32 %v6625_v22, %v6625_v22  ;;  %v6631_v18 = vpop.f32.mrf.mxu1 }
 0x2f9   :  { %5917 = vrsqrt.f32 %v1303_v52  ;;  %v1182_v37 = vrot.slane %v1181_v53, 2  ;;  %v1237_v47 = vadd.f32 %v1236_v54, %v1208_v51  ;;  %v1192_v57 = vrot.slane %v6631_v18, 4 }
 0x2fa   :  { %v1187_v60 = vadd.f32 %v1186_v6, %v6625_v22  ;;  %v1242_v3 = vrot.slane %v1209_v56, 4  ;;  %v1210_v4 = vmul.f32 %v6631_v18, %v6631_v18  ;;  %v6637_v8 = vpop.f32.mrf.mxu1 }
 0x2fb   :  { %v1183_v9 = vadd.f32 %v1182_v37, %v1181_v53  ;;  %v1238_v10 = vrot.slane %v1237_v47, 2  ;;  %v1193_v13 = vadd.f32 %v1192_v57, %v6631_v18  ;;  %v1198_v15 = vrot.slane %v6637_v8, 4 }
 0x2fc   :  { %v1188_v50 = vrot.slane %v1187_v60, 2  ;;  %v1243_v0 = vadd.f32 %v1242_v3, %v1209_v56  ;;  %v1248_v16 = vrot.slane %v1210_v4, 4  ;;  %v1211_v27 = vmul.f32 %v6637_v8, %v6637_v8 }
 0x2fd   :  { %v1184_v17 = vrot.slane %v1183_v9, 1  ;;  %v1239_v29 = vadd.f32 %v1238_v10, %v1237_v47  ;;  %v1194_v35 = vrot.slane %v1193_v13, 2  ;;  %v1199_v40 = vadd.f32 %v1198_v15, %v6637_v8 }
 0x2fe   :  { %v1189_v41 = vadd.f32 %v1188_v50, %v1187_v60  ;;  %v1244_v42 = vrot.slane %v1243_v0, 2  ;;  %v1249_v39 = vadd.f32 %v1248_v16, %v1210_v4  ;;  %v1254_v43 = vrot.slane %v1211_v27, 4  ;;  %v6646_v60 = vld [vmem:[#allocation10] sm:$0xf] }
 0x2ff   :  { %v1185_v25 = vadd.f32 %v1184_v17, %v1183_v9  ;;  %v1240_v14 = vrot.slane %v1239_v29, 1  ;;  %v1195_v7 = vadd.f32 %v1194_v35, %v1193_v13  ;;  %v1200_v44 = vrot.slane %v1199_v40, 2  ;;  %v5912_v45 = vpop.eup %5911 }
 0x300   :  { %v1190_v46 = vrot.slane %v1189_v41, 1  ;;  %v1245_v49 = vadd.f32 %v1244_v42, %v1243_v0  ;;  %v1250_v28 = vrot.slane %v1249_v39, 2  ;;  %v1255_v12 = vadd.f32 %v1254_v43, %v1211_v27 }
 0x301   :  { %v5914_v51 = vpop.eup %5913  ;;  %v1241_v52 = vadd.f32 %v1240_v14, %v1239_v29  ;;  %v6644_v53 = vmul.f32 0.125, %v1185_v25  ;;  %v1196_v54 = vrot.slane %v1195_v7, 1  ;;  %v1201_v6 = vadd.f32 %v1200_v44, %v1199_v40 }
 0x302   :  { %v1324_v56 = vcombine.low %v5912_v45, %v5914_v51  ;;  %v1191_v37 = vadd.f32 %v1190_v46, %v1189_v41  ;;  %v1246_v47 = vrot.slane %v1245_v49, 1  ;;  %v1251_v57 = vadd.f32 %v1250_v28, %v1249_v39 }
 0x303   :  { %v1272_v3 = vmul.f32 0.125, %v1241_v52  ;;  %v1280_v4 = vmul.f32 %v6644_v53, %v6644_v53  ;;  %v1197_v9 = vadd.f32 %v1196_v54, %v1195_v7  ;;  %v1202_v10 = vrot.slane %v1201_v6, 1 }
 0x304   :  { %v1331_v13 = vrot.slane %v1324_v56, %v6486_v20  ;;  %v1247_v15 = vadd.f32 %v1246_v47, %v1245_v49  ;;  %v6651_v50 = vmul.f32 0.125, %v1191_v37  ;;  %v1252_v0 = vrot.slane %v1251_v57, 1  ;;  %v5916_v16 = vpop.eup %5915 }
 0x305   :  { %v1288_v27 = vsub.f32 %v1272_v3, %v1280_v4  ;;  %v6653_v17 = vmul.f32 0.125, %v1197_v9  ;;  %v1203_v29 = vadd.f32 %v1202_v10, %v1201_v6  ;;  %v1256_v35 = vrot.slane %v1255_v12, 2 }
 0x306   :  { %v5918_v40 = vpop.eup %5917  ;;  %v1360_v41 = vmul.f32 %v1331_v13, %v6646_v60  ;;  %v1273_v42 = vmul.f32 0.125, %v1247_v15  ;;  %v1281_v39 = vmul.f32 %v6651_v50, %v6651_v50  ;;  %v1253_v43 = vadd.f32 %v1252_v0, %v1251_v57 }
 0x307   :  { %v1332_v25 = vcombine.low %v5916_v16, %v5918_v40  ;;  %v1296_v14 = vmax.f32 %v1288_v27, 0.0  ;;  %v1282_v7 = vmul.f32 %v6653_v17, %v6653_v17  ;;  %v1257_v44 = vadd.f32 %v1256_v35, %v1255_v12 }
 0x308   :  { %v1371_v45 = vrot.slane %v1360_v41, %v6383_v26  ;;  %v1375_v46 = vrot.slane %v1360_v41, %v6390_v32  ;;  %v1289_v49 = vsub.f32 %v1273_v42, %v1281_v39  ;;  %v1274_v28 = vmul.f32 0.125, %v1253_v43 }
 0x309   :  { %v1339_v51 = vrot.slane %v1332_v25, %v6486_v20  ;;  %v1258_v52 = vrot.slane %v1257_v44, 1  ;;  %v6663_v54 = vmul.f32 0.125, %v1203_v29  ;;  %v1304_v47 = vadd.f32 1e-05, %v1296_v14 }
 0x30a   :  { %v1408_v6 = vmul.f32 %v1371_v45, %v6604_v55  ;;  %v1409_v56 = vmul.f32 %v1375_v46, %v6608_v30  ;;  %v1297_v57 = vmax.f32 %v1289_v49, 0.0  ;;  %v1290_v12 = vsub.f32 %v1274_v28, %v1282_v7 }
 0x30b   :  { %v1361_v37 = vmul.f32 %v1339_v51, %v6646_v60  ;;  %v1259_v4 = vadd.f32 %v1258_v52, %v1257_v44  ;;  %v1283_v9 = vmul.f32 %v6663_v54, %v6663_v54  ;;  %5919 = vrsqrt.f32 %v1304_v47 }
 0x30c   :  { %v1424_v3 = vcombine.low %v1408_v6, %v1409_v56  ;;  %v1305_v15 = vadd.f32 1e-05, %v1297_v57  ;;  %v1298_v0 = vmax.f32 %v1290_v12, 0.0 }
 0x30d   :  { %v1379_v10 = vrot.slane %v1361_v37, %v6383_v26  ;;  %v1383_v13 = vrot.slane %v1361_v37, %v6390_v32  ;;  %v1275_v16 = vmul.f32 0.125, %v1259_v4 }
 0x30e   :  { %v1431_v55 = vrot.slane %v1424_v3, %v6486_v20  ;;  %5921 = vrsqrt.f32 %v1305_v15  ;;  %v1306_v41 = vadd.f32 1e-05, %v1298_v0 }
 0x30f   :  { %v1410_v30 = vmul.f32 %v1379_v10, %v6612_v19  ;;  %v1411_v27 = vmul.f32 %v1383_v13, %v6616_v48  ;;  %v1291_v29 = vsub.f32 %v1275_v16, %v1283_v9  ;;  %v1471_v19 = vrot.slane %v1371_v45, %v6383_v26 }
 0x310   :  { %v1456_v35 = vrot.slane %v1431_v55, 7  ;;  %v1475_v48 = vrot.slane %v1375_v46, %v6383_v26  ;;  %5923 = vrsqrt.f32 %v1306_v41  ;;  %v1479_v49 = vrot.slane %v1379_v10, %v6383_v26 }
 0x311   :  { %v1432_v40 = vcombine.low %v1410_v30, %v1411_v27  ;;  %v1299_v42 = vmax.f32 %v1291_v29, 0.0  ;;  %v1483_v28 = vrot.slane %v1383_v13, %v6383_v26  ;;  %v1500_v46 = vmul.f32 %v1471_v19, %v6580_v61 }
 0x312   :  { %v1464_v39 = vsub.f32 %v6646_v60, %v1456_v35  ;;  %v1501_v56 = vmul.f32 %v1475_v48, %v6585_v5  ;;  %v1502_v57 = vmul.f32 %v1479_v49, %v6591_v11 }
 0x313   :  { %v1439_v43 = vrot.slane %v1432_v40, %v6486_v20  ;;  %v1307_v25 = vadd.f32 1e-05, %v1299_v42  ;;  %v1503_v47 = vmul.f32 %v1483_v28, %v6597_v21 }
 0x314   :  { %v1515_v14 = vrot.slane %v1464_v39, %v6387_v31  ;;  %v1519_v7 = vrot.slane %v1464_v39, %v6393_v38 }
 0x315   :  { %v1457_v44 = vrot.slane %v1439_v43, 7  ;;  %5925 = vrsqrt.f32 %v1307_v25 }
 0x316   :  { %v1559_v52 = vrot.slane %v1519_v7, %v6387_v31  ;;  %v1555_v6 = vrot.slane %v1515_v14, %v6387_v31 }
 0x317   :  { %v1465_v51 = vsub.f32 %v6646_v60, %v1457_v44 }
 0x318   :  { %v1585_v3 = vadd.f32 %v1559_v52, %v1501_v56  ;;  %v1584_v9 = vadd.f32 %v1555_v6, %v1500_v46  ;;  %v5920_v10 = vpop.eup %5919 }
 0x319   :  { %v1523_v37 = vrot.slane %v1465_v51, %v6387_v31  ;;  %v1527_v45 = vrot.slane %v1465_v51, %v6393_v38 }
 0x31a   :  { %v1593_v16 = vmax.f32 %v1585_v3, 0.0  ;;  %v1592_v30 = vmax.f32 %v1584_v9, 0.0 }
 0x31b   :  { %v1567_v12 = vrot.slane %v1527_v45, %v6387_v31  ;;  %v1563_v4 = vrot.slane %v1523_v37, %v6387_v31  ;;  %v5922_v13 = vpop.eup %5921 }
 0x31c   :  { %v1340_v0 = vcombine.low %v5920_v10, %v5922_v13 }
 0x31d   :  { %v1587_v15 = vadd.f32 %v1567_v12, %v1503_v47  ;;  %v1586_v5 = vadd.f32 %v1563_v4, %v1502_v57  ;;  %v5924_v11 = vpop.eup %5923 }
 0x31e   :  { %v1347_v61 = vrot.slane %v1340_v0, %v6486_v20 }
 0x31f   :  { %v1595_v55 = vmax.f32 %v1587_v15, 0.0  ;;  %v1594_v27 = vmax.f32 %v1586_v5, 0.0 }
 0x320   :  { %v1362_v35 = vmul.f32 %v1347_v61, %v6646_v60 }
 0x321   :  { %v1633_v21 = vpack.c.bf16 %v1595_v55, %v1593_v16  ;;  %v1632_v29 = vpack.c.bf16 %v1594_v27, %v1592_v30 }
 0x322   :  { %v5926_v40 = vpop.eup %5925  ;;  %v1387_v41 = vrot.slane %v1362_v35, %v6383_v26  ;;  %v1391_v42 = vrot.slane %v1362_v35, %v6390_v32  ;;  %v5724_v35 = vld [vmem:[#allocation6 + $0xe4] ss:$8 sps:$4 sm:$0xff]  }
 0x323   :  { %1764 = vmatprep.mubr.bf16.mxu0 %v1633_v21  ;;  %v1348_v39 = vcombine.low %v5924_v11, %v5926_v40  ;;  %v5722_v40 = vld [vmem:[#allocation6 + $0xe0] ss:$8 sps:$4 sm:$0xff]  }
 0x324   :  { %1765 = vmatmul.mubr.bf16.vlgmr.msra.gmra.mxu0 %v1632_v29  ;;  %v1412_v43 = vmul.f32 %v1387_v41, %v6644_v53  ;;  %v1413_v25 = vmul.f32 %v1391_v42, %v6651_v50  ;;  %v1491_v45 = vrot.slane %v1391_v42, %v6383_v26  ;;  %v1487_v47 = vrot.slane %v1387_v41, %v6383_v26  ;;  %v5727_v41 = vld [vmem:[#allocation6 + $0xd4] ss:$8 sps:$4 sm:$0xff]   ;;  %v5725_v42 = vld [vmem:[#allocation6 + $0xd0] ss:$8 sps:$4 sm:$0xff]  }
 0x325   :  { %v1355_v14 = vrot.slane %v1348_v39, %v6486_v20  ;;  %v5730_v39 = vld [vmem:[#allocation6 + $0xc4] ss:$8 sps:$4 sm:$0xff]  }
 0x326   :  { %v1440_v7 = vcombine.low %v1412_v43, %v1413_v25  ;;  %v1505_v4 = vmul.f32 %v1491_v45, %v6625_v22  ;;  %v1504_v10 = vmul.f32 %v1487_v47, %v6620_v2  ;;  %v5728_v43 = vld [vmem:[#allocation6 + $0xc0] ss:$8 sps:$4 sm:$0xff]   ;;  %v5733_v25 = vld [vmem:[#allocation6 + $0xb4] ss:$8 sps:$4 sm:$0xff]  }
 0x327   :  { %v1363_v19 = vmul.f32 %v1355_v14, %v6646_v60  ;;  %v5731_v14 = vld [vmem:[#allocation6 + $0xb0] ss:$8 sps:$4 sm:$0xff]  }
 0x328   :  { %v1447_v49 = vrot.slane %v1440_v7, %v6486_v20  ;;  %v5736_v7 = vld [vmem:[#allocation6 + $0xa4] ss:$8 sps:$4 sm:$0xff]  }
 0x329   :  { %v1395_v48 = vrot.slane %v1363_v19, %v6383_v26  ;;  %v1399_v44 = vrot.slane %v1363_v19, %v6390_v32  ;;  %v5734_v19 = vld [vmem:[#allocation6 + $0xa0] ss:$8 sps:$4 sm:$0xff]  }
 0x32a   :  { %v1458_v52 = vrot.slane %v1447_v49, 7  ;;  %v5742_v49 = vld [vmem:[#allocation6 + $0x84] ss:$8 sps:$4 sm:$0xff]  }
 0x32b   :  { %v1414_v28 = vmul.f32 %v1395_v48, %v6653_v17  ;;  %v1415_v51 = vmul.f32 %v1399_v44, %v6663_v54  ;;  %v1499_v57 = vrot.slane %v1399_v44, %v6383_v26  ;;  %v1495_v17 = vrot.slane %v1395_v48, %v6383_v26  ;;  %v5739_v48 = vld [vmem:[#allocation6 + $0x94] ss:$8 sps:$4 sm:$0xff]   ;;  %v5737_v44 = vld [vmem:[#allocation6 + $0x90] ss:$8 sps:$4 sm:$0xff]  }
 0x32c   :  { %v1466_v53 = vsub.f32 %v6646_v60, %v1458_v52 }
 0x32d   :  { %v1448_v6 = vcombine.low %v1414_v28, %v1415_v51  ;;  %v1507_v15 = vmul.f32 %v1499_v57, %v6637_v8  ;;  %v1506_v5 = vmul.f32 %v1495_v17, %v6631_v18  ;;  %v5721_v8 = vld [vmem:[#allocation6 + $0xf4] ss:$8 sps:$4 sm:$0xff]   ;;  %v5719_v18 = vld [vmem:[#allocation6 + $0xf0] ss:$8 sps:$4 sm:$0xff]   ;;  %v5740_v28 = vld [vmem:[#allocation6 + $0x80] ss:$8 sps:$4 sm:$0xff]  }
 0x32e   :  { %v1535_v56 = vrot.slane %v1466_v53, %v6393_v38  ;;  %v1531_v37 = vrot.slane %v1466_v53, %v6387_v31  ;;  %2037 = vmatprep.subr.bf16.mxu0 %v5721_v8 }
 0x32f   :  { %v1455_v50 = vrot.slane %v1448_v6, %v6486_v20  ;;  %2038 = vmatpush1.bf16.msra.mxu0 %v5719_v18 }
 0x330   :  { %v1575_v12 = vrot.slane %v1535_v56, %v6387_v31  ;;  %v1571_v3 = vrot.slane %v1531_v37, %v6387_v31  ;;  %2039 = vmatprep.subr.bf16.mxu0 %v5724_v35 }
 0x331   :  { %v1459_v46 = vrot.slane %v1455_v50, 7 }
 0x332   :  { %v1589_v16 = vadd.f32 %v1575_v12, %v1505_v4  ;;  %v1588_v55 = vadd.f32 %v1571_v3, %v1504_v10 }
 0x333   :  { %v1467_v54 = vsub.f32 %v6646_v60, %v1459_v46  ;;  %2040 = vmatpush1.bf16.msra.mxu0 %v5722_v40 }
 0x334   :  { %v1597_v61 = vmax.f32 %v1589_v16, 0.0  ;;  %v1596_v21 = vmax.f32 %v1588_v55, 0.0  ;;  %2041 = vmatprep.subr.bf16.mxu0 %v5727_v41 }
 0x335   :  { %v1543_v9 = vrot.slane %v1467_v54, %v6393_v38  ;;  %v1539_v13 = vrot.slane %v1467_v54, %v6387_v31 }
 0x337   :  { %v1583_v0 = vrot.slane %v1543_v9, %v6387_v31  ;;  %v1579_v60 = vrot.slane %v1539_v13, %v6387_v31  ;;  %2042 = vmatpush1.bf16.msra.mxu0 %v5725_v42 }
 0x338   :  { %2043 = vmatprep.subr.bf16.mxu0 %v5730_v39 }
 0x339   :  { %v1591_v30 = vadd.f32 %v1583_v0, %v1507_v15  ;;  %v1590_v27 = vadd.f32 %v1579_v60, %v1506_v5 }
 0x33b   :  { %v1599_v22 = vmax.f32 %v1591_v30, 0.0  ;;  %v1598_v29 = vmax.f32 %v1590_v27, 0.0  ;;  %2044 = vmatpush1.bf16.msra.mxu0 %v5728_v43 }
 0x33c   :  { %2045 = vmatprep.subr.bf16.mxu0 %v5733_v25 }
 0x33d   :  { %v1635_v11 = vpack.c.bf16 %v1599_v22, %v1597_v61  ;;  %v1634_v2 = vpack.c.bf16 %v1598_v29, %v1596_v21 }
 0x33f   :  { %1772 = vmatprep.mubr.bf16.mxu0 %v1635_v11  ;;  %2046 = vmatpush1.bf16.msra.mxu0 %v5731_v14 }
 0x340   :  { %1773 = vmatmul.mubr.bf16.gmra.mxu0 %v1634_v2  ;;  %2047 = vmatprep.subr.bf16.mxu0 %v5736_v7 }
 0x341   :  { %2069 = vmatprep.mubr.bf16.mxu0 %v6256_v1 }
 0x343   :  { %2048 = vmatpush1.bf16.msra.mxu0 %v5734_v19 }
 0x344   :  { %2049 = vmatprep.subr.bf16.mxu0 %v5739_v48 }
 0x347   :  { %2050 = vmatpush1.bf16.msra.mxu0 %v5737_v44 }
 0x348   :  { %2051 = vmatprep.subr.bf16.mxu0 %v5742_v49 }
 0x34b   :  { %2052 = vmatpush1.bf16.msra.mxu0 %v5740_v28 }
 0x3e4   :  { %v5529_v51 = vpop.f32.mrf.mxu0 }
 0x3e6   :  { %v5530_v52 = vpop.f32.mrf.mxu0 }
 0x3e7   :  { %v6727_v6 = vadd.f32 %v5530_v52, %v5529_v51 }
 0x3e8   :  { %v5532_v53 = vpop.f32.mrf.mxu0 }
 0x3e9   :  { %v1782_v50 = vrot.slane %v6727_v6, 4  ;;  %v1806_v56 = vmul.f32 %v6727_v6, %v6727_v6 }
 0x3ea   :  { %v5533_v37 = vpop.f32.mrf.mxu0 }
 0x3eb   :  { %v1783_v45 = vadd.f32 %v6727_v6, %v1782_v50  ;;  %v1810_v46 = vrot.slane %v1806_v56, 4  ;;  %v6733_v47 = vadd.f32 %v5533_v37, %v5532_v53  ;;  %v6747_v37 = vld [vmem:[#allocation13] sm:$0x3] }
 0x3ed   :  { %v1784_v57 = vrot.slane %v1783_v45, 2  ;;  %v1811_v17 = vadd.f32 %v1810_v46, %v1806_v56  ;;  %v1788_v54 = vrot.slane %v6733_v47, 4  ;;  %v1807_v12 = vmul.f32 %v6733_v47, %v6733_v47 }
 0x3ef   :  { %v1785_v3 = vadd.f32 %v1784_v57, %v1783_v45  ;;  %v1812_v4 = vrot.slane %v1811_v17, 2  ;;  %v1789_v9 = vadd.f32 %v6733_v47, %v1788_v54  ;;  %v1816_v10 = vrot.slane %v1807_v12, 4 }
 0x3f1   :  { %v1786_v13 = vrot.slane %v1785_v3, 1  ;;  %v1813_v15 = vadd.f32 %v1812_v4, %v1811_v17  ;;  %v1790_v5 = vrot.slane %v1789_v9, 2  ;;  %v1817_v0 = vadd.f32 %v1816_v10, %v1807_v12 }
 0x3f3   :  { %v1787_v16 = vadd.f32 %v1786_v13, %v1785_v3  ;;  %v1814_v60 = vrot.slane %v1813_v15, 1  ;;  %v1791_v55 = vadd.f32 %v1790_v5, %v1789_v9  ;;  %v1818_v30 = vrot.slane %v1817_v0, 2 }
 0x3f5   :  { %v1815_v27 = vadd.f32 %v1814_v60, %v1813_v15  ;;  %v1834_v61 = vmul.f32 0.125, %v1787_v16  ;;  %v1792_v22 = vrot.slane %v1791_v55, 1  ;;  %v1819_v21 = vadd.f32 %v1818_v30, %v1817_v0 }
 0x3f7   :  { %v1838_v29 = vmul.f32 0.125, %v1815_v27  ;;  %v1842_v11 = vmul.f32 %v1834_v61, %v1834_v61  ;;  %v1793_v2 = vadd.f32 %v1792_v22, %v1791_v55  ;;  %v1820_v8 = vrot.slane %v1819_v21, 1 }
 0x3f9   :  { %v1846_v18 = vsub.f32 %v1838_v29, %v1842_v11  ;;  %v1821_v35 = vadd.f32 %v1820_v8, %v1819_v21  ;;  %v1835_v40 = vmul.f32 0.125, %v1793_v2 }
 0x3fb   :  { %v1850_v41 = vmax.f32 %v1846_v18, 0.0  ;;  %v1839_v42 = vmul.f32 0.125, %v1821_v35  ;;  %v1843_v39 = vmul.f32 %v1835_v40, %v1835_v40 }
 0x3fd   :  { %v1854_v43 = vadd.f32 1e-05, %v1850_v41  ;;  %v1847_v25 = vsub.f32 %v1839_v42, %v1843_v39 }
 0x3ff   :  { %5927 = vrsqrt.f32 %v1854_v43  ;;  %v1851_v14 = vmax.f32 %v1847_v25, 0.0 }
 0x400   :  { %v5535_v19 = vpop.f32.mrf.mxu0 }
 0x401   :  { %v1855_v7 = vadd.f32 1e-05, %v1851_v14 }
 0x402   :  { %v5536_v48 = vpop.f32.mrf.mxu0 }
 0x403   :  { %5929 = vrsqrt.f32 %v1855_v7  ;;  %v6739_v44 = vadd.f32 %v5536_v48, %v5535_v19 }
 0x404   :  { %v5538_v49 = vpop.f32.mrf.mxu0 }
 0x405   :  { %v1794_v28 = vrot.slane %v6739_v44, 4  ;;  %v1808_v51 = vmul.f32 %v6739_v44, %v6739_v44 }
 0x406   :  { %v5539_v52 = vpop.f32.mrf.mxu0 }
 0x407   :  { %v1795_v53 = vadd.f32 %v6739_v44, %v1794_v28  ;;  %v1822_v50 = vrot.slane %v1808_v51, 4  ;;  %v6745_v56 = vadd.f32 %v5539_v52, %v5538_v49 }
 0x409   :  { %v1796_v45 = vrot.slane %v1795_v53, 2  ;;  %v1823_v46 = vadd.f32 %v1822_v50, %v1808_v51  ;;  %v1800_v57 = vrot.slane %v6745_v56, 4  ;;  %v1809_v17 = vmul.f32 %v6745_v56, %v6745_v56 }
 0x40b   :  { %v1797_v12 = vadd.f32 %v1796_v45, %v1795_v53  ;;  %v1824_v3 = vrot.slane %v1823_v46, 2  ;;  %v1801_v4 = vadd.f32 %v6745_v56, %v1800_v57  ;;  %v1828_v9 = vrot.slane %v1809_v17, 4 }
 0x40c   :  { %v5928_v54 = vpop.eup %5927 }
 0x40d   :  { %v1862_v10 = vmul.f32 %v5928_v54, %v6747_v37  ;;  %v1798_v13 = vrot.slane %v1797_v12, 1  ;;  %v1825_v15 = vadd.f32 %v1824_v3, %v1823_v46  ;;  %v1802_v5 = vrot.slane %v1801_v4, 2 }
 0x40e   :  { %v1829_v0 = vadd.f32 %v1828_v9, %v1809_v17 }
 0x40f   :  { %v1866_v16 = vmul.f32 %v1862_v10, %v1834_v61  ;;  %v1799_v55 = vadd.f32 %v1798_v13, %v1797_v12  ;;  %v1826_v30 = vrot.slane %v1825_v15, 1  ;;  %v1803_v27 = vadd.f32 %v1802_v5, %v1801_v4  ;;  %v6016_v5 = vld [vmem:[%s7569_s1 + $0x8] sm:$0xff] }
 0x410   :  { %v5930_v60 = vpop.eup %5929  ;;  %v1830_v22 = vrot.slane %v1829_v0, 2  ;;  %v1889_v29 = vrot.slane %v1862_v10, %v6383_v26 }
 0x411   :  { %v1874_v21 = vrot.slane %v1866_v16, 7  ;;  %v1863_v11 = vmul.f32 %v5930_v60, %v6747_v37  ;;  %v1827_v2 = vadd.f32 %v1826_v30, %v1825_v15  ;;  %v1836_v8 = vmul.f32 0.125, %v1799_v55 }
 0x412   :  { %v1804_v18 = vrot.slane %v1803_v27, 1  ;;  %v1831_v35 = vadd.f32 %v1830_v22, %v1829_v0  ;;  %v1902_v14 = vmul.f32 %v6727_v6, %v1889_v29 }
 0x413   :  { %v1882_v41 = vsub.f32 %v6747_v37, %v1874_v21  ;;  %v1867_v42 = vmul.f32 %v1863_v11, %v1835_v40  ;;  %v1840_v39 = vmul.f32 0.125, %v1827_v2  ;;  %v1844_v43 = vmul.f32 %v1836_v8, %v1836_v8 }
 0x414   :  { %v1805_v61 = vadd.f32 %v1804_v18, %v1803_v27  ;;  %v1832_v25 = vrot.slane %v1831_v35, 1  ;;  %v1893_v48 = vrot.slane %v1863_v11, %v6383_v26 }
 0x415   :  { %v1909_v7 = vrot.slane %v1882_v41, %v6387_v31  ;;  %v1875_v19 = vrot.slane %v1867_v42, 7  ;;  %v1848_v49 = vsub.f32 %v1840_v39, %v1844_v43 }
 0x416   :  { %v1833_v28 = vadd.f32 %v1832_v25, %v1831_v35  ;;  %v1837_v51 = vmul.f32 0.125, %v1805_v61  ;;  %v1903_v57 = vmul.f32 %v6733_v47, %v1893_v48  ;;  %v6015_v47 = vld [vmem:[%s7569_s1] sm:$0xff] }
 0x417   :  { %v1922_v52 = vadd.f32 %v1909_v7, %v1902_v14  ;;  %v1883_v53 = vsub.f32 %v6747_v37, %v1875_v19  ;;  %v1852_v50 = vmax.f32 %v1848_v49, 0.0  ;;  %v5751_v19 = vld [vmem:[#allocation9 + $0x154] ss:$8 sps:$4 sm:$0xff]   ;;  %v5749_v48 = vld [vmem:[#allocation9 + $0x150] ss:$8 sps:$4 sm:$0xff]  }
 0x418   :  { %v1841_v45 = vmul.f32 0.125, %v1833_v28  ;;  %v1845_v40 = vmul.f32 %v1837_v51, %v1837_v51  ;;  %v5754_v49 = vld [vmem:[#allocation9 + $0x144] ss:$8 sps:$4 sm:$0xff]   ;;  %v5752_v28 = vld [vmem:[#allocation9 + $0x140] ss:$8 sps:$4 sm:$0xff]  }
 0x419   :  { %v1926_v46 = vmax.f32 %v1922_v52, 0.0  ;;  %v1913_v17 = vrot.slane %v1883_v53, %v6387_v31  ;;  %v1856_v6 = vadd.f32 1e-05, %v1852_v50  ;;  %v5755_v52 = vld [vmem:[#allocation9 + $0x130] ss:$8 sps:$4 sm:$0xff]  }
 0x41a   :  { %v1849_v54 = vsub.f32 %v1841_v45, %v1845_v40  ;;  %v5760_v53 = vld [vmem:[#allocation9 + $0x124] ss:$8 sps:$4 sm:$0xff]   ;;  %v5758_v50 = vld [vmem:[#allocation9 + $0x120] ss:$8 sps:$4 sm:$0xff]   ;;  %v5763_v45 = vld [vmem:[#allocation9 + $0x114] ss:$8 sps:$4 sm:$0xff]  }
 0x41b   :  { %v1923_v12 = vadd.f32 %v1913_v17, %v1903_v57  ;;  %5931 = vrsqrt.f32 %v1856_v6  ;;  %v6765_v4 = vadd.f32 %v1926_v46, %v302_v62  ;;  %v5761_v40 = vld [vmem:[#allocation9 + $0x110] ss:$8 sps:$4 sm:$0xff]   ;;  %v5766_v46 = vld [vmem:[#allocation9 + $0x104] ss:$8 sps:$4 sm:$0xff]   ;;  %v5764_v57 = vld [vmem:[#allocation9 + $0x100] ss:$8 sps:$4 sm:$0xff]  }
 0x41c   :  { %v1853_v3 = vmax.f32 %v1849_v54, 0.0  ;;  %v5769_v17 = vld [vmem:[#allocation9 + $0x1f4] ss:$8 sps:$4 sm:$0xff]   ;;  %v5767_v6 = vld [vmem:[#allocation9 + $0x1f0] ss:$8 sps:$4 sm:$0xff]  }
 0x41d   :  { %v1927_v9 = vmax.f32 %v1923_v12, 0.0  ;;  %v1934_v15 = vadd.f32 %v6015_v47, %v6765_v4  ;;  %v5772_v54 = vld [vmem:[#allocation9 + $0x1e4] ss:$8 sps:$4 sm:$0xff]   ;;  %v5770_v12 = vld [vmem:[#allocation9 + $0x1e0] ss:$8 sps:$4 sm:$0xff]  }
 0x41e   :  { %v1857_v10 = vadd.f32 1e-05, %v1853_v3  ;;  %v5775_v3 = vld [vmem:[#allocation9 + $0x1d4] ss:$8 sps:$4 sm:$0xff]   ;;  %v5776_v47 = vld [vmem:[#allocation9 + $0x1c0] ss:$8 sps:$4 sm:$0xff]  }
 0x41f   :  { %v6769_v13 = vadd.f32 %v1927_v9, %v303_v63  ;;  %v5773_v9 = vld [vmem:[#allocation9 + $0x1d0] ss:$8 sps:$4 sm:$0xff]  }
 0x420   :  { %5933 = vrsqrt.f32 %v1857_v10  ;;  %v5778_v10 = vld [vmem:[#allocation9 + $0x1c4] ss:$8 sps:$4 sm:$0xff]  }
 0x421   :  { %v1935_v58 = vadd.f32 %v6016_v5, %v6769_v13  ;;  %v5779_v5 = vld [vmem:[#allocation9 + $0x1b0] ss:$8 sps:$4 sm:$0xff]  }
 0x423   :  { %v1955_v62 = vpack.c.bf16 %v1935_v58, %v1934_v15  ;;  %v5781_v15 = vld [vmem:[#allocation9 + $0x1b4] ss:$8 sps:$4 sm:$0xff]   ;;  %v5784_v58 = vld [vmem:[#allocation9 + $0x1a4] ss:$8 sps:$4 sm:$0xff]  }
 0x425   :  { %2070 = vmatmul.mubr.bf16.vlgmr.msra.gmra.mxu0 %v1955_v62  ;;  %v5782_v62 = vld [vmem:[#allocation9 + $0x1a0] ss:$8 sps:$4 sm:$0xff]  }
 0x426   :  { %2079 = vmatprep.mubr.bf16.mxu0 %v6256_v1 }
 0x428   :  { %v5932_v59 = vpop.eup %5931 }
 0x429   :  { %v1864_v63 = vmul.f32 %v5932_v59, %v6747_v37  ;;  %v5787_v59 = vld [vmem:[#allocation9 + $0x194] ss:$8 sps:$4 sm:$0xff]  }
 0x42b   :  { %v1868_v0 = vmul.f32 %v1864_v63, %v1836_v8  ;;  %v1897_v55 = vrot.slane %v1864_v63, %v6383_v26  ;;  %v5785_v63 = vld [vmem:[#allocation9 + $0x190] ss:$8 sps:$4 sm:$0xff]  }
 0x42d   :  { %v5934_v16 = vpop.eup %5933  ;;  %v1876_v60 = vrot.slane %v1868_v0, 7  ;;  %v1904_v21 = vmul.f32 %v6739_v44, %v1897_v55  ;;  %v5790_v0 = vld [vmem:[#allocation9 + $0x184] ss:$8 sps:$4 sm:$0xff]  }
 0x42e   :  { %v1865_v30 = vmul.f32 %v5934_v16, %v6747_v37  ;;  %v5788_v16 = vld [vmem:[#allocation9 + $0x180] ss:$8 sps:$4 sm:$0xff]  }
 0x42f   :  { %v1884_v22 = vsub.f32 %v6747_v37, %v1876_v60 }
 0x430   :  { %v1869_v27 = vmul.f32 %v1865_v30, %v1837_v51  ;;  %v1901_v11 = vrot.slane %v1865_v30, %v6383_v26  ;;  %v5757_v51 = vld [vmem:[#allocation9 + $0x134] ss:$8 sps:$4 sm:$0xff]  }
 0x431   :  { %v1917_v2 = vrot.slane %v1884_v22, %v6387_v31 }
 0x432   :  { %v1877_v29 = vrot.slane %v1869_v27, 7  ;;  %v1905_v8 = vmul.f32 %v6745_v56, %v1901_v11  ;;  %v6018_v56 = vld [vmem:[%s7569_s1 + $0x18] sm:$0xff] }
 0x433   :  { %v1924_v35 = vadd.f32 %v1917_v2, %v1904_v21 }
 0x434   :  { %v1885_v18 = vsub.f32 %v6747_v37, %v1877_v29  ;;  %v6017_v37 = vld [vmem:[%s7569_s1 + $0x10] sm:$0xff] }
 0x435   :  { %v1928_v42 = vmax.f32 %v1924_v35, 0.0 }
 0x436   :  { %v1921_v41 = vrot.slane %v1885_v18, %v6387_v31 }
 0x437   :  { %v6792_v61 = vadd.f32 %v1928_v42, %v304_v33  ;;  %v5743_v33 = vld [vmem:[#allocation9 + $0x170] ss:$8 sps:$4 sm:$0xff]  }
 0x438   :  { %v1925_v39 = vadd.f32 %v1921_v41, %v1905_v8  ;;  %2734 = vmatpush1.bf16.msra.mxu1 %v5743_v33 }
 0x439   :  { %v1936_v25 = vadd.f32 %v6017_v37, %v6792_v61  ;;  %2735 = vmatprep.subr.bf16.mxu1 %v5748_v34 }
 0x43a   :  { %v1929_v43 = vmax.f32 %v1925_v39, 0.0 }
 0x43c   :  { %v6796_v44 = vadd.f32 %v1929_v43, %v305_v36  ;;  %v5746_v36 = vld [vmem:[#allocation9 + $0x160] ss:$8 sps:$4 sm:$0xff]  }
 0x43d   :  { %2736 = vmatpush1.bf16.msra.mxu1 %v5746_v36 }
 0x43e   :  { %v1937_v14 = vadd.f32 %v6018_v56, %v6796_v44  ;;  %2737 = vmatprep.subr.bf16.mxu1 %v5751_v19 }
 0x440   :  { %v1956_v7 = vpack.c.bf16 %v1937_v14, %v1936_v25 }
 0x441   :  { %2738 = vmatpush1.bf16.msra.mxu1 %v5749_v48 }
 0x442   :  { %2080 = vmatmul.mubr.bf16.gmra.mxu0 %v1956_v7  ;;  %2739 = vmatprep.subr.bf16.mxu1 %v5754_v49 }
 0x445   :  { %2740 = vmatpush1.bf16.msra.mxu1 %v5752_v28 }
 0x446   :  { %2741 = vmatprep.subr.bf16.mxu1 %v5757_v51 }
 0x449   :  { %2742 = vmatpush1.bf16.msra.mxu1 %v5755_v52 }
 0x44a   :  { %2743 = vmatprep.subr.bf16.mxu1 %v5760_v53 }
 0x44d   :  { %2744 = vmatpush1.bf16.msra.mxu1 %v5758_v50 }
 0x44e   :  { %2745 = vmatprep.subr.bf16.mxu1 %v5763_v45 }
 0x451   :  { %2746 = vmatpush1.bf16.msra.mxu1 %v5761_v40 }
 0x452   :  { %2747 = vmatprep.subr.bf16.mxu1 %v5766_v46 }
 0x455   :  { %2748 = vmatpush1.bf16.msra.mxu1 %v5764_v57 }
 0x456   :  { %2749 = vmatprep.subr.bf16.mxu1 %v5769_v17 }
 0x459   :  { %2750 = vmatpush2.bf16.msra.mxu1 %v5767_v6 }
 0x45a   :  { %2751 = vmatprep.subr.bf16.mxu1 %v5772_v54 }
 0x45d   :  { %2752 = vmatpush2.bf16.msra.mxu1 %v5770_v12 }
 0x45e   :  { %2753 = vmatprep.subr.bf16.mxu1 %v5775_v3 }
 0x461   :  { %2754 = vmatpush2.bf16.msra.mxu1 %v5773_v9 }
 0x462   :  { %2755 = vmatprep.subr.bf16.mxu1 %v5778_v10 }
 0x465   :  { %2756 = vmatpush2.bf16.msra.mxu1 %v5776_v47 }
 0x466   :  { %2757 = vmatprep.subr.bf16.mxu1 %v5781_v15 }
 0x469   :  { %2758 = vmatpush2.bf16.msra.mxu1 %v5779_v5 }
 0x46a   :  { %2759 = vmatprep.subr.bf16.mxu1 %v5784_v58 }
 0x46d   :  { %2760 = vmatpush2.bf16.msra.mxu1 %v5782_v62 }
 0x46e   :  { %2761 = vmatprep.subr.bf16.mxu1 %v5787_v59 }
 0x471   :  { %2762 = vmatpush2.bf16.msra.mxu1 %v5785_v63 }
 0x472   :  { %2763 = vmatprep.subr.bf16.mxu1 %v5790_v0 }
 0x475   :  { %2764 = vmatpush2.bf16.msra.mxu1 %v5788_v16 }
 0x4e5   :  { %v6806_v60 = vpop.f32.mrf.mxu0 }
 0x4e6   :  { %v2092_v55 = vrot.slane %v6806_v60, 4  ;;  %v2140_v30 = vmul.f32 %v6806_v60, %v6806_v60 }
 0x4e7   :  { %v6811_v27 = vpop.f32.mrf.mxu0 }
 0x4e8   :  { %v2093_v22 = vadd.f32 %v2092_v55, %v6806_v60  ;;  %v2148_v21 = vrot.slane %v2140_v30, 4  ;;  %v2098_v29 = vrot.slane %v6811_v27, 4  ;;  %v2141_v11 = vmul.f32 %v6811_v27, %v6811_v27 }
 0x4e9   :  { %v6817_v2 = vpop.f32.mrf.mxu0 }
 0x4ea   :  { %v2094_v18 = vrot.slane %v2093_v22, 2  ;;  %v2149_v35 = vadd.f32 %v2148_v21, %v2140_v30  ;;  %v2099_v8 = vadd.f32 %v2098_v29, %v6811_v27  ;;  %v2154_v41 = vrot.slane %v2141_v11, 4 }
 0x4eb   :  { %v2104_v42 = vrot.slane %v6817_v2, 4  ;;  %v2142_v39 = vmul.f32 %v6817_v2, %v6817_v2  ;;  %v6823_v43 = vpop.f32.mrf.mxu0 }
 0x4ec   :  { %v2095_v37 = vadd.f32 %v2094_v18, %v2093_v22  ;;  %v2150_v25 = vrot.slane %v2149_v35, 2  ;;  %v2100_v56 = vrot.slane %v2099_v8, 2  ;;  %v2155_v14 = vadd.f32 %v2154_v41, %v2141_v11 }
 0x4ed   :  { %v2105_v7 = vadd.f32 %v2104_v42, %v6817_v2  ;;  %v2160_v23 = vrot.slane %v2142_v39, 4  ;;  %v2110_v33 = vrot.slane %v6823_v43, 4  ;;  %v2143_v34 = vmul.f32 %v6823_v43, %v6823_v43 }
 0x4ee   :  { %v2096_v36 = vrot.slane %v2095_v37, 1  ;;  %v2151_v19 = vadd.f32 %v2150_v25, %v2149_v35  ;;  %v2101_v48 = vadd.f32 %v2100_v56, %v2099_v8  ;;  %v2156_v49 = vrot.slane %v2155_v14, 2 }
 0x4ef   :  { %v2106_v28 = vrot.slane %v2105_v7, 2  ;;  %v2161_v51 = vadd.f32 %v2160_v23, %v2142_v39  ;;  %v2111_v52 = vadd.f32 %v2110_v33, %v6823_v43  ;;  %v2166_v53 = vrot.slane %v2143_v34, 4 }
 0x4f0   :  { %v2097_v50 = vadd.f32 %v2096_v36, %v2095_v37  ;;  %v2152_v45 = vrot.slane %v2151_v19, 1  ;;  %v2102_v40 = vrot.slane %v2101_v48, 1  ;;  %v2157_v46 = vadd.f32 %v2156_v49, %v2155_v14 }
 0x4f1   :  { %v2107_v57 = vadd.f32 %v2106_v28, %v2105_v7  ;;  %v2162_v17 = vrot.slane %v2161_v51, 2  ;;  %v2112_v6 = vrot.slane %v2111_v52, 2  ;;  %v2167_v54 = vadd.f32 %v2166_v53, %v2143_v34 }
 0x4f2   :  { %v2153_v12 = vadd.f32 %v2152_v45, %v2151_v19  ;;  %v6830_v3 = vmul.f32 0.125, %v2097_v50  ;;  %v2103_v9 = vadd.f32 %v2102_v40, %v2101_v48  ;;  %v2158_v10 = vrot.slane %v2157_v46, 1 }
 0x4f3   :  { %v2108_v47 = vrot.slane %v2107_v57, 1  ;;  %v2163_v15 = vadd.f32 %v2162_v17, %v2161_v51  ;;  %v2113_v5 = vadd.f32 %v2112_v6, %v2111_v52  ;;  %v2168_v58 = vrot.slane %v2167_v54, 2 }
 0x4f4   :  { %v2204_v62 = vmul.f32 0.125, %v2153_v12  ;;  %v2212_v59 = vmul.f32 %v6830_v3, %v6830_v3  ;;  %v2159_v63 = vadd.f32 %v2158_v10, %v2157_v46  ;;  %v6834_v0 = vmul.f32 0.125, %v2103_v9 }
 0x4f5   :  { %v2109_v16 = vadd.f32 %v2108_v47, %v2107_v57  ;;  %v2164_v55 = vrot.slane %v2163_v15, 1  ;;  %v2114_v30 = vrot.slane %v2113_v5, 1  ;;  %v2169_v22 = vadd.f32 %v2168_v58, %v2167_v54 }
 0x4f6   :  { %v2220_v21 = vsub.f32 %v2204_v62, %v2212_v59  ;;  %v2205_v29 = vmul.f32 0.125, %v2159_v63  ;;  %v2213_v11 = vmul.f32 %v6834_v0, %v6834_v0 }
 0x4f7   :  { %v2165_v18 = vadd.f32 %v2164_v55, %v2163_v15  ;;  %v6838_v35 = vmul.f32 0.125, %v2109_v16  ;;  %v2115_v8 = vadd.f32 %v2114_v30, %v2113_v5  ;;  %v2170_v41 = vrot.slane %v2169_v22, 1 }
 0x4f8   :  { %v2228_v42 = vmax.f32 %v2220_v21, 0.0  ;;  %v2221_v39 = vsub.f32 %v2205_v29, %v2213_v11 }
 0x4f9   :  { %v2206_v37 = vmul.f32 0.125, %v2165_v18  ;;  %v2214_v25 = vmul.f32 %v6838_v35, %v6838_v35  ;;  %v2171_v56 = vadd.f32 %v2170_v41, %v2169_v22  ;;  %v6842_v14 = vmul.f32 0.125, %v2115_v8 }
 0x4fa   :  { %v2236_v7 = vadd.f32 1e-05, %v2228_v42  ;;  %v2229_v23 = vmax.f32 %v2221_v39, 0.0 }
 0x4fb   :  { %v2222_v33 = vsub.f32 %v2206_v37, %v2214_v25  ;;  %v2207_v34 = vmul.f32 0.125, %v2171_v56  ;;  %v2215_v36 = vmul.f32 %v6842_v14, %v6842_v14  ;;  %v6868_v56 = vld [vmem:[#allocation7 + $0x4] sm:$0xf] }
 0x4fc   :  { %v2237_v19 = vadd.f32 1e-05, %v2229_v23  ;;  %5935 = vrsqrt.f32 %v2236_v7 }
 0x4fd   :  { %v2230_v48 = vmax.f32 %v2222_v33, 0.0  ;;  %v2223_v49 = vsub.f32 %v2207_v34, %v2215_v36 }
 0x4fe   :  { %5937 = vrsqrt.f32 %v2237_v19 }
 0x4ff   :  { %v2238_v28 = vadd.f32 1e-05, %v2230_v48  ;;  %v2231_v51 = vmax.f32 %v2223_v49, 0.0 }
 0x501   :  { %v2239_v52 = vadd.f32 1e-05, %v2231_v51  ;;  %5939 = vrsqrt.f32 %v2238_v28 }
 0x502   :  { %v6846_v53 = vpop.f32.mrf.mxu0 }
 0x503   :  { %5941 = vrsqrt.f32 %v2239_v52  ;;  %v2116_v50 = vrot.slane %v6846_v53, 4  ;;  %v2144_v45 = vmul.f32 %v6846_v53, %v6846_v53 }
 0x504   :  { %v6851_v40 = vpop.f32.mrf.mxu0 }
 0x505   :  { %v2117_v46 = vadd.f32 %v2116_v50, %v6846_v53  ;;  %v2172_v57 = vrot.slane %v2144_v45, 4  ;;  %v2122_v17 = vrot.slane %v6851_v40, 4  ;;  %v2145_v6 = vmul.f32 %v6851_v40, %v6851_v40 }
 0x506   :  { %v6857_v54 = vpop.f32.mrf.mxu0 }
 0x507   :  { %v2118_v12 = vrot.slane %v2117_v46, 2  ;;  %v2173_v9 = vadd.f32 %v2172_v57, %v2144_v45  ;;  %v2123_v10 = vadd.f32 %v2122_v17, %v6851_v40  ;;  %v2178_v47 = vrot.slane %v2145_v6, 4 }
 0x508   :  { %v2128_v15 = vrot.slane %v6857_v54, 4  ;;  %v2146_v5 = vmul.f32 %v6857_v54, %v6857_v54  ;;  %v6863_v58 = vpop.f32.mrf.mxu0 }
 0x509   :  { %v2119_v62 = vadd.f32 %v2118_v12, %v2117_v46  ;;  %v2174_v59 = vrot.slane %v2173_v9, 2  ;;  %v2124_v63 = vrot.slane %v2123_v10, 2  ;;  %v2179_v16 = vadd.f32 %v2178_v47, %v2145_v6  ;;  %v5936_v55 = vpop.eup %5935 }
 0x50a   :  { %v2129_v30 = vadd.f32 %v2128_v15, %v6857_v54  ;;  %v2184_v22 = vrot.slane %v2146_v5, 4  ;;  %v2134_v21 = vrot.slane %v6863_v58, 4 }
 0x50b   :  { %v5938_v29 = vpop.eup %5937  ;;  %v2120_v11 = vrot.slane %v2119_v62, 1  ;;  %v2175_v18 = vadd.f32 %v2174_v59, %v2173_v9  ;;  %v2125_v8 = vadd.f32 %v2124_v63, %v2123_v10  ;;  %v2180_v41 = vrot.slane %v2179_v16, 2 }
 0x50c   :  { %v2260_v42 = vcombine.low %v5936_v55, %v5938_v29  ;;  %v2130_v39 = vrot.slane %v2129_v30, 2  ;;  %v2185_v37 = vadd.f32 %v2184_v22, %v2146_v5  ;;  %v2135_v25 = vadd.f32 %v2134_v21, %v6863_v58 }
 0x50d   :  { %v2121_v7 = vadd.f32 %v2120_v11, %v2119_v62  ;;  %v2176_v23 = vrot.slane %v2175_v18, 1  ;;  %v2126_v33 = vrot.slane %v2125_v8, 1  ;;  %v2181_v34 = vadd.f32 %v2180_v41, %v2179_v16 }
 0x50e   :  { %v2267_v36 = vrot.slane %v2260_v42, %v6486_v20  ;;  %v2131_v19 = vadd.f32 %v2130_v39, %v2129_v30  ;;  %v2186_v48 = vrot.slane %v2185_v37, 2  ;;  %v2136_v49 = vrot.slane %v2135_v25, 2  ;;  %v5940_v28 = vpop.eup %5939 }
 0x50f   :  { %v2177_v51 = vadd.f32 %v2176_v23, %v2175_v18  ;;  %v6871_v52 = vmul.f32 0.125, %v2121_v7  ;;  %v2127_v50 = vadd.f32 %v2126_v33, %v2125_v8  ;;  %v2182_v45 = vrot.slane %v2181_v34, 1 }
 0x510   :  { %v5942_v46 = vpop.eup %5941  ;;  %v2296_v57 = vmul.f32 %v2267_v36, %v6868_v56  ;;  %v2132_v17 = vrot.slane %v2131_v19, 1  ;;  %v2187_v6 = vadd.f32 %v2186_v48, %v2185_v37  ;;  %v2137_v12 = vadd.f32 %v2136_v49, %v2135_v25 }
 0x511   :  { %v2268_v9 = vcombine.low %v5940_v28, %v5942_v46  ;;  %v2208_v10 = vmul.f32 0.125, %v2177_v51  ;;  %v2216_v47 = vmul.f32 %v6871_v52, %v6871_v52  ;;  %v2183_v15 = vadd.f32 %v2182_v45, %v2181_v34 }
 0x512   :  { %v2307_v5 = vrot.slane %v2296_v57, %v6383_v26  ;;  %v2311_v62 = vrot.slane %v2296_v57, %v6390_v32  ;;  %v6878_v59 = vmul.f32 0.125, %v2127_v50  ;;  %v2133_v63 = vadd.f32 %v2132_v17, %v2131_v19 }
 0x513   :  { %v2275_v16 = vrot.slane %v2268_v9, %v6486_v20  ;;  %v2224_v55 = vsub.f32 %v2208_v10, %v2216_v47  ;;  %v2209_v30 = vmul.f32 0.125, %v2183_v15  ;;  %v2188_v22 = vrot.slane %v2187_v6, 1 }
 0x514   :  { %v2344_v21 = vmul.f32 %v2307_v5, %v6830_v3  ;;  %v2345_v29 = vmul.f32 %v2311_v62, %v6834_v0  ;;  %v2147_v11 = vmul.f32 %v6863_v58, %v6863_v58  ;;  %v2217_v41 = vmul.f32 %v6878_v59, %v6878_v59 }
 0x515   :  { %v2297_v18 = vmul.f32 %v2275_v16, %v6868_v56  ;;  %v2232_v8 = vmax.f32 %v2224_v55, 0.0  ;;  %v2189_v42 = vadd.f32 %v2188_v22, %v2187_v6  ;;  %v6888_v39 = vmul.f32 0.125, %v2133_v63 }
 0x516   :  { %v2138_v37 = vrot.slane %v2137_v12, 1  ;;  %v2360_v25 = vcombine.low %v2344_v21, %v2345_v29  ;;  %v2225_v23 = vsub.f32 %v2209_v30, %v2217_v41  ;;  %v2190_v0 = vrot.slane %v2147_v11, 4 }
 0x517   :  { %v2315_v7 = vrot.slane %v2297_v18, %v6383_v26  ;;  %v2319_v3 = vrot.slane %v2297_v18, %v6390_v32  ;;  %v2240_v36 = vadd.f32 1e-05, %v2232_v8  ;;  %v2210_v19 = vmul.f32 0.125, %v2189_v42 }
 0x518   :  { %v2233_v48 = vmax.f32 %v2225_v23, 0.0  ;;  %v2218_v49 = vmul.f32 %v6888_v39, %v6888_v39  ;;  %v2139_v28 = vadd.f32 %v2138_v37, %v2137_v12  ;;  %v2191_v51 = vadd.f32 %v2190_v0, %v2147_v11 }
 0x519   :  { %v2346_v33 = vmul.f32 %v2315_v7, %v6838_v35  ;;  %v2347_v34 = vmul.f32 %v2319_v3, %v6842_v14  ;;  %v2367_v45 = vrot.slane %v2360_v25, %v6486_v20  ;;  %v2407_v46 = vrot.slane %v2307_v5, %v6383_v26 }
 0x51a   :  { %v2241_v57 = vadd.f32 1e-05, %v2233_v48  ;;  %v2192_v17 = vrot.slane %v2191_v51, 2  ;;  %v2411_v6 = vrot.slane %v2311_v62, %v6383_v26  ;;  %5943 = vrsqrt.f32 %v2240_v36 }
 0x51b   :  { %v2368_v50 = vcombine.low %v2346_v33, %v2347_v34  ;;  %v2392_v14 = vrot.slane %v2367_v45, 7  ;;  %v2226_v9 = vsub.f32 %v2210_v19, %v2218_v49  ;;  %v2203_v47 = vmul.f32 0.125, %v2139_v28 }
 0x51c   :  { %5945 = vrsqrt.f32 %v2241_v57  ;;  %v2193_v10 = vadd.f32 %v2192_v17, %v2191_v51  ;;  %v2415_v63 = vrot.slane %v2315_v7, %v6383_v26  ;;  %v2419_v16 = vrot.slane %v2319_v3, %v6383_v26 }
 0x51d   :  { %v2375_v35 = vrot.slane %v2368_v50, %v6486_v20  ;;  %v2400_v12 = vsub.f32 %v6868_v56, %v2392_v14  ;;  %v2437_v55 = vmul.f32 %v2411_v6, %v6811_v27  ;;  %v2234_v21 = vmax.f32 %v2226_v9, 0.0 }
 0x51e   :  { %v2194_v5 = vrot.slane %v2193_v10, 1  ;;  %v2219_v11 = vmul.f32 %v2203_v47, %v2203_v47  ;;  %v2436_v18 = vmul.f32 %v2407_v46, %v6806_v60  ;;  %v2439_v27 = vmul.f32 %v2419_v16, %v6823_v43 }
 0x51f   :  { %v2393_v15 = vrot.slane %v2375_v35, 7  ;;  %v2451_v30 = vrot.slane %v2400_v12, %v6387_v31  ;;  %v2455_v22 = vrot.slane %v2400_v12, %v6393_v38  ;;  %v2438_v7 = vmul.f32 %v2415_v63, %v6817_v2 }
 0x520   :  { %v2195_v29 = vadd.f32 %v2194_v5, %v2193_v10  ;;  %v2242_v34 = vadd.f32 1e-05, %v2234_v21 }
 0x521   :  { %v2401_v62 = vsub.f32 %v6868_v56, %v2393_v15  ;;  %v2495_v42 = vrot.slane %v2455_v22, %v6387_v31  ;;  %v2491_v37 = vrot.slane %v2451_v30, %v6387_v31 }
 0x522   :  { %v2211_v25 = vmul.f32 0.125, %v2195_v29  ;;  %5947 = vrsqrt.f32 %v2242_v34 }
 0x523   :  { %v2459_v8 = vrot.slane %v2401_v62, %v6387_v31  ;;  %v2463_v41 = vrot.slane %v2401_v62, %v6393_v38  ;;  %v2521_v23 = vadd.f32 %v2495_v42, %v2437_v55  ;;  %v2520_v33 = vadd.f32 %v2491_v37, %v2436_v18 }
 0x524   :  { %v2227_v60 = vsub.f32 %v2211_v25, %v2219_v11 }
 0x525   :  { %v2503_v3 = vrot.slane %v2463_v41, %v6387_v31  ;;  %v2499_v0 = vrot.slane %v2459_v8, %v6387_v31  ;;  %v2529_v49 = vmax.f32 %v2521_v23, 0.0  ;;  %v2528_v51 = vmax.f32 %v2520_v33, 0.0 }
 0x526   :  { %v2235_v48 = vmax.f32 %v2227_v60, 0.0 }
 0x527   :  { %v2523_v36 = vadd.f32 %v2503_v3, %v2439_v27  ;;  %v2522_v19 = vadd.f32 %v2499_v0, %v2438_v7  ;;  %v5944_v45 = vpop.eup %5943 }
 0x528   :  { %v2243_v43 = vadd.f32 1e-05, %v2235_v48 }
 0x529   :  { %v2531_v28 = vmax.f32 %v2523_v36, 0.0  ;;  %v2530_v50 = vmax.f32 %v2522_v19, 0.0  ;;  %v5946_v46 = vpop.eup %5945 }
 0x52a   :  { %v2276_v17 = vcombine.low %v5944_v45, %v5946_v46  ;;  %5949 = vrsqrt.f32 %v2243_v43 }
 0x52b   :  { %v2570_v2 = vpack.c.bf16 %v2531_v28, %v2529_v49  ;;  %v2569_v57 = vpack.c.bf16 %v2530_v50, %v2528_v51 }
 0x52c   :  { %v2283_v6 = vrot.slane %v2276_v17, %v6486_v20  ;;  %v5792_v17 = vld [vmem:[#allocation12 + $0xb8] sm:$0xff]  }
 0x52d   :  { %2765 = vmatprep.mubr.bf16.mxu1 %v2570_v2 }
 0x52e   :  { %2766 = vmatmul.mubr.bf16.vlgmr.msra.gmra.mxu1 %v2569_v57  ;;  %v2298_v35 = vmul.f32 %v2283_v6, %v6868_v56  ;;  %v5791_v57 = vld [vmem:[#allocation12 + $0xf8] sm:$0xff]   ;;  %v5794_v6 = vld [vmem:[#allocation12 + $0xb0] sm:$0xff]  }
 0x52f   :  { %v5948_v63 = vpop.eup %5947  ;;  %5541 = vmatprep.subr.bf16.mxu0 %v5791_v57 }
 0x530   :  { %v2323_v14 = vrot.slane %v2298_v35, %v6383_v26  ;;  %v2327_v9 = vrot.slane %v2298_v35, %v6390_v32  ;;  %5542 = vmatpush3.bf16.msra.mxu0 %v5792_v17  ;;  %v5796_v35 = vld [vmem:[#allocation12 + $0xa8] sm:$0xff]  }
 0x532   :  { %v2348_v10 = vmul.f32 %v2323_v14, %v6871_v52  ;;  %v2349_v15 = vmul.f32 %v2327_v9, %v6878_v59  ;;  %v2427_v37 = vrot.slane %v2327_v9, %v6383_v26  ;;  %v2423_v27 = vrot.slane %v2323_v14, %v6383_v26  ;;  %v5797_v14 = vld [vmem:[#allocation12 + $0xe0] sm:$0xff]  }
 0x533   :  { %v5798_v9 = vld [vmem:[#allocation12 + $0xa0] sm:$0xff]  }
 0x534   :  { %v2376_v12 = vcombine.low %v2348_v10, %v2349_v15  ;;  %v2441_v0 = vmul.f32 %v2427_v37, %v6851_v40  ;;  %v2440_v33 = vmul.f32 %v2423_v27, %v6846_v53  ;;  %v5799_v10 = vld [vmem:[#allocation12 + $0xd8] sm:$0xff]  }
 0x535   :  { %v5800_v15 = vld [vmem:[#allocation12 + $0x98] sm:$0xff]  }
 0x536   :  { %v2383_v5 = vrot.slane %v2376_v12, %v6486_v20  ;;  %v5801_v12 = vld [vmem:[#allocation12 + $0xd0] sm:$0xff]  }
 0x537   :  { %v5950_v16 = vpop.eup %5949 }
 0x538   :  { %v2284_v55 = vcombine.low %v5948_v63, %v5950_v16  ;;  %v2394_v30 = vrot.slane %v2383_v5, 7  ;;  %v5802_v63 = vld [vmem:[#allocation12 + $0x90] sm:$0xff]   ;;  %v5803_v16 = vld [vmem:[#allocation12 + $0xc8] sm:$0xff]  }
 0x539   :  { %v5804_v5 = vld [vmem:[#allocation12 + $0x88] sm:$0xff]  }
 0x53a   :  { %v2291_v62 = vrot.slane %v2284_v55, %v6486_v20  ;;  %v2402_v11 = vsub.f32 %v6868_v56, %v2394_v30  ;;  %v5805_v55 = vld [vmem:[#allocation12 + $0xc0] sm:$0xff]  }
 0x53c   :  { %v2299_v22 = vmul.f32 %v2291_v62, %v6868_v56  ;;  %v2471_v8 = vrot.slane %v2402_v11, %v6393_v38  ;;  %v2467_v41 = vrot.slane %v2402_v11, %v6387_v31  ;;  %v5806_v62 = vld [vmem:[#allocation12 + $0x80] sm:$0xff]  }
 0x53e   :  { %v2331_v21 = vrot.slane %v2299_v22, %v6383_v26  ;;  %v2335_v29 = vrot.slane %v2299_v22, %v6390_v32  ;;  %v2511_v7 = vrot.slane %v2471_v8, %v6387_v31  ;;  %v2507_v3 = vrot.slane %v2467_v41, %v6387_v31 }
 0x540   :  { %v2350_v52 = vmul.f32 %v2331_v21, %v6888_v39  ;;  %v2351_v59 = vmul.f32 %v2335_v29, %v2203_v47  ;;  %v2435_v23 = vrot.slane %v2335_v29, %v6383_v26  ;;  %v2431_v47 = vrot.slane %v2331_v21, %v6383_v26 }
 0x541   :  { %v2525_v36 = vadd.f32 %v2511_v7, %v2441_v0  ;;  %v2524_v19 = vadd.f32 %v2507_v3, %v2440_v33 }
 0x542   :  { %v2384_v18 = vcombine.low %v2350_v52, %v2351_v59  ;;  %v2443_v48 = vmul.f32 %v2435_v23, %v6863_v58  ;;  %v2442_v28 = vmul.f32 %v2431_v47, %v6857_v54  ;;  %v5793_v58 = vld [vmem:[#allocation12 + $0xf0] sm:$0xff]   ;;  %v5795_v54 = vld [vmem:[#allocation12 + $0xe8] sm:$0xff]  }
 0x543   :  { %v2533_v45 = vmax.f32 %v2525_v36, 0.0  ;;  %v2532_v43 = vmax.f32 %v2524_v19, 0.0  ;;  %5543 = vmatprep.subr.bf16.mxu0 %v5793_v58 }
 0x544   :  { %v2391_v42 = vrot.slane %v2384_v18, %v6486_v20  ;;  %5544 = vmatpush3.bf16.msra.mxu0 %v5794_v6 }
 0x545   :  { %5545 = vmatprep.subr.bf16.mxu0 %v5795_v54 }
 0x546   :  { %v2395_v25 = vrot.slane %v2391_v42, 7 }
 0x548   :  { %v2403_v39 = vsub.f32 %v6868_v56, %v2395_v25  ;;  %5546 = vmatpush3.bf16.msra.mxu0 %v5796_v35 }
 0x549   :  { %5547 = vmatprep.subr.bf16.mxu0 %v5797_v14 }
 0x54a   :  { %v2479_v60 = vrot.slane %v2403_v39, %v6393_v38  ;;  %v2475_v34 = vrot.slane %v2403_v39, %v6387_v31 }
 0x54c   :  { %v2519_v49 = vrot.slane %v2479_v60, %v6387_v31  ;;  %v2515_v56 = vrot.slane %v2475_v34, %v6387_v31  ;;  %5548 = vmatpush3.bf16.msra.mxu0 %v5798_v9 }
 0x54d   :  { %5549 = vmatprep.subr.bf16.mxu0 %v5799_v10 }
 0x54e   :  { %v2527_v51 = vadd.f32 %v2519_v49, %v2443_v48  ;;  %v2526_v50 = vadd.f32 %v2515_v56, %v2442_v28 }
 0x550   :  { %v2535_v40 = vmax.f32 %v2527_v51, 0.0  ;;  %v2534_v53 = vmax.f32 %v2526_v50, 0.0  ;;  %5550 = vmatpush3.bf16.msra.mxu0 %v5800_v15 }
 0x551   :  { %5551 = vmatprep.subr.bf16.mxu0 %v5801_v12 }
 0x552   :  { %v2572_v46 = vpack.c.bf16 %v2535_v40, %v2533_v45  ;;  %v2571_v2 = vpack.c.bf16 %v2534_v53, %v2532_v43 }
 0x554   :  { %2775 = vmatprep.mubr.bf16.mxu1 %v2572_v46  ;;  %5552 = vmatpush3.bf16.msra.mxu0 %v5802_v63 }
 0x555   :  { %2776 = vmatmul.mubr.bf16.gmra.mxu1 %v2571_v2  ;;  %5553 = vmatprep.subr.bf16.mxu0 %v5803_v16 }
 0x558   :  { %5554 = vmatpush3.bf16.msra.mxu0 %v5804_v5 }
 0x559   :  { %5555 = vmatprep.subr.bf16.mxu0 %v5805_v55 }
 0x55c   :  { %5556 = vmatpush3.bf16.msra.mxu0 %v5806_v62 }
 0x5ee   :  { %v6947_v30 = vpop.f32.mrf.mxu1 }
 0x5ef   :  { %v2788_v22 = vrot.slane %v6947_v30, 4  ;;  %v2836_v21 = vmul.f32 %v6947_v30, %v6947_v30 }
 0x5f0   :  { %v6952_v29 = vpop.f32.mrf.mxu1 }
 0x5f1   :  { %v2789_v11 = vadd.f32 %v2788_v22, %v6947_v30  ;;  %v2844_v52 = vrot.slane %v2836_v21, 4  ;;  %v2794_v59 = vrot.slane %v6952_v29, 4  ;;  %v2837_v18 = vmul.f32 %v6952_v29, %v6952_v29 }
 0x5f2   :  { %v6958_v8 = vpop.f32.mrf.mxu1 }
 0x5f3   :  { %v2790_v41 = vrot.slane %v2789_v11, 2  ;;  %v2845_v42 = vadd.f32 %v2844_v52, %v2836_v21  ;;  %v2795_v37 = vadd.f32 %v2794_v59, %v6952_v29  ;;  %v2850_v27 = vrot.slane %v2837_v18, 4 }
 0x5f4   :  { %v2800_v25 = vrot.slane %v6958_v8, 4  ;;  %v2838_v7 = vmul.f32 %v6958_v8, %v6958_v8  ;;  %v6964_v3 = vpop.f32.mrf.mxu1 }
 0x5f5   :  { %v2791_v23 = vadd.f32 %v2790_v41, %v2789_v11  ;;  %v2846_v39 = vrot.slane %v2845_v42, 2  ;;  %v2796_v47 = vrot.slane %v2795_v37, 2  ;;  %v2851_v0 = vadd.f32 %v2850_v27, %v2837_v18 }
 0x5f6   :  { %v2801_v33 = vadd.f32 %v2800_v25, %v6958_v8  ;;  %v2856_v60 = vrot.slane %v2838_v7, 4  ;;  %v2806_v34 = vrot.slane %v6964_v3, 4  ;;  %v2839_v36 = vmul.f32 %v6964_v3, %v6964_v3 }
 0x5f7   :  { %v2792_v19 = vrot.slane %v2791_v23, 1  ;;  %v2847_v48 = vadd.f32 %v2846_v39, %v2845_v42  ;;  %v2797_v49 = vadd.f32 %v2796_v47, %v2795_v37  ;;  %v2852_v28 = vrot.slane %v2851_v0, 2 }
 0x5f8   :  { %v2802_v56 = vrot.slane %v2801_v33, 2  ;;  %v2857_v51 = vadd.f32 %v2856_v60, %v2838_v7  ;;  %v2807_v50 = vadd.f32 %v2806_v34, %v6964_v3  ;;  %v2862_v45 = vrot.slane %v2839_v36, 4 }
 0x5f9   :  { %v2793_v40 = vadd.f32 %v2792_v19, %v2791_v23  ;;  %v2848_v43 = vrot.slane %v2847_v48, 1  ;;  %v2798_v53 = vrot.slane %v2797_v49, 1  ;;  %v2853_v46 = vadd.f32 %v2852_v28, %v2851_v0 }
 0x5fa   :  { %v2803_v2 = vadd.f32 %v2802_v56, %v2801_v33  ;;  %v2858_v57 = vrot.slane %v2857_v51, 2  ;;  %v2808_v17 = vrot.slane %v2807_v50, 2  ;;  %v2863_v58 = vadd.f32 %v2862_v45, %v2839_v36 }
 0x5fb   :  { %v2849_v6 = vadd.f32 %v2848_v43, %v2847_v48  ;;  %v6971_v54 = vmul.f32 0.125, %v2793_v40  ;;  %v2799_v35 = vadd.f32 %v2798_v53, %v2797_v49  ;;  %v2854_v14 = vrot.slane %v2853_v46, 1  ;;  %v6979_v53 = vld [vmem:[#allocation10 + $0x4] sm:$0xf] }
 0x5fc   :  { %v2804_v9 = vrot.slane %v2803_v2, 1  ;;  %v2859_v10 = vadd.f32 %v2858_v57, %v2857_v51  ;;  %v2809_v15 = vadd.f32 %v2808_v17, %v2807_v50  ;;  %v2864_v12 = vrot.slane %v2863_v58, 2 }
 0x5fd   :  { %v2900_v63 = vmul.f32 0.125, %v2849_v6  ;;  %v2908_v16 = vmul.f32 %v6971_v54, %v6971_v54  ;;  %v2855_v5 = vadd.f32 %v2854_v14, %v2853_v46  ;;  %v2893_v55 = vmul.f32 0.125, %v2799_v35 }
 0x5fe   :  { %v2805_v62 = vadd.f32 %v2804_v9, %v2803_v2  ;;  %v2860_v22 = vrot.slane %v2859_v10, 1  ;;  %v2810_v21 = vrot.slane %v2809_v15, 1  ;;  %v2865_v11 = vadd.f32 %v2864_v12, %v2863_v58 }
 0x5ff   :  { %v2916_v52 = vsub.f32 %v2900_v63, %v2908_v16  ;;  %v2901_v59 = vmul.f32 0.125, %v2855_v5  ;;  %v2909_v18 = vmul.f32 %v2893_v55, %v2893_v55 }
 0x600   :  { %v2861_v41 = vadd.f32 %v2860_v22, %v2859_v10  ;;  %v6975_v42 = vmul.f32 0.125, %v2805_v62  ;;  %v2811_v37 = vadd.f32 %v2810_v21, %v2809_v15  ;;  %v2866_v27 = vrot.slane %v2865_v11, 1 }
 0x601   :  { %v2924_v25 = vmax.f32 %v2916_v52, 0.0  ;;  %v2917_v7 = vsub.f32 %v2901_v59, %v2909_v18 }
 0x602   :  { %v2902_v23 = vmul.f32 0.125, %v2861_v41  ;;  %v2910_v39 = vmul.f32 %v6975_v42, %v6975_v42  ;;  %v2867_v47 = vadd.f32 %v2866_v27, %v2865_v11  ;;  %v2895_v0 = vmul.f32 0.125, %v2811_v37 }
 0x603   :  { %v2932_v33 = vadd.f32 1e-05, %v2924_v25  ;;  %v2925_v60 = vmax.f32 %v2917_v7, 0.0 }
 0x604   :  { %v2918_v34 = vsub.f32 %v2902_v23, %v2910_v39  ;;  %v2903_v36 = vmul.f32 0.125, %v2867_v47  ;;  %v2911_v19 = vmul.f32 %v2895_v0, %v2895_v0 }
 0x605   :  { %v2933_v48 = vadd.f32 1e-05, %v2925_v60  ;;  %5951 = vrsqrt.f32 %v2932_v33 }
 0x606   :  { %v2926_v49 = vmax.f32 %v2918_v34, 0.0  ;;  %v2919_v28 = vsub.f32 %v2903_v36, %v2911_v19 }
 0x607   :  { %5953 = vrsqrt.f32 %v2933_v48 }
 0x608   :  { %v2934_v56 = vadd.f32 1e-05, %v2926_v49  ;;  %v2927_v51 = vmax.f32 %v2919_v28, 0.0 }
 0x60a   :  { %v2935_v50 = vadd.f32 1e-05, %v2927_v51  ;;  %5955 = vrsqrt.f32 %v2934_v56 }
 0x60c   :  { %5957 = vrsqrt.f32 %v2935_v50 }
 0x612   :  { %v5952_v45 = vpop.eup %5951 }
 0x614   :  { %v5954_v40 = vpop.eup %5953 }
 0x615   :  { %v2956_v43 = vcombine.low %v5952_v45, %v5954_v40  ;;  %v6982_v2 = vpop.f32.mrf.mxu1 }
 0x616   :  { %v2812_v17 = vrot.slane %v6982_v2, 4  ;;  %v2840_v58 = vmul.f32 %v6982_v2, %v6982_v2 }
 0x617   :  { %v2963_v46 = vrot.slane %v2956_v43, %v6486_v20  ;;  %v5956_v57 = vpop.eup %5955  ;;  %v6988_v14 = vpop.f32.mrf.mxu1 }
 0x618   :  { %v2813_v10 = vadd.f32 %v2812_v17, %v6982_v2  ;;  %v2868_v15 = vrot.slane %v2840_v58, 4  ;;  %v2818_v12 = vrot.slane %v6988_v14, 4  ;;  %v2841_v5 = vmul.f32 %v6988_v14, %v6988_v14 }
 0x619   :  { %v5958_v6 = vpop.eup %5957  ;;  %v2992_v35 = vmul.f32 %v2963_v46, %v6979_v53  ;;  %v7000_v52 = vpop.f32.mrf.mxu1 }
 0x61a   :  { %v2964_v9 = vcombine.low %v5956_v57, %v5958_v6  ;;  %v2814_v22 = vrot.slane %v2813_v10, 2  ;;  %v2869_v21 = vadd.f32 %v2868_v15, %v2840_v58  ;;  %v2819_v11 = vadd.f32 %v2818_v12, %v6988_v14 }
 0x61b   :  { %v6993_v63 = vrot.slane %v2992_v35, %v6383_v26  ;;  %v3007_v16 = vrot.slane %v2992_v35, %v6390_v32  ;;  %v2874_v47 = vrot.slane %v2841_v5, 4  ;;  %v2824_v33 = vrot.slane %v7000_v52, 4  ;;  %v7023_v57 = vpop.f32.mrf.mxu1 }
 0x61c   :  { %v2971_v62 = vrot.slane %v2964_v9, %v6486_v20  ;;  %v2815_v27 = vadd.f32 %v2814_v22, %v2813_v10  ;;  %v2870_v25 = vrot.slane %v2869_v21, 2  ;;  %v2820_v7 = vrot.slane %v2819_v11, 2 }
 0x61d   :  { %v3040_v59 = vmul.f32 %v6993_v63, %v6971_v54  ;;  %v3041_v18 = vmul.f32 %v3007_v16, %v2893_v55  ;;  %v3107_v41 = vrot.slane %v3007_v16, %v6383_v26  ;;  %v3103_v39 = vrot.slane %v6993_v63, %v6383_v26 }
 0x61e   :  { %v2993_v37 = vmul.f32 %v2971_v62, %v6979_v53  ;;  %v2816_v55 = vrot.slane %v2815_v27, 1  ;;  %v2871_v34 = vadd.f32 %v2870_v25, %v2869_v21  ;;  %v2821_v36 = vadd.f32 %v2820_v7, %v2819_v11 }
 0x61f   :  { %v3056_v23 = vcombine.low %v3040_v59, %v3041_v18  ;;  %v2875_v19 = vadd.f32 %v2874_v47, %v2841_v5  ;;  %v2825_v48 = vadd.f32 %v2824_v33, %v7000_v52  ;;  %v2842_v49 = vmul.f32 %v7000_v52, %v7000_v52 }
 0x620   :  { %v7010_v60 = vrot.slane %v2993_v37, %v6383_v26  ;;  %v3015_v54 = vrot.slane %v2993_v37, %v6390_v32  ;;  %v7017_v28 = vmul.f32 %v3107_v41, %v6952_v29  ;;  %v2817_v45 = vadd.f32 %v2816_v55, %v2815_v27 }
 0x621   :  { %v2872_v40 = vrot.slane %v2871_v34, 1  ;;  %v2822_v43 = vrot.slane %v2821_v36, 1  ;;  %v2876_v46 = vrot.slane %v2875_v19, 2  ;;  %v2826_v6 = vrot.slane %v2825_v48, 2 }
 0x622   :  { %v3042_v56 = vmul.f32 %v7010_v60, %v6975_v42  ;;  %v3043_v51 = vmul.f32 %v3015_v54, %v2895_v0  ;;  %v3111_v50 = vrot.slane %v7010_v60, %v6383_v26  ;;  %v3115_v58 = vrot.slane %v3015_v54, %v6383_v26 }
 0x623   :  { %v2880_v35 = vrot.slane %v2842_v49, 4  ;;  %v2873_v29 = vadd.f32 %v2872_v40, %v2871_v34  ;;  %v7026_v9 = vmul.f32 0.125, %v2817_v45  ;;  %v2823_v10 = vadd.f32 %v2822_v43, %v2821_v36 }
 0x624   :  { %v3064_v17 = vcombine.low %v3042_v56, %v3043_v51  ;;  %v2877_v42 = vadd.f32 %v2876_v46, %v2875_v19  ;;  %v2827_v0 = vadd.f32 %v2826_v6, %v2825_v48  ;;  %v2830_v12 = vrot.slane %v7023_v57, 4 }
 0x625   :  { %v2881_v15 = vadd.f32 %v2880_v35, %v2842_v49  ;;  %v2843_v16 = vmul.f32 %v7023_v57, %v7023_v57  ;;  %v2904_v5 = vmul.f32 0.125, %v2873_v29  ;;  %v2912_v62 = vmul.f32 %v7026_v9, %v7026_v9 }
 0x626   :  { %v2878_v22 = vrot.slane %v2877_v42, 1  ;;  %v7033_v21 = vmul.f32 0.125, %v2823_v10  ;;  %v2828_v11 = vrot.slane %v2827_v0, 1  ;;  %v2831_v18 = vadd.f32 %v2830_v12, %v7023_v57 }
 0x627   :  { %v2882_v59 = vrot.slane %v2881_v15, 2  ;;  %v2886_v41 = vrot.slane %v2843_v16, 4  ;;  %v2920_v37 = vsub.f32 %v2904_v5, %v2912_v62  ;;  %v3063_v7 = vrot.slane %v3056_v23, %v6486_v20 }
 0x628   :  { %v2879_v27 = vadd.f32 %v2878_v22, %v2877_v42  ;;  %v2913_v25 = vmul.f32 %v7033_v21, %v7033_v21  ;;  %v2829_v47 = vadd.f32 %v2828_v11, %v2827_v0  ;;  %v2832_v54 = vrot.slane %v2831_v18, 2 }
 0x629   :  { %v2883_v33 = vadd.f32 %v2882_v59, %v2881_v15  ;;  %v2887_v55 = vadd.f32 %v2886_v41, %v2843_v16  ;;  %v2928_v34 = vmax.f32 %v2920_v37, 0.0  ;;  %v3071_v19 = vrot.slane %v3064_v17, %v6486_v20 }
 0x62a   :  { %v2905_v36 = vmul.f32 0.125, %v2879_v27  ;;  %v3088_v48 = vrot.slane %v3063_v7, 7  ;;  %v7040_v56 = vmul.f32 0.125, %v2829_v47  ;;  %v2833_v51 = vadd.f32 %v2832_v54, %v2831_v18 }
 0x62b   :  { %v2884_v49 = vrot.slane %v2883_v33, 1  ;;  %v2888_v45 = vrot.slane %v2887_v55, 2  ;;  %v2936_v40 = vadd.f32 1e-05, %v2928_v34  ;;  %v3089_v46 = vrot.slane %v3071_v19, 7 }
 0x62c   :  { %v2921_v43 = vsub.f32 %v2905_v36, %v2913_v25  ;;  %v3096_v6 = vsub.f32 %v6979_v53, %v3088_v48  ;;  %v2914_v35 = vmul.f32 %v7040_v56, %v7040_v56  ;;  %v2834_v29 = vrot.slane %v2833_v51, 1 }
 0x62d   :  { %v2885_v23 = vadd.f32 %v2884_v49, %v2883_v33  ;;  %v2889_v10 = vadd.f32 %v2888_v45, %v2887_v55  ;;  %v3135_v42 = vmul.f32 %v3115_v58, %v6964_v3  ;;  %v3097_v0 = vsub.f32 %v6979_v53, %v3089_v46 }
 0x62e   :  { %v2929_v17 = vmax.f32 %v2921_v43, 0.0  ;;  %v3147_v15 = vrot.slane %v3096_v6, %v6387_v31  ;;  %v2835_v16 = vadd.f32 %v2834_v29, %v2833_v51  ;;  %v3151_v62 = vrot.slane %v3096_v6, %v6393_v38 }
 0x62f   :  { %v2906_v12 = vmul.f32 0.125, %v2885_v23  ;;  %v2890_v5 = vrot.slane %v2889_v10, 1  ;;  %5959 = vrsqrt.f32 %v2936_v40  ;;  %v3155_v11 = vrot.slane %v3097_v0, %v6387_v31 }
 0x630   :  { %v2937_v22 = vadd.f32 1e-05, %v2929_v17  ;;  %v3159_v59 = vrot.slane %v3097_v0, %v6393_v38  ;;  %v2899_v37 = vmul.f32 0.125, %v2835_v16  ;;  %v3191_v3 = vrot.slane %v3151_v62, %v6387_v31 }
 0x631   :  { %v2922_v18 = vsub.f32 %v2906_v12, %v2914_v35  ;;  %v2891_v41 = vadd.f32 %v2890_v5, %v2889_v10  ;;  %v3132_v27 = vmul.f32 %v3103_v39, %v6947_v30  ;;  %v3187_v25 = vrot.slane %v3147_v15, %v6387_v31 }
 0x632   :  { %5961 = vrsqrt.f32 %v2937_v22  ;;  %v3199_v58 = vrot.slane %v3159_v59, %v6387_v31  ;;  %v2915_v33 = vmul.f32 %v2899_v37, %v2899_v37  ;;  %v3217_v54 = vadd.f32 %v3191_v3, %v7017_v28 }
 0x633   :  { %v2930_v7 = vmax.f32 %v2922_v18, 0.0  ;;  %v2907_v47 = vmul.f32 0.125, %v2891_v41  ;;  %v3134_v34 = vmul.f32 %v3111_v50, %v6958_v8  ;;  %v3195_v36 = vrot.slane %v3155_v11, %v6387_v31 }
 0x634   :  { %v3219_v55 = vadd.f32 %v3199_v58, %v3135_v42  ;;  %v3216_v19 = vadd.f32 %v3187_v25, %v3132_v27  ;;  %v3225_v63 = vmax.f32 %v3217_v54, 0.0 }
 0x635   :  { %v2923_v48 = vsub.f32 %v2907_v47, %v2915_v33  ;;  %v2938_v49 = vadd.f32 1e-05, %v2930_v7  ;;  %v3218_v39 = vadd.f32 %v3195_v36, %v3134_v34 }
 0x636   :  { %v3227_v30 = vmax.f32 %v3219_v55, 0.0  ;;  %v3224_v40 = vmax.f32 %v3216_v19, 0.0 }
 0x637   :  { %v2931_v51 = vmax.f32 %v2923_v48, 0.0  ;;  %v3226_v43 = vmax.f32 %v3218_v39, 0.0  ;;  %5963 = vrsqrt.f32 %v2938_v49 }
 0x638   :  { %v3266_v45 = vpack.c.bf16 %v3227_v30, %v3225_v63 }
 0x639   :  { %v2939_v46 = vadd.f32 1e-05, %v2931_v51  ;;  %v3265_v28 = vpack.c.bf16 %v3226_v43, %v3224_v40 }
 0x63a   :  { %3397 = vmatprep.mubr.bf16.mxu0 %v3266_v45 }
 0x63b   :  { %5965 = vrsqrt.f32 %v2939_v46  ;;  %3398 = vmatmul.mubr.bf16.vlgmr.msra.gmra.mxu0 %v3265_v28 }
 0x63c   :  { %v5960_v60 = vpop.eup %5959 }
 0x63f   :  { %v5962_v8 = vpop.eup %5961 }
 0x640   :  { %v2972_v50 = vcombine.low %v5960_v60, %v5962_v8  ;;  %v5812_v8 = vld [vmem:[#allocation6 + $0x164] ss:$8 sps:$4 sm:$0xff]  }
 0x642   :  { %v2979_v6 = vrot.slane %v2972_v50, %v6486_v20  ;;  %v5810_v50 = vld [vmem:[#allocation6 + $0x160] ss:$8 sps:$4 sm:$0xff]  }
 0x644   :  { %v2994_v23 = vmul.f32 %v2979_v6, %v6979_v53  ;;  %v5964_v10 = vpop.eup %5963  ;;  %v5815_v6 = vld [vmem:[#allocation6 + $0x154] ss:$8 sps:$4 sm:$0xff]  }
 0x646   :  { %v3019_v35 = vrot.slane %v2994_v23, %v6383_v26  ;;  %v3023_v29 = vrot.slane %v2994_v23, %v6390_v32  ;;  %v5813_v23 = vld [vmem:[#allocation6 + $0x150] ss:$8 sps:$4 sm:$0xff]  }
 0x648   :  { %v5966_v42 = vpop.eup %5965  ;;  %v3044_v17 = vmul.f32 %v3019_v35, %v7026_v9  ;;  %v3045_v0 = vmul.f32 %v3023_v29, %v7033_v21  ;;  %v3123_v25 = vrot.slane %v3023_v29, %v6383_v26  ;;  %v3119_v47 = vrot.slane %v3019_v35, %v6383_v26  ;;  %v5818_v35 = vld [vmem:[#allocation6 + $0x144] ss:$8 sps:$4 sm:$0xff]   ;;  %v5816_v29 = vld [vmem:[#allocation6 + $0x140] ss:$8 sps:$4 sm:$0xff]  }
 0x649   :  { %v2980_v15 = vcombine.low %v5964_v10, %v5966_v42  ;;  %v5821_v10 = vld [vmem:[#allocation6 + $0x134] ss:$8 sps:$4 sm:$0xff]   ;;  %v5819_v42 = vld [vmem:[#allocation6 + $0x130] ss:$8 sps:$4 sm:$0xff]  }
 0x64a   :  { %v3072_v12 = vcombine.low %v3044_v17, %v3045_v0  ;;  %v3137_v34 = vmul.f32 %v3123_v25, %v6988_v14  ;;  %v3136_v19 = vmul.f32 %v3119_v47, %v6982_v2  ;;  %v5824_v17 = vld [vmem:[#allocation6 + $0x124] ss:$8 sps:$4 sm:$0xff]   ;;  %v5822_v0 = vld [vmem:[#allocation6 + $0x120] ss:$8 sps:$4 sm:$0xff]  }
 0x64b   :  { %v2987_v16 = vrot.slane %v2980_v15, %v6486_v20  ;;  %v5827_v15 = vld [vmem:[#allocation6 + $0x114] ss:$8 sps:$4 sm:$0xff]  }
 0x64c   :  { %v3079_v5 = vrot.slane %v3072_v12, %v6486_v20  ;;  %v5825_v12 = vld [vmem:[#allocation6 + $0x110] ss:$8 sps:$4 sm:$0xff]  }
 0x64d   :  { %v2995_v62 = vmul.f32 %v2987_v16, %v6979_v53  ;;  %v5830_v16 = vld [vmem:[#allocation6 + $0x104] ss:$8 sps:$4 sm:$0xff]  }
 0x64e   :  { %v3090_v22 = vrot.slane %v3079_v5, 7  ;;  %v5828_v5 = vld [vmem:[#allocation6 + $0x100] ss:$8 sps:$4 sm:$0xff]  }
 0x64f   :  { %v3027_v11 = vrot.slane %v2995_v62, %v6383_v26  ;;  %v3031_v59 = vrot.slane %v2995_v62, %v6390_v32 }
 0x650   :  { %v3098_v9 = vsub.f32 %v6979_v53, %v3090_v22 }
 0x651   :  { %v3046_v18 = vmul.f32 %v3027_v11, %v7040_v56  ;;  %v3047_v41 = vmul.f32 %v3031_v59, %v2899_v37  ;;  %v3131_v33 = vrot.slane %v3031_v59, %v6383_v26  ;;  %v3127_v54 = vrot.slane %v3027_v11, %v6383_v26 }
 0x652   :  { %v3167_v58 = vrot.slane %v3098_v9, %v6393_v38  ;;  %v3163_v27 = vrot.slane %v3098_v9, %v6387_v31 }
 0x653   :  { %v3080_v3 = vcombine.low %v3046_v18, %v3047_v41  ;;  %v3139_v49 = vmul.f32 %v3131_v33, %v7023_v57  ;;  %v3138_v63 = vmul.f32 %v3127_v54, %v7000_v52  ;;  %v5809_v57 = vld [vmem:[#allocation6 + $0x174] ss:$8 sps:$4 sm:$0xff]   ;;  %v5807_v52 = vld [vmem:[#allocation6 + $0x170] ss:$8 sps:$4 sm:$0xff]  }
 0x654   :  { %v3207_v37 = vrot.slane %v3167_v58, %v6387_v31  ;;  %v3203_v55 = vrot.slane %v3163_v27, %v6387_v31  ;;  %3671 = vmatprep.subr.bf16.mxu0 %v5809_v57 }
 0x655   :  { %v3087_v21 = vrot.slane %v3080_v3, %v6486_v20  ;;  %3672 = vmatpush1.bf16.msra.mxu0 %v5807_v52 }
 0x656   :  { %v3221_v39 = vadd.f32 %v3207_v37, %v3137_v34  ;;  %v3220_v51 = vadd.f32 %v3203_v55, %v3136_v19  ;;  %3673 = vmatprep.subr.bf16.mxu0 %v5812_v8 }
 0x657   :  { %v3091_v7 = vrot.slane %v3087_v21, 7 }
 0x658   :  { %v3229_v43 = vmax.f32 %v3221_v39, 0.0  ;;  %v3228_v46 = vmax.f32 %v3220_v51, 0.0 }
 0x659   :  { %v3099_v56 = vsub.f32 %v6979_v53, %v3091_v7  ;;  %3674 = vmatpush1.bf16.msra.mxu0 %v5810_v50 }
 0x65a   :  { %3675 = vmatprep.subr.bf16.mxu0 %v5815_v6 }
 0x65b   :  { %v3175_v36 = vrot.slane %v3099_v56, %v6393_v38  ;;  %v3171_v48 = vrot.slane %v3099_v56, %v6387_v31 }
 0x65d   :  { %v3215_v30 = vrot.slane %v3175_v36, %v6387_v31  ;;  %v3211_v53 = vrot.slane %v3171_v48, %v6387_v31  ;;  %3676 = vmatpush1.bf16.msra.mxu0 %v5813_v23 }
 0x65e   :  { %3677 = vmatprep.subr.bf16.mxu0 %v5818_v35 }
 0x65f   :  { %v3223_v45 = vadd.f32 %v3215_v30, %v3139_v49  ;;  %v3222_v40 = vadd.f32 %v3211_v53, %v3138_v63 }
 0x661   :  { %v3231_v14 = vmax.f32 %v3223_v45, 0.0  ;;  %v3230_v28 = vmax.f32 %v3222_v40, 0.0  ;;  %3678 = vmatpush1.bf16.msra.mxu0 %v5816_v29  ;;  %v7102_v29 = vld [vmem:[#allocation13 + $0x2] sm:$0x3] }
 0x662   :  { %3679 = vmatprep.subr.bf16.mxu0 %v5821_v10 }
 0x663   :  { %v3268_v60 = vpack.c.bf16 %v3231_v14, %v3229_v43  ;;  %v3267_v2 = vpack.c.bf16 %v3230_v28, %v3228_v46 }
 0x665   :  { %3405 = vmatprep.mubr.bf16.mxu0 %v3268_v60  ;;  %3680 = vmatpush1.bf16.msra.mxu0 %v5819_v42 }
 0x666   :  { %3406 = vmatmul.mubr.bf16.gmra.mxu0 %v3267_v2  ;;  %3681 = vmatprep.subr.bf16.mxu0 %v5824_v17 }
 0x667   :  { %3703 = vmatprep.mubr.bf16.mxu0 %v6256_v1 }
 0x669   :  { %3682 = vmatpush1.bf16.msra.mxu0 %v5822_v0 }
 0x66a   :  { %3683 = vmatprep.subr.bf16.mxu0 %v5827_v15 }
 0x66d   :  { %3684 = vmatpush1.bf16.msra.mxu0 %v5825_v12 }
 0x66e   :  { %3685 = vmatprep.subr.bf16.mxu0 %v5830_v16 }
 0x671   :  { %3686 = vmatpush1.bf16.msra.mxu0 %v5828_v5 }
 0x6fb   :  { %v5557_v62 = vpop.f32.mrf.mxu0 }
 0x6fd   :  { %v5558_v22 = vpop.f32.mrf.mxu0 }
 0x6fe   :  { %v5559_v11 = vadd.f32 %v5558_v22, %v5557_v62 }
 0x6ff   :  { %v5560_v59 = vpop.f32.mrf.mxu0 }
 0x700   :  { %v3416_v18 = vrot.slane %v5559_v11, 4  ;;  %v3440_v41 = vmul.f32 %v5559_v11, %v5559_v11 }
 0x701   :  { %v5561_v9 = vpop.f32.mrf.mxu0 }
 0x702   :  { %v3417_v3 = vadd.f32 %v5559_v11, %v3416_v18  ;;  %v3444_v21 = vrot.slane %v3440_v41, 4  ;;  %v7096_v58 = vadd.f32 %v5561_v9, %v5560_v59 }
 0x704   :  { %v3418_v27 = vrot.slane %v3417_v3, 2  ;;  %v3445_v25 = vadd.f32 %v3444_v21, %v3440_v41  ;;  %v3422_v7 = vrot.slane %v7096_v58, 4  ;;  %v3441_v47 = vmul.f32 %v7096_v58, %v7096_v58 }
 0x706   :  { %v3419_v33 = vadd.f32 %v3418_v27, %v3417_v3  ;;  %v3446_v54 = vrot.slane %v3445_v25, 2  ;;  %v3423_v56 = vadd.f32 %v7096_v58, %v3422_v7  ;;  %v3450_v37 = vrot.slane %v3441_v47, 4 }
 0x708   :  { %v3420_v55 = vrot.slane %v3419_v33, 1  ;;  %v3447_v34 = vadd.f32 %v3446_v54, %v3445_v25  ;;  %v3424_v36 = vrot.slane %v3423_v56, 2  ;;  %v3451_v19 = vadd.f32 %v3450_v37, %v3441_v47 }
 0x70a   :  { %v3421_v48 = vadd.f32 %v3420_v55, %v3419_v33  ;;  %v3448_v49 = vrot.slane %v3447_v34, 1  ;;  %v3425_v63 = vadd.f32 %v3424_v36, %v3423_v56  ;;  %v3452_v30 = vrot.slane %v3451_v19, 2 }
 0x70c   :  { %v3449_v39 = vadd.f32 %v3448_v49, %v3447_v34  ;;  %v3468_v53 = vmul.f32 0.125, %v3421_v48  ;;  %v3426_v51 = vrot.slane %v3425_v63, 1  ;;  %v3453_v45 = vadd.f32 %v3452_v30, %v3451_v19 }
 0x70e   :  { %v3472_v40 = vmul.f32 0.125, %v3449_v39  ;;  %v3476_v43 = vmul.f32 %v3468_v53, %v3468_v53  ;;  %v3427_v14 = vadd.f32 %v3426_v51, %v3425_v63  ;;  %v3454_v46 = vrot.slane %v3453_v45, 1 }
 0x710   :  { %v3480_v28 = vsub.f32 %v3472_v40, %v3476_v43  ;;  %v3455_v60 = vadd.f32 %v3454_v46, %v3453_v45  ;;  %v3469_v2 = vmul.f32 0.125, %v3427_v14 }
 0x712   :  { %v3484_v57 = vmax.f32 %v3480_v28, 0.0  ;;  %v3473_v52 = vmul.f32 0.125, %v3455_v60  ;;  %v3477_v8 = vmul.f32 %v3469_v2, %v3469_v2 }
 0x714   :  { %v3488_v50 = vadd.f32 1e-05, %v3484_v57  ;;  %v3481_v6 = vsub.f32 %v3473_v52, %v3477_v8 }
 0x716   :  { %5967 = vrsqrt.f32 %v3488_v50  ;;  %v3485_v23 = vmax.f32 %v3481_v6, 0.0 }
 0x718   :  { %v3489_v35 = vadd.f32 1e-05, %v3485_v23 }
 0x71a   :  { %5969 = vrsqrt.f32 %v3489_v35 }
 0x723   :  { %v5968_v10 = vpop.eup %5967 }
 0x724   :  { %v3496_v42 = vmul.f32 %v5968_v10, %v7102_v29 }
 0x726   :  { %v5563_v17 = vpop.f32.mrf.mxu0  ;;  %v3500_v0 = vmul.f32 %v3496_v42, %v3468_v53  ;;  %v3523_v12 = vrot.slane %v3496_v42, %v6383_v26  ;;  %v6019_v42 = vld [vmem:[%s7569_s1] sm:$0xff] }
 0x727   :  { %v5970_v15 = vpop.eup %5969 }
 0x728   :  { %v5564_v16 = vpop.f32.mrf.mxu0  ;;  %v3508_v5 = vrot.slane %v3500_v0, 7  ;;  %v3497_v62 = vmul.f32 %v5970_v15, %v7102_v29  ;;  %v3536_v3 = vmul.f32 %v5559_v11, %v3523_v12 }
 0x729   :  { %v7107_v22 = vadd.f32 %v5564_v16, %v5563_v17  ;;  %v6020_v17 = vld [vmem:[%s7569_s1 + $0x8] sm:$0xff] }
 0x72a   :  { %v5566_v59 = vpop.f32.mrf.mxu0  ;;  %v3516_v18 = vsub.f32 %v7102_v29, %v3508_v5  ;;  %v3501_v41 = vmul.f32 %v3497_v62, %v3469_v2  ;;  %v3527_v47 = vrot.slane %v3497_v62, %v6383_v26 }
 0x72b   :  { %v3428_v9 = vrot.slane %v7107_v22, 4  ;;  %v3442_v21 = vmul.f32 %v7107_v22, %v7107_v22 }
 0x72c   :  { %v5567_v27 = vpop.f32.mrf.mxu0  ;;  %v3543_v25 = vrot.slane %v3516_v18, %v6387_v31  ;;  %v3509_v7 = vrot.slane %v3501_v41, 7  ;;  %v3537_v49 = vmul.f32 %v7096_v58, %v3527_v47 }
 0x72d   :  { %v3429_v33 = vadd.f32 %v7107_v22, %v3428_v9  ;;  %v3456_v54 = vrot.slane %v3442_v21, 4  ;;  %v7116_v56 = vadd.f32 %v5567_v27, %v5566_v59 }
 0x72e   :  { %v3556_v37 = vadd.f32 %v3543_v25, %v3536_v3  ;;  %v3517_v55 = vsub.f32 %v7102_v29, %v3509_v7 }
 0x72f   :  { %v3430_v34 = vrot.slane %v3429_v33, 2  ;;  %v3457_v36 = vadd.f32 %v3456_v54, %v3442_v21  ;;  %v3434_v11 = vrot.slane %v7116_v56, 4  ;;  %v3443_v19 = vmul.f32 %v7116_v56, %v7116_v56 }
 0x730   :  { %v3560_v48 = vmax.f32 %v3556_v37, 0.0  ;;  %v3547_v63 = vrot.slane %v3517_v55, %v6387_v31 }
 0x731   :  { %v3431_v30 = vadd.f32 %v3430_v34, %v3429_v33  ;;  %v3458_v39 = vrot.slane %v3457_v36, 2  ;;  %v3435_v53 = vadd.f32 %v7116_v56, %v3434_v11  ;;  %v3462_v51 = vrot.slane %v3443_v19, 4 }
 0x732   :  { %v3557_v45 = vadd.f32 %v3547_v63, %v3537_v49  ;;  %v7126_v28 = vadd.f32 %v3560_v48, %v6765_v4 }
 0x733   :  { %v3432_v40 = vrot.slane %v3431_v30, 1  ;;  %v3459_v43 = vadd.f32 %v3458_v39, %v3457_v36  ;;  %v3436_v14 = vrot.slane %v3435_v53, 2  ;;  %v3463_v46 = vadd.f32 %v3462_v51, %v3443_v19 }
 0x734   :  { %v3561_v60 = vmax.f32 %v3557_v45, 0.0  ;;  %v3568_v4 = vadd.f32 %v6019_v42, %v7126_v28  ;;  %v5846_v42 = vld [vmem:[#allocation9 + $0x220] ss:$8 sps:$4 sm:$0xff]  }
 0x735   :  { %v3433_v2 = vadd.f32 %v3432_v40, %v3431_v30  ;;  %v3460_v57 = vrot.slane %v3459_v43, 1  ;;  %v3437_v52 = vadd.f32 %v3436_v14, %v3435_v53  ;;  %v3464_v58 = vrot.slane %v3463_v46, 2  ;;  %v6021_v14 = vld [vmem:[%s7569_s1 + $0x10] sm:$0xff] }
 0x736   :  { %v7129_v8 = vadd.f32 %v3561_v60, %v6769_v13 }
 0x737   :  { %v3470_v50 = vmul.f32 0.125, %v3433_v2  ;;  %v3461_v6 = vadd.f32 %v3460_v57, %v3459_v43  ;;  %v3438_v23 = vrot.slane %v3437_v52, 1  ;;  %v3465_v35 = vadd.f32 %v3464_v58, %v3463_v46  ;;  %v5833_v2 = vld [vmem:[#allocation9 + $0x274] ss:$8 sps:$4 sm:$0xff]   ;;  %v5834_v57 = vld [vmem:[#allocation9 + $0x260] ss:$8 sps:$4 sm:$0xff]  }
 0x738   :  { %v3569_v0 = vadd.f32 %v6020_v17, %v7129_v8  ;;  %4367 = vmatprep.subr.bf16.mxu1 %v5833_v2  ;;  %v5837_v58 = vld [vmem:[#allocation9 + $0x250] ss:$8 sps:$4 sm:$0xff]  }
 0x739   :  { %v3478_v10 = vmul.f32 %v3470_v50, %v3470_v50  ;;  %v3474_v15 = vmul.f32 0.125, %v3461_v6  ;;  %v3439_v13 = vadd.f32 %v3438_v23, %v3437_v52  ;;  %v3466_v12 = vrot.slane %v3465_v35, 1  ;;  %v5839_v52 = vld [vmem:[#allocation9 + $0x254] ss:$8 sps:$4 sm:$0xff]   ;;  %v5840_v6 = vld [vmem:[#allocation9 + $0x240] ss:$8 sps:$4 sm:$0xff]  }
 0x73a   :  { %v3589_v16 = vpack.c.bf16 %v3569_v0, %v3568_v4  ;;  %v5845_v23 = vld [vmem:[#allocation9 + $0x234] ss:$8 sps:$4 sm:$0xff]   ;;  %v5849_v17 = vld [vmem:[#allocation9 + $0x210] ss:$8 sps:$4 sm:$0xff]   ;;  %v5854_v0 = vld [vmem:[#allocation9 + $0x204] ss:$8 sps:$4 sm:$0xff]  }
 0x73b   :  { %v3482_v5 = vsub.f32 %v3474_v15, %v3478_v10  ;;  %v3467_v62 = vadd.f32 %v3466_v12, %v3465_v35  ;;  %v3471_v59 = vmul.f32 0.125, %v3439_v13  ;;  %v5843_v35 = vld [vmem:[#allocation9 + $0x230] ss:$8 sps:$4 sm:$0xff]   ;;  %v5848_v10 = vld [vmem:[#allocation9 + $0x224] ss:$8 sps:$4 sm:$0xff]  }
 0x73c   :  { %3704 = vmatmul.mubr.bf16.vlgmr.msra.gmra.mxu0 %v3589_v16  ;;  %v5851_v4 = vld [vmem:[#allocation9 + $0x214] ss:$8 sps:$4 sm:$0xff]   ;;  %v5852_v15 = vld [vmem:[#allocation9 + $0x200] ss:$8 sps:$4 sm:$0xff]   ;;  %v5855_v12 = vld [vmem:[#allocation9 + $0x2f0] ss:$8 sps:$4 sm:$0xff]  }
 0x73d   :  { %v3486_v18 = vmax.f32 %v3482_v5, 0.0  ;;  %v3475_v41 = vmul.f32 0.125, %v3467_v62  ;;  %v3479_v9 = vmul.f32 %v3471_v59, %v3471_v59  ;;  %3713 = vmatprep.mubr.bf16.mxu0 %v6256_v1  ;;  %v5857_v13 = vld [vmem:[#allocation9 + $0x2f4] ss:$8 sps:$4 sm:$0xff]   ;;  %v5860_v16 = vld [vmem:[#allocation9 + $0x2e4] ss:$8 sps:$4 sm:$0xff]  }
 0x73e   :  { %v5858_v5 = vld [vmem:[#allocation9 + $0x2e0] ss:$8 sps:$4 sm:$0xff]   ;;  %v5863_v62 = vld [vmem:[#allocation9 + $0x2d4] ss:$8 sps:$4 sm:$0xff]  }
 0x73f   :  { %v3490_v3 = vadd.f32 1e-05, %v3486_v18  ;;  %v3483_v21 = vsub.f32 %v3475_v41, %v3479_v9  ;;  %v5866_v18 = vld [vmem:[#allocation9 + $0x2c4] ss:$8 sps:$4 sm:$0xff]   ;;  %v5864_v41 = vld [vmem:[#allocation9 + $0x2c0] ss:$8 sps:$4 sm:$0xff]  }
 0x740   :  { %v5869_v9 = vld [vmem:[#allocation9 + $0x2b4] ss:$8 sps:$4 sm:$0xff]  }
 0x741   :  { %5971 = vrsqrt.f32 %v3490_v3  ;;  %v3487_v27 = vmax.f32 %v3483_v21, 0.0  ;;  %v5867_v3 = vld [vmem:[#allocation9 + $0x2b0] ss:$8 sps:$4 sm:$0xff]   ;;  %v5872_v21 = vld [vmem:[#allocation9 + $0x2a4] ss:$8 sps:$4 sm:$0xff]  }
 0x743   :  { %v3491_v25 = vadd.f32 1e-05, %v3487_v27  ;;  %v5870_v27 = vld [vmem:[#allocation9 + $0x2a0] ss:$8 sps:$4 sm:$0xff]  }
 0x745   :  { %5973 = vrsqrt.f32 %v3491_v25  ;;  %v5875_v25 = vld [vmem:[#allocation9 + $0x294] ss:$8 sps:$4 sm:$0xff]  }
 0x74e   :  { %v5972_v7 = vpop.eup %5971 }
 0x74f   :  { %v3498_v47 = vmul.f32 %v5972_v7, %v7102_v29  ;;  %v5873_v7 = vld [vmem:[#allocation9 + $0x290] ss:$8 sps:$4 sm:$0xff]  }
 0x751   :  { %v3502_v33 = vmul.f32 %v3498_v47, %v3470_v50  ;;  %v3531_v55 = vrot.slane %v3498_v47, %v6383_v26  ;;  %v5842_v50 = vld [vmem:[#allocation9 + $0x244] ss:$8 sps:$4 sm:$0xff]  }
 0x752   :  { %v5974_v54 = vpop.eup %5973  ;;  %v5878_v47 = vld [vmem:[#allocation9 + $0x284] ss:$8 sps:$4 sm:$0xff]  }
 0x753   :  { %v3510_v37 = vrot.slane %v3502_v33, 7  ;;  %v3499_v34 = vmul.f32 %v5974_v54, %v7102_v29  ;;  %v3538_v1 = vmul.f32 %v7107_v22, %v3531_v55  ;;  %v5876_v33 = vld [vmem:[#allocation9 + $0x280] ss:$8 sps:$4 sm:$0xff]  }
 0x755   :  { %v3503_v36 = vmul.f32 %v3499_v34, %v3471_v59  ;;  %v3518_v11 = vsub.f32 %v7102_v29, %v3510_v37  ;;  %v3535_v48 = vrot.slane %v3499_v34, %v6383_v26  ;;  %v5861_v59 = vld [vmem:[#allocation9 + $0x2d0] ss:$8 sps:$4 sm:$0xff]  }
 0x757   :  { %v3511_v19 = vrot.slane %v3503_v36, 7  ;;  %v3551_v49 = vrot.slane %v3518_v11, %v6387_v31  ;;  %v3539_v39 = vmul.f32 %v7116_v56, %v3535_v48  ;;  %v6022_v56 = vld [vmem:[%s7569_s1 + $0x18] sm:$0xff] }
 0x759   :  { %v3519_v63 = vsub.f32 %v7102_v29, %v3511_v19  ;;  %v3558_v30 = vadd.f32 %v3551_v49, %v3538_v1 }
 0x75b   :  { %v3555_v53 = vrot.slane %v3519_v63, %v6387_v31  ;;  %v3562_v51 = vmax.f32 %v3558_v30, 0.0 }
 0x75d   :  { %v3559_v45 = vadd.f32 %v3555_v53, %v3539_v39  ;;  %v7151_v43 = vadd.f32 %v3562_v51, %v6792_v61  ;;  %v5831_v61 = vld [vmem:[#allocation9 + $0x270] ss:$8 sps:$4 sm:$0xff]  }
 0x75e   :  { %4368 = vmatpush1.bf16.msra.mxu1 %v5831_v61 }
 0x75f   :  { %v3563_v40 = vmax.f32 %v3559_v45, 0.0  ;;  %v3570_v29 = vadd.f32 %v6021_v14, %v7151_v43 }
 0x761   :  { %v7154_v22 = vadd.f32 %v3563_v40, %v6796_v44  ;;  %v5836_v44 = vld [vmem:[#allocation9 + $0x264] ss:$8 sps:$4 sm:$0xff]  }
 0x762   :  { %4369 = vmatprep.subr.bf16.mxu1 %v5836_v44 }
 0x763   :  { %v3571_v46 = vadd.f32 %v6022_v56, %v7154_v22  ;;  %4370 = vmatpush1.bf16.msra.mxu1 %v5834_v57 }
 0x764   :  { %4371 = vmatprep.subr.bf16.mxu1 %v5839_v52 }
 0x765   :  { %v3590_v60 = vpack.c.bf16 %v3571_v46, %v3570_v29 }
 0x767   :  { %3714 = vmatmul.mubr.bf16.gmra.mxu0 %v3590_v60  ;;  %4372 = vmatpush1.bf16.msra.mxu1 %v5837_v58 }
 0x768   :  { %4373 = vmatprep.subr.bf16.mxu1 %v5842_v50 }
 0x76b   :  { %4374 = vmatpush1.bf16.msra.mxu1 %v5840_v6 }
 0x76c   :  { %4375 = vmatprep.subr.bf16.mxu1 %v5845_v23 }
 0x76f   :  { %4376 = vmatpush1.bf16.msra.mxu1 %v5843_v35 }
 0x770   :  { %4377 = vmatprep.subr.bf16.mxu1 %v5848_v10 }
 0x773   :  { %4378 = vmatpush1.bf16.msra.mxu1 %v5846_v42 }
 0x774   :  { %4379 = vmatprep.subr.bf16.mxu1 %v5851_v4 }
 0x777   :  { %4380 = vmatpush1.bf16.msra.mxu1 %v5849_v17 }
 0x778   :  { %4381 = vmatprep.subr.bf16.mxu1 %v5854_v0 }
 0x77b   :  { %4382 = vmatpush1.bf16.msra.mxu1 %v5852_v15 }
 0x77c   :  { %4383 = vmatprep.subr.bf16.mxu1 %v5857_v13 }
 0x77f   :  { %4384 = vmatpush2.bf16.msra.mxu1 %v5855_v12 }
 0x780   :  { %4385 = vmatprep.subr.bf16.mxu1 %v5860_v16 }
 0x783   :  { %4386 = vmatpush2.bf16.msra.mxu1 %v5858_v5 }
 0x784   :  { %4387 = vmatprep.subr.bf16.mxu1 %v5863_v62 }
 0x787   :  { %4388 = vmatpush2.bf16.msra.mxu1 %v5861_v59 }
 0x788   :  { %4389 = vmatprep.subr.bf16.mxu1 %v5866_v18 }
 0x78b   :  { %4390 = vmatpush2.bf16.msra.mxu1 %v5864_v41 }
 0x78c   :  { %4391 = vmatprep.subr.bf16.mxu1 %v5869_v9 }
 0x78f   :  { %4392 = vmatpush2.bf16.msra.mxu1 %v5867_v3 }
 0x790   :  { %4393 = vmatprep.subr.bf16.mxu1 %v5872_v21 }
 0x793   :  { %4394 = vmatpush2.bf16.msra.mxu1 %v5870_v27 }
 0x794   :  { %4395 = vmatprep.subr.bf16.mxu1 %v5875_v25 }
 0x797   :  { %4396 = vmatpush2.bf16.msra.mxu1 %v5873_v7 }
 0x798   :  { %4397 = vmatprep.subr.bf16.mxu1 %v5878_v47 }
 0x79b   :  { %4398 = vmatpush2.bf16.msra.mxu1 %v5876_v33 }
 0x7fc   :  { %v7164_v54 = vpop.f32.mrf.mxu0 }
 0x7fd   :  { %v3726_v37 = vrot.slane %v7164_v54, 4  ;;  %v3774_v55 = vmul.f32 %v7164_v54, %v7164_v54 }
 0x7fe   :  { %v7169_v34 = vpop.f32.mrf.mxu0 }
 0x7ff   :  { %v3727_v36 = vadd.f32 %v3726_v37, %v7164_v54  ;;  %v3782_v11 = vrot.slane %v3774_v55, 4  ;;  %v3732_v1 = vrot.slane %v7169_v34, 4  ;;  %v3775_v19 = vmul.f32 %v7169_v34, %v7169_v34 }
 0x800   :  { %v7175_v48 = vpop.f32.mrf.mxu0 }
 0x801   :  { %v3728_v49 = vrot.slane %v3727_v36, 2  ;;  %v3783_v63 = vadd.f32 %v3782_v11, %v3774_v55  ;;  %v3733_v30 = vadd.f32 %v3732_v1, %v7169_v34  ;;  %v3788_v39 = vrot.slane %v3775_v19, 4 }
 0x802   :  { %v3738_v53 = vrot.slane %v7175_v48, 4  ;;  %v3776_v51 = vmul.f32 %v7175_v48, %v7175_v48  ;;  %v7181_v45 = vpop.f32.mrf.mxu0 }
 0x803   :  { %v3729_v40 = vadd.f32 %v3728_v49, %v3727_v36  ;;  %v3784_v14 = vrot.slane %v3783_v63, 2  ;;  %v3734_v29 = vrot.slane %v3733_v30, 2  ;;  %v3789_v56 = vadd.f32 %v3788_v39, %v3775_v19 }
 0x804   :  { %v3739_v46 = vadd.f32 %v3738_v53, %v7175_v48  ;;  %v3794_v60 = vrot.slane %v3776_v51, 4  ;;  %v3744_v2 = vrot.slane %v7181_v45, 4  ;;  %v3777_v61 = vmul.f32 %v7181_v45, %v7181_v45 }
 0x805   :  { %v3730_v44 = vrot.slane %v3729_v40, 1  ;;  %v3785_v57 = vadd.f32 %v3784_v14, %v3783_v63  ;;  %v3735_v52 = vadd.f32 %v3734_v29, %v3733_v30  ;;  %v3790_v58 = vrot.slane %v3789_v56, 2 }
 0x806   :  { %v3740_v50 = vrot.slane %v3739_v46, 2  ;;  %v3795_v6 = vadd.f32 %v3794_v60, %v3776_v51  ;;  %v3745_v23 = vadd.f32 %v3744_v2, %v7181_v45  ;;  %v3800_v35 = vrot.slane %v3777_v61, 4 }
 0x807   :  { %v3731_v10 = vadd.f32 %v3730_v44, %v3729_v40  ;;  %v3786_v42 = vrot.slane %v3785_v57, 1  ;;  %v3736_v4 = vrot.slane %v3735_v52, 1  ;;  %v3791_v17 = vadd.f32 %v3790_v58, %v3789_v56 }
 0x808   :  { %v3741_v0 = vadd.f32 %v3740_v50, %v3739_v46  ;;  %v3796_v15 = vrot.slane %v3795_v6, 2  ;;  %v3746_v13 = vrot.slane %v3745_v23, 2  ;;  %v3801_v12 = vadd.f32 %v3800_v35, %v3777_v61 }
 0x809   :  { %v3787_v16 = vadd.f32 %v3786_v42, %v3785_v57  ;;  %v3830_v5 = vmul.f32 0.125, %v3731_v10  ;;  %v3737_v62 = vadd.f32 %v3736_v4, %v3735_v52  ;;  %v3792_v59 = vrot.slane %v3791_v17, 1  ;;  %v7192_v42 = vld [vmem:[#allocation7 + $0x8] sm:$0xf] }
 0x80a   :  { %v3742_v18 = vrot.slane %v3741_v0, 1  ;;  %v3797_v41 = vadd.f32 %v3796_v15, %v3795_v6  ;;  %v3747_v9 = vadd.f32 %v3746_v13, %v3745_v23  ;;  %v3802_v3 = vrot.slane %v3801_v12, 2 }
 0x80b   :  { %v3838_v21 = vmul.f32 0.125, %v3787_v16  ;;  %v3846_v27 = vmul.f32 %v3830_v5, %v3830_v5  ;;  %v3793_v25 = vadd.f32 %v3792_v59, %v3791_v17  ;;  %v3831_v7 = vmul.f32 0.125, %v3737_v62 }
 0x80c   :  { %v3743_v47 = vadd.f32 %v3742_v18, %v3741_v0  ;;  %v3798_v33 = vrot.slane %v3797_v41, 1  ;;  %v3748_v37 = vrot.slane %v3747_v9, 1  ;;  %v3803_v55 = vadd.f32 %v3802_v3, %v3801_v12 }
 0x80d   :  { %v3854_v36 = vsub.f32 %v3838_v21, %v3846_v27  ;;  %v3839_v11 = vmul.f32 0.125, %v3793_v25  ;;  %v3847_v1 = vmul.f32 %v3831_v7, %v3831_v7 }
 0x80e   :  { %v3799_v19 = vadd.f32 %v3798_v33, %v3797_v41  ;;  %v7188_v49 = vmul.f32 0.125, %v3743_v47  ;;  %v3749_v63 = vadd.f32 %v3748_v37, %v3747_v9  ;;  %v3804_v30 = vrot.slane %v3803_v55, 1 }
 0x80f   :  { %v3862_v39 = vmax.f32 %v3854_v36, 0.0  ;;  %v3855_v53 = vsub.f32 %v3839_v11, %v3847_v1 }
 0x810   :  { %v3840_v51 = vmul.f32 0.125, %v3799_v19  ;;  %v3848_v40 = vmul.f32 %v7188_v49, %v7188_v49  ;;  %v3805_v14 = vadd.f32 %v3804_v30, %v3803_v55  ;;  %v3833_v29 = vmul.f32 0.125, %v3749_v63 }
 0x811   :  { %v3870_v56 = vadd.f32 1e-05, %v3862_v39  ;;  %v3863_v46 = vmax.f32 %v3855_v53, 0.0 }
 0x812   :  { %v3856_v60 = vsub.f32 %v3840_v51, %v3848_v40  ;;  %v3841_v2 = vmul.f32 0.125, %v3805_v14  ;;  %v3849_v61 = vmul.f32 %v3833_v29, %v3833_v29 }
 0x813   :  { %v3871_v44 = vadd.f32 1e-05, %v3863_v46  ;;  %5975 = vrsqrt.f32 %v3870_v56 }
 0x814   :  { %v3864_v57 = vmax.f32 %v3856_v60, 0.0  ;;  %v3857_v52 = vsub.f32 %v3841_v2, %v3849_v61 }
 0x815   :  { %5977 = vrsqrt.f32 %v3871_v44 }
 0x816   :  { %v3872_v58 = vadd.f32 1e-05, %v3864_v57  ;;  %v3865_v50 = vmax.f32 %v3857_v52, 0.0 }
 0x818   :  { %v3873_v6 = vadd.f32 1e-05, %v3865_v50  ;;  %5979 = vrsqrt.f32 %v3872_v58 }
 0x81a   :  { %5981 = vrsqrt.f32 %v3873_v6 }
 0x820   :  { %v5976_v23 = vpop.eup %5975 }
 0x822   :  { %v5978_v35 = vpop.eup %5977 }
 0x823   :  { %v3894_v10 = vcombine.low %v5976_v23, %v5978_v35 }
 0x825   :  { %v3901_v4 = vrot.slane %v3894_v10, %v6486_v20  ;;  %v5980_v17 = vpop.eup %5979 }
 0x827   :  { %v5982_v0 = vpop.eup %5981  ;;  %v3930_v15 = vmul.f32 %v3901_v4, %v7192_v42  ;;  %v7196_v13 = vpop.f32.mrf.mxu0 }
 0x828   :  { %v3902_v12 = vcombine.low %v5980_v17, %v5982_v0  ;;  %v3750_v16 = vrot.slane %v7196_v13, 4  ;;  %v3778_v62 = vmul.f32 %v7196_v13, %v7196_v13 }
 0x829   :  { %v7202_v59 = vrot.slane %v3930_v15, %v6383_v26  ;;  %v3945_v18 = vrot.slane %v3930_v15, %v6390_v32  ;;  %v7205_v41 = vpop.f32.mrf.mxu0 }
 0x82a   :  { %v3909_v9 = vrot.slane %v3902_v12, %v6486_v20  ;;  %v3751_v3 = vadd.f32 %v3750_v16, %v7196_v13  ;;  %v3806_v21 = vrot.slane %v3778_v62, 4  ;;  %v3756_v27 = vrot.slane %v7205_v41, 4 }
 0x82b   :  { %v3978_v25 = vmul.f32 %v7202_v59, %v3830_v5  ;;  %v3979_v47 = vmul.f32 %v3945_v18, %v3831_v7  ;;  %v4041_v33 = vrot.slane %v7202_v59, %v6383_v26  ;;  %v4045_v37 = vrot.slane %v3945_v18, %v6383_v26  ;;  %v7214_v55 = vpop.f32.mrf.mxu0 }
 0x82c   :  { %v3931_v36 = vmul.f32 %v3909_v9, %v7192_v42  ;;  %v3752_v11 = vrot.slane %v3751_v3, 2  ;;  %v3807_v1 = vadd.f32 %v3806_v21, %v3778_v62  ;;  %v3757_v19 = vadd.f32 %v3756_v27, %v7205_v41 }
 0x82d   :  { %v3994_v63 = vcombine.low %v3978_v25, %v3979_v47  ;;  %v7219_v30 = vmul.f32 %v4045_v37, %v7169_v34  ;;  %v3779_v5 = vmul.f32 %v7205_v41, %v7205_v41  ;;  %v3762_v7 = vrot.slane %v7214_v55, 4  ;;  %v7236_v6 = vpop.f32.mrf.mxu0 }
 0x82e   :  { %v7225_v39 = vrot.slane %v3931_v36, %v6383_v26  ;;  %v3953_v53 = vrot.slane %v3931_v36, %v6390_v32  ;;  %v3753_v51 = vadd.f32 %v3752_v11, %v3751_v3  ;;  %v3808_v40 = vrot.slane %v3807_v1, 2 }
 0x82f   :  { %v3758_v14 = vrot.slane %v3757_v19, 2  ;;  %v3812_v56 = vrot.slane %v3779_v5, 4  ;;  %v3763_v46 = vadd.f32 %v3762_v7, %v7214_v55  ;;  %v3780_v34 = vmul.f32 %v7214_v55, %v7214_v55 }
 0x830   :  { %v3980_v60 = vmul.f32 %v7225_v39, %v7188_v49  ;;  %v3981_v2 = vmul.f32 %v3953_v53, %v3833_v29  ;;  %v4049_v61 = vrot.slane %v7225_v39, %v6383_v26  ;;  %v4053_v44 = vrot.slane %v3953_v53, %v6383_v26 }
 0x831   :  { %v3754_v57 = vrot.slane %v3753_v51, 1  ;;  %v3809_v52 = vadd.f32 %v3808_v40, %v3807_v1  ;;  %v3759_v58 = vadd.f32 %v3758_v14, %v3757_v19  ;;  %v3813_v50 = vadd.f32 %v3812_v56, %v3779_v5 }
 0x832   :  { %v4002_v23 = vcombine.low %v3980_v60, %v3981_v2  ;;  %v7239_v35 = vmul.f32 %v4053_v44, %v7181_v45  ;;  %v3764_v10 = vrot.slane %v3763_v46, 2  ;;  %v3818_v4 = vrot.slane %v3780_v34, 4 }
 0x833   :  { %v3755_v17 = vadd.f32 %v3754_v57, %v3753_v51  ;;  %v3810_v49 = vrot.slane %v3809_v52, 1  ;;  %v3760_v29 = vrot.slane %v3759_v58, 1  ;;  %v3814_v0 = vrot.slane %v3813_v50, 2 }
 0x834   :  { %v3765_v15 = vadd.f32 %v3764_v10, %v3763_v46  ;;  %v3819_v12 = vadd.f32 %v3818_v4, %v3780_v34  ;;  %v3768_v16 = vrot.slane %v7236_v6, 4  ;;  %v3781_v62 = vmul.f32 %v7236_v6, %v7236_v6 }
 0x835   :  { %v3811_v18 = vadd.f32 %v3810_v49, %v3809_v52  ;;  %v7244_v9 = vmul.f32 0.125, %v3755_v17  ;;  %v3761_v3 = vadd.f32 %v3760_v29, %v3759_v58  ;;  %v3815_v21 = vadd.f32 %v3814_v0, %v3813_v50 }
 0x836   :  { %v3766_v45 = vrot.slane %v3765_v15, 1  ;;  %v3820_v27 = vrot.slane %v3819_v12, 2  ;;  %v3769_v25 = vadd.f32 %v3768_v16, %v7236_v6  ;;  %v3824_v47 = vrot.slane %v3781_v62, 4 }
 0x837   :  { %v3842_v37 = vmul.f32 0.125, %v3811_v18  ;;  %v3850_v36 = vmul.f32 %v7244_v9, %v7244_v9  ;;  %v3816_v11 = vrot.slane %v3815_v21, 1  ;;  %v7249_v1 = vmul.f32 0.125, %v3761_v3 }
 0x838   :  { %v3767_v19 = vadd.f32 %v3766_v45, %v3765_v15  ;;  %v3821_v5 = vadd.f32 %v3820_v27, %v3819_v12  ;;  %v3770_v7 = vrot.slane %v3769_v25, 2  ;;  %v3825_v53 = vadd.f32 %v3824_v47, %v3781_v62 }
 0x839   :  { %v3858_v51 = vsub.f32 %v3842_v37, %v3850_v36  ;;  %v3817_v40 = vadd.f32 %v3816_v11, %v3815_v21  ;;  %v3851_v14 = vmul.f32 %v7249_v1, %v7249_v1  ;;  %v4001_v56 = vrot.slane %v3994_v63, %v6486_v20 }
 0x83a   :  { %v3822_v46 = vrot.slane %v3821_v5, 1  ;;  %v7254_v34 = vmul.f32 0.125, %v3767_v19  ;;  %v3771_v60 = vadd.f32 %v3770_v7, %v3769_v25  ;;  %v3826_v2 = vrot.slane %v3825_v53, 2 }
 0x83b   :  { %v3866_v44 = vmax.f32 %v3858_v51, 0.0  ;;  %v3843_v57 = vmul.f32 0.125, %v3817_v40  ;;  %v4009_v52 = vrot.slane %v4002_v23, %v6486_v20  ;;  %v4026_v58 = vrot.slane %v4001_v56, 7 }
 0x83c   :  { %v3823_v50 = vadd.f32 %v3822_v46, %v3821_v5  ;;  %v3852_v10 = vmul.f32 %v7254_v34, %v7254_v34  ;;  %v3772_v4 = vrot.slane %v3771_v60, 1  ;;  %v3827_v17 = vadd.f32 %v3826_v2, %v3825_v53 }
 0x83d   :  { %v3874_v49 = vadd.f32 1e-05, %v3866_v44  ;;  %v3859_v29 = vsub.f32 %v3843_v57, %v3851_v14  ;;  %v4027_v0 = vrot.slane %v4009_v52, 7  ;;  %v4034_v63 = vsub.f32 %v7192_v42, %v4026_v58 }
 0x83e   :  { %v3844_v15 = vmul.f32 0.125, %v3823_v50  ;;  %v3773_v12 = vadd.f32 %v3772_v4, %v3771_v60  ;;  %v3828_v16 = vrot.slane %v3827_v17, 1  ;;  %v4070_v23 = vmul.f32 %v4041_v33, %v7164_v54 }
 0x83f   :  { %5983 = vrsqrt.f32 %v3874_v49  ;;  %v3867_v62 = vmax.f32 %v3859_v29, 0.0  ;;  %v4035_v18 = vsub.f32 %v7192_v42, %v4027_v0  ;;  %v4085_v3 = vrot.slane %v4034_v63, %v6387_v31 }
 0x840   :  { %v3860_v21 = vsub.f32 %v3844_v15, %v3852_v10  ;;  %v3829_v45 = vadd.f32 %v3828_v16, %v3827_v17  ;;  %v3837_v27 = vmul.f32 0.125, %v3773_v12  ;;  %v4089_v25 = vrot.slane %v4034_v63, %v6393_v38 }
 0x841   :  { %v3875_v47 = vadd.f32 1e-05, %v3867_v62  ;;  %v4093_v37 = vrot.slane %v4035_v18, %v6387_v31  ;;  %v4097_v36 = vrot.slane %v4035_v18, %v6393_v38  ;;  %v4072_v54 = vmul.f32 %v4049_v61, %v7175_v48 }
 0x842   :  { %v3868_v59 = vmax.f32 %v3860_v21, 0.0  ;;  %v3845_v33 = vmul.f32 0.125, %v3829_v45  ;;  %v3853_v11 = vmul.f32 %v3837_v27, %v3837_v27  ;;  %v4129_v19 = vrot.slane %v4089_v25, %v6387_v31 }
 0x843   :  { %5985 = vrsqrt.f32 %v3875_v47  ;;  %v4137_v5 = vrot.slane %v4097_v36, %v6387_v31  ;;  %v4125_v7 = vrot.slane %v4085_v3, %v6387_v31  ;;  %v4133_v53 = vrot.slane %v4093_v37, %v6387_v31 }
 0x844   :  { %v3861_v51 = vsub.f32 %v3845_v33, %v3853_v11  ;;  %v4155_v40 = vadd.f32 %v4129_v19, %v7219_v30  ;;  %v3876_v14 = vadd.f32 1e-05, %v3868_v59 }
 0x845   :  { %v4157_v56 = vadd.f32 %v4137_v5, %v7239_v35  ;;  %v4154_v39 = vadd.f32 %v4125_v7, %v4070_v23  ;;  %v4156_v48 = vadd.f32 %v4133_v53, %v4072_v54 }
 0x846   :  { %v3869_v61 = vmax.f32 %v3861_v51, 0.0  ;;  %v4163_v46 = vmax.f32 %v4155_v40, 0.0  ;;  %5987 = vrsqrt.f32 %v3876_v14 }
 0x847   :  { %v4165_v60 = vmax.f32 %v4157_v56, 0.0  ;;  %v4162_v2 = vmax.f32 %v4154_v39, 0.0  ;;  %v4164_v44 = vmax.f32 %v4156_v48, 0.0 }
 0x848   :  { %v3877_v57 = vadd.f32 1e-05, %v3869_v61 }
 0x849   :  { %v4204_v52 = vpack.c.bf16 %v4165_v60, %v4163_v46  ;;  %v4203_v58 = vpack.c.bf16 %v4164_v44, %v4162_v2 }
 0x84a   :  { %5989 = vrsqrt.f32 %v3877_v57 }
 0x84b   :  { %4399 = vmatprep.mubr.bf16.mxu1 %v4204_v52 }
 0x84c   :  { %v5984_v50 = vpop.eup %5983  ;;  %4400 = vmatmul.mubr.bf16.vlgmr.msra.gmra.mxu1 %v4203_v58 }
 0x850   :  { %v5986_v10 = vpop.eup %5985 }
 0x851   :  { %v3910_v30 = vcombine.low %v5984_v50, %v5986_v10  ;;  %v5879_v50 = vld [vmem:[#allocation12 + $0x178] sm:$0xff]   ;;  %v5882_v10 = vld [vmem:[#allocation12 + $0x130] sm:$0xff]  }
 0x852   :  { %5569 = vmatprep.subr.bf16.mxu0 %v5879_v50 }
 0x853   :  { %v3917_v4 = vrot.slane %v3910_v30, %v6486_v20  ;;  %v5988_v17 = vpop.eup %5987  ;;  %v5883_v30 = vld [vmem:[#allocation12 + $0x168] sm:$0xff]  }
 0x855   :  { %v3932_v35 = vmul.f32 %v3917_v4, %v7192_v42  ;;  %v5884_v4 = vld [vmem:[#allocation12 + $0x128] sm:$0xff]  }
 0x857   :  { %v5990_v49 = vpop.eup %5989  ;;  %v3957_v29 = vrot.slane %v3932_v35, %v6383_v26  ;;  %v3961_v0 = vrot.slane %v3932_v35, %v6390_v32  ;;  %v5885_v35 = vld [vmem:[#allocation12 + $0x160] sm:$0xff]  }
 0x858   :  { %v3918_v63 = vcombine.low %v5988_v17, %v5990_v49  ;;  %v5886_v17 = vld [vmem:[#allocation12 + $0x120] sm:$0xff]   ;;  %v5887_v49 = vld [vmem:[#allocation12 + $0x158] sm:$0xff]  }
 0x859   :  { %v3982_v15 = vmul.f32 %v3957_v29, %v7244_v9  ;;  %v3983_v12 = vmul.f32 %v3961_v0, %v7249_v1  ;;  %v4061_v59 = vrot.slane %v3961_v0, %v6383_v26  ;;  %v4057_v11 = vrot.slane %v3957_v29, %v6383_v26  ;;  %v5888_v29 = vld [vmem:[#allocation12 + $0x118] sm:$0xff]   ;;  %v5889_v0 = vld [vmem:[#allocation12 + $0x150] sm:$0xff]  }
 0x85a   :  { %v3925_v16 = vrot.slane %v3918_v63, %v6486_v20  ;;  %v5890_v63 = vld [vmem:[#allocation12 + $0x110] sm:$0xff]  }
 0x85b   :  { %v4010_v23 = vcombine.low %v3982_v15, %v3983_v12  ;;  %v4075_v53 = vmul.f32 %v4061_v59, %v7205_v41  ;;  %v4074_v40 = vmul.f32 %v4057_v11, %v7196_v13  ;;  %v5891_v15 = vld [vmem:[#allocation12 + $0x148] sm:$0xff]  }
 0x85c   :  { %v3933_v62 = vmul.f32 %v3925_v16, %v7192_v42  ;;  %v5892_v12 = vld [vmem:[#allocation12 + $0x108] sm:$0xff]   ;;  %v5893_v16 = vld [vmem:[#allocation12 + $0x140] sm:$0xff]  }
 0x85d   :  { %v4017_v18 = vrot.slane %v4010_v23, %v6486_v20  ;;  %v5894_v23 = vld [vmem:[#allocation12 + $0x100] sm:$0xff]  }
 0x85e   :  { %v3965_v3 = vrot.slane %v3933_v62, %v6383_v26  ;;  %v3969_v21 = vrot.slane %v3933_v62, %v6390_v32 }
 0x85f   :  { %v4028_v45 = vrot.slane %v4017_v18, 7 }
 0x860   :  { %v3984_v25 = vmul.f32 %v3965_v3, %v7254_v34  ;;  %v3985_v47 = vmul.f32 %v3969_v21, %v3837_v27  ;;  %v4069_v19 = vrot.slane %v3969_v21, %v6383_v26  ;;  %v4065_v5 = vrot.slane %v3965_v3, %v6383_v26 }
 0x861   :  { %v4036_v37 = vsub.f32 %v7192_v42, %v4028_v45 }
 0x862   :  { %v4018_v9 = vcombine.low %v3984_v25, %v3985_v47  ;;  %v4077_v56 = vmul.f32 %v4069_v19, %v7236_v6  ;;  %v4076_v39 = vmul.f32 %v4065_v5, %v7214_v55  ;;  %v5880_v6 = vld [vmem:[#allocation12 + $0x138] sm:$0xff]   ;;  %v5881_v55 = vld [vmem:[#allocation12 + $0x170] sm:$0xff]  }
 0x863   :  { %v4105_v36 = vrot.slane %v4036_v37, %v6393_v38  ;;  %v4101_v54 = vrot.slane %v4036_v37, %v6387_v31  ;;  %5570 = vmatpush3.bf16.msra.mxu0 %v5880_v6 }
 0x864   :  { %v4025_v1 = vrot.slane %v4018_v9, %v6486_v20  ;;  %5571 = vmatprep.subr.bf16.mxu0 %v5881_v55 }
 0x865   :  { %v4145_v27 = vrot.slane %v4105_v36, %v6387_v31  ;;  %v4141_v7 = vrot.slane %v4101_v54, %v6387_v31 }
 0x866   :  { %v4029_v33 = vrot.slane %v4025_v1, 7 }
 0x867   :  { %v4159_v61 = vadd.f32 %v4145_v27, %v4075_v53  ;;  %v4158_v46 = vadd.f32 %v4141_v7, %v4074_v40  ;;  %5572 = vmatpush3.bf16.msra.mxu0 %v5882_v10 }
 0x868   :  { %v4037_v34 = vsub.f32 %v7192_v42, %v4029_v33  ;;  %5573 = vmatprep.subr.bf16.mxu0 %v5883_v30 }
 0x869   :  { %v4167_v44 = vmax.f32 %v4159_v61, 0.0  ;;  %v4166_v57 = vmax.f32 %v4158_v46, 0.0 }
 0x86a   :  { %v4113_v51 = vrot.slane %v4037_v34, %v6393_v38  ;;  %v4109_v14 = vrot.slane %v4037_v34, %v6387_v31 }
 0x86b   :  { %5574 = vmatpush3.bf16.msra.mxu0 %v5884_v4 }
 0x86c   :  { %v4153_v48 = vrot.slane %v4113_v51, %v6387_v31  ;;  %v4149_v42 = vrot.slane %v4109_v14, %v6387_v31  ;;  %5575 = vmatprep.subr.bf16.mxu0 %v5885_v35 }
 0x86e   :  { %v4161_v60 = vadd.f32 %v4153_v48, %v4077_v56  ;;  %v4160_v2 = vadd.f32 %v4149_v42, %v4076_v39 }
 0x86f   :  { %5576 = vmatpush3.bf16.msra.mxu0 %v5886_v17 }
 0x870   :  { %v4169_v41 = vmax.f32 %v4161_v60, 0.0  ;;  %v4168_v52 = vmax.f32 %v4160_v2, 0.0  ;;  %5577 = vmatprep.subr.bf16.mxu0 %v5887_v49 }
 0x872   :  { %v4206_v58 = vpack.c.bf16 %v4169_v41, %v4167_v44  ;;  %v4205_v13 = vpack.c.bf16 %v4168_v52, %v4166_v57 }
 0x873   :  { %5578 = vmatpush3.bf16.msra.mxu0 %v5888_v29 }
 0x874   :  { %4409 = vmatprep.mubr.bf16.mxu1 %v4206_v58  ;;  %5579 = vmatprep.subr.bf16.mxu0 %v5889_v0 }
 0x875   :  { %4410 = vmatmul.mubr.bf16.gmra.mxu1 %v4205_v13 }
 0x877   :  { %5580 = vmatpush3.bf16.msra.mxu0 %v5890_v63 }
 0x878   :  { %5581 = vmatprep.subr.bf16.mxu0 %v5891_v15 }
 0x87b   :  { %5582 = vmatpush3.bf16.msra.mxu0 %v5892_v12 }
 0x87c   :  { %5583 = vmatprep.subr.bf16.mxu0 %v5893_v16 }
 0x87f   :  { %5584 = vmatpush3.bf16.msra.mxu0 %v5894_v23 }
 0x90c   :  { %v7310_v62 = vpop.f32.mrf.mxu1 }
 0x90d   :  { %v4422_v18 = vrot.slane %v7310_v62, 4  ;;  %v4470_v3 = vmul.f32 %v7310_v62, %v7310_v62 }
 0x90e   :  { %v7315_v21 = vpop.f32.mrf.mxu1 }
 0x90f   :  { %v4423_v45 = vadd.f32 %v4422_v18, %v7310_v62  ;;  %v4478_v25 = vrot.slane %v4470_v3, 4  ;;  %v4428_v47 = vrot.slane %v7315_v21, 4  ;;  %v4471_v37 = vmul.f32 %v7315_v21, %v7315_v21 }
 0x910   :  { %v7321_v9 = vpop.f32.mrf.mxu1 }
 0x911   :  { %v4424_v1 = vrot.slane %v4423_v45, 2  ;;  %v4479_v36 = vadd.f32 %v4478_v25, %v4470_v3  ;;  %v4429_v54 = vadd.f32 %v4428_v47, %v7315_v21  ;;  %v4484_v59 = vrot.slane %v4471_v37, 4 }
 0x912   :  { %v4434_v33 = vrot.slane %v7321_v9, 4  ;;  %v4472_v11 = vmul.f32 %v7321_v9, %v7321_v9  ;;  %v7327_v19 = vpop.f32.mrf.mxu1 }
 0x913   :  { %v4425_v5 = vadd.f32 %v4424_v1, %v4423_v45  ;;  %v4480_v34 = vrot.slane %v4479_v36, 2  ;;  %v4430_v27 = vrot.slane %v4429_v54, 2  ;;  %v4485_v7 = vadd.f32 %v4484_v59, %v4471_v37 }
 0x914   :  { %v4435_v53 = vadd.f32 %v4434_v33, %v7321_v9  ;;  %v4490_v51 = vrot.slane %v4472_v11, 4  ;;  %v4440_v40 = vrot.slane %v7327_v19, 4  ;;  %v4473_v14 = vmul.f32 %v7327_v19, %v7327_v19 }
 0x915   :  { %v4426_v56 = vrot.slane %v4425_v5, 1  ;;  %v4481_v39 = vadd.f32 %v4480_v34, %v4479_v36  ;;  %v4431_v48 = vadd.f32 %v4430_v27, %v4429_v54  ;;  %v4486_v61 = vrot.slane %v4485_v7, 2 }
 0x916   :  { %v4436_v42 = vrot.slane %v4435_v53, 2  ;;  %v4491_v46 = vadd.f32 %v4490_v51, %v4472_v11  ;;  %v4441_v60 = vadd.f32 %v4440_v40, %v7327_v19  ;;  %v4496_v2 = vrot.slane %v4473_v14, 4 }
 0x917   :  { %v4427_v44 = vadd.f32 %v4426_v56, %v4425_v5  ;;  %v4482_v41 = vrot.slane %v4481_v39, 1  ;;  %v4432_v57 = vrot.slane %v4431_v48, 1  ;;  %v4487_v52 = vadd.f32 %v4486_v61, %v4485_v7 }
 0x918   :  { %v4437_v58 = vadd.f32 %v4436_v42, %v4435_v53  ;;  %v4492_v13 = vrot.slane %v4491_v46, 2  ;;  %v4442_v50 = vrot.slane %v4441_v60, 2  ;;  %v4497_v6 = vadd.f32 %v4496_v2, %v4473_v14 }
 0x919   :  { %v4483_v55 = vadd.f32 %v4482_v41, %v4481_v39  ;;  %v7334_v10 = vmul.f32 0.125, %v4427_v44  ;;  %v4433_v30 = vadd.f32 %v4432_v57, %v4431_v48  ;;  %v4488_v4 = vrot.slane %v4487_v52, 1  ;;  %v7342_v41 = vld [vmem:[#allocation10 + $0x8] sm:$0xf] }
 0x91a   :  { %v4438_v35 = vrot.slane %v4437_v58, 1  ;;  %v4493_v17 = vadd.f32 %v4492_v13, %v4491_v46  ;;  %v4443_v49 = vadd.f32 %v4442_v50, %v4441_v60  ;;  %v4498_v29 = vrot.slane %v4497_v6, 2 }
 0x91b   :  { %v4534_v0 = vmul.f32 0.125, %v4483_v55  ;;  %v4542_v63 = vmul.f32 %v7334_v10, %v7334_v10  ;;  %v4489_v15 = vadd.f32 %v4488_v4, %v4487_v52  ;;  %v4527_v12 = vmul.f32 0.125, %v4433_v30 }
 0x91c   :  { %v4439_v16 = vadd.f32 %v4438_v35, %v4437_v58  ;;  %v4494_v23 = vrot.slane %v4493_v17, 1  ;;  %v4444_v18 = vrot.slane %v4443_v49, 1  ;;  %v4499_v3 = vadd.f32 %v4498_v29, %v4497_v6 }
 0x91d   :  { %v4550_v45 = vsub.f32 %v4534_v0, %v4542_v63  ;;  %v4535_v25 = vmul.f32 0.125, %v4489_v15  ;;  %v4543_v47 = vmul.f32 %v4527_v12, %v4527_v12 }
 0x91e   :  { %v4495_v37 = vadd.f32 %v4494_v23, %v4493_v17  ;;  %v7338_v1 = vmul.f32 0.125, %v4439_v16  ;;  %v4445_v36 = vadd.f32 %v4444_v18, %v4443_v49  ;;  %v4500_v54 = vrot.slane %v4499_v3, 1 }
 0x91f   :  { %v4558_v59 = vmax.f32 %v4550_v45, 0.0  ;;  %v4551_v33 = vsub.f32 %v4535_v25, %v4543_v47 }
 0x920   :  { %v4536_v11 = vmul.f32 0.125, %v4495_v37  ;;  %v4544_v5 = vmul.f32 %v7338_v1, %v7338_v1  ;;  %v4501_v34 = vadd.f32 %v4500_v54, %v4499_v3  ;;  %v4529_v27 = vmul.f32 0.125, %v4445_v36 }
 0x921   :  { %v4566_v7 = vadd.f32 1e-05, %v4558_v59  ;;  %v4559_v53 = vmax.f32 %v4551_v33, 0.0 }
 0x922   :  { %v4552_v51 = vsub.f32 %v4536_v11, %v4544_v5  ;;  %v4537_v40 = vmul.f32 0.125, %v4501_v34  ;;  %v4545_v14 = vmul.f32 %v4529_v27, %v4529_v27 }
 0x923   :  { %v4567_v56 = vadd.f32 1e-05, %v4559_v53  ;;  %5991 = vrsqrt.f32 %v4566_v7 }
 0x924   :  { %v4560_v39 = vmax.f32 %v4552_v51, 0.0  ;;  %v4553_v48 = vsub.f32 %v4537_v40, %v4545_v14 }
 0x925   :  { %5993 = vrsqrt.f32 %v4567_v56 }
 0x926   :  { %v4568_v61 = vadd.f32 1e-05, %v4560_v39  ;;  %v4561_v42 = vmax.f32 %v4553_v48, 0.0 }
 0x928   :  { %v4569_v46 = vadd.f32 1e-05, %v4561_v42  ;;  %5995 = vrsqrt.f32 %v4568_v61 }
 0x92a   :  { %5997 = vrsqrt.f32 %v4569_v46 }
 0x930   :  { %v5992_v60 = vpop.eup %5991 }
 0x932   :  { %v5994_v2 = vpop.eup %5993 }
 0x933   :  { %v4590_v44 = vcombine.low %v5992_v60, %v5994_v2 }
 0x935   :  { %v4597_v57 = vrot.slane %v4590_v44, %v6486_v20  ;;  %v7345_v52 = vpop.f32.mrf.mxu1  ;;  %v5996_v58 = vpop.eup %5995 }
 0x936   :  { %v4446_v13 = vrot.slane %v7345_v52, 4  ;;  %v4474_v50 = vmul.f32 %v7345_v52, %v7345_v52 }
 0x937   :  { %v5998_v6 = vpop.eup %5997  ;;  %v4626_v55 = vmul.f32 %v4597_v57, %v7342_v41  ;;  %v7351_v30 = vpop.f32.mrf.mxu1 }
 0x938   :  { %v4598_v4 = vcombine.low %v5996_v58, %v5998_v6  ;;  %v4447_v35 = vadd.f32 %v4446_v13, %v7345_v52  ;;  %v4502_v17 = vrot.slane %v4474_v50, 4  ;;  %v4452_v49 = vrot.slane %v7351_v30, 4 }
 0x939   :  { %v7356_v29 = vrot.slane %v4626_v55, %v6383_v26  ;;  %v4641_v0 = vrot.slane %v4626_v55, %v6390_v32  ;;  %v4475_v63 = vmul.f32 %v7351_v30, %v7351_v30  ;;  %v7363_v3 = vpop.f32.mrf.mxu1 }
 0x93a   :  { %v4605_v15 = vrot.slane %v4598_v4, %v6486_v20  ;;  %v4448_v16 = vrot.slane %v4447_v35, 2  ;;  %v4503_v23 = vadd.f32 %v4502_v17, %v4474_v50  ;;  %v4453_v18 = vadd.f32 %v4452_v49, %v7351_v30 }
 0x93b   :  { %v4674_v45 = vmul.f32 %v7356_v29, %v7334_v10  ;;  %v4675_v25 = vmul.f32 %v4641_v0, %v4527_v12  ;;  %v4741_v47 = vrot.slane %v4641_v0, %v6383_v26  ;;  %v4737_v11 = vrot.slane %v7356_v29, %v6383_v26  ;;  %v7386_v57 = vpop.f32.mrf.mxu1 }
 0x93c   :  { %v4627_v37 = vmul.f32 %v4605_v15, %v7342_v41  ;;  %v4449_v36 = vadd.f32 %v4448_v16, %v4447_v35  ;;  %v4504_v54 = vrot.slane %v4503_v23, 2  ;;  %v4454_v59 = vrot.slane %v4453_v18, 2 }
 0x93d   :  { %v4690_v33 = vcombine.low %v4674_v45, %v4675_v25  ;;  %v4508_v5 = vrot.slane %v4475_v63, 4  ;;  %v4458_v34 = vrot.slane %v7363_v3, 4  ;;  %v4476_v56 = vmul.f32 %v7363_v3, %v7363_v3 }
 0x93e   :  { %v7373_v7 = vrot.slane %v4627_v37, %v6383_v26  ;;  %v4649_v10 = vrot.slane %v4627_v37, %v6390_v32  ;;  %v4450_v12 = vrot.slane %v4449_v36, 1  ;;  %v4505_v53 = vadd.f32 %v4504_v54, %v4503_v23 }
 0x93f   :  { %v4455_v51 = vadd.f32 %v4454_v59, %v4453_v18  ;;  %v4509_v40 = vadd.f32 %v4508_v5, %v4475_v63  ;;  %v4459_v14 = vadd.f32 %v4458_v34, %v7363_v3  ;;  %v7380_v39 = vmul.f32 %v4741_v47, %v7315_v21 }
 0x940   :  { %v4676_v48 = vmul.f32 %v7373_v7, %v7338_v1  ;;  %v4677_v61 = vmul.f32 %v4649_v10, %v4529_v27  ;;  %v4745_v42 = vrot.slane %v7373_v7, %v6383_v26  ;;  %v4451_v46 = vadd.f32 %v4450_v12, %v4449_v36 }
 0x941   :  { %v4506_v60 = vrot.slane %v4505_v53, 1  ;;  %v4456_v2 = vrot.slane %v4455_v51, 1  ;;  %v4510_v44 = vrot.slane %v4509_v40, 2  ;;  %v4749_v13 = vrot.slane %v4649_v10, %v6383_v26 }
 0x942   :  { %v4698_v58 = vcombine.low %v4676_v48, %v4677_v61  ;;  %v4460_v50 = vrot.slane %v4459_v14, 2  ;;  %v4514_v6 = vrot.slane %v4476_v56, 4  ;;  %v7389_v55 = vmul.f32 0.125, %v4451_v46 }
 0x943   :  { %v4507_v21 = vadd.f32 %v4506_v60, %v4505_v53  ;;  %v4457_v4 = vadd.f32 %v4456_v2, %v4455_v51  ;;  %v4511_v1 = vadd.f32 %v4510_v44, %v4509_v40  ;;  %v4464_v17 = vrot.slane %v7386_v57, 4 }
 0x944   :  { %v4461_v27 = vadd.f32 %v4460_v50, %v4459_v14  ;;  %v4515_v35 = vadd.f32 %v4514_v6, %v4476_v56  ;;  %v4477_v49 = vmul.f32 %v7386_v57, %v7386_v57  ;;  %v4546_v63 = vmul.f32 %v7389_v55, %v7389_v55 }
 0x945   :  { %v4538_v0 = vmul.f32 0.125, %v4507_v21  ;;  %v4512_v15 = vrot.slane %v4511_v1, 1  ;;  %v7396_v16 = vmul.f32 0.125, %v4457_v4  ;;  %v4465_v45 = vadd.f32 %v4464_v17, %v7386_v57 }
 0x946   :  { %v4462_v23 = vrot.slane %v4461_v27, 1  ;;  %v4516_v18 = vrot.slane %v4515_v35, 2  ;;  %v4520_v25 = vrot.slane %v4477_v49, 4  ;;  %v4697_v54 = vrot.slane %v4690_v33, %v6486_v20 }
 0x947   :  { %v4554_v47 = vsub.f32 %v4538_v0, %v4546_v63  ;;  %v4513_v37 = vadd.f32 %v4512_v15, %v4511_v1  ;;  %v4547_v36 = vmul.f32 %v7396_v16, %v7396_v16  ;;  %v4466_v34 = vrot.slane %v4465_v45, 2 }
 0x948   :  { %v4463_v59 = vadd.f32 %v4462_v23, %v4461_v27  ;;  %v4517_v5 = vadd.f32 %v4516_v18, %v4515_v35  ;;  %v4521_v10 = vadd.f32 %v4520_v25, %v4477_v49  ;;  %v4705_v51 = vrot.slane %v4698_v58, %v6486_v20 }
 0x949   :  { %v4562_v12 = vmax.f32 %v4554_v47, 0.0  ;;  %v4539_v53 = vmul.f32 0.125, %v4513_v37  ;;  %v4722_v40 = vrot.slane %v4697_v54, 7  ;;  %v4467_v48 = vadd.f32 %v4466_v34, %v4465_v45 }
 0x94a   :  { %v4518_v14 = vrot.slane %v4517_v5, 1  ;;  %v7403_v56 = vmul.f32 0.125, %v4463_v59  ;;  %v4522_v61 = vrot.slane %v4521_v10, 2  ;;  %v4723_v2 = vrot.slane %v4705_v51, 7 }
 0x94b   :  { %v4570_v46 = vadd.f32 1e-05, %v4562_v12  ;;  %v4555_v60 = vsub.f32 %v4539_v53, %v4547_v36  ;;  %v4730_v44 = vsub.f32 %v7342_v41, %v4722_v40  ;;  %v4468_v6 = vrot.slane %v4467_v48, 1 }
 0x94c   :  { %v4519_v33 = vadd.f32 %v4518_v14, %v4517_v5  ;;  %v4548_v50 = vmul.f32 %v7403_v56, %v7403_v56  ;;  %v4523_v21 = vadd.f32 %v4522_v61, %v4521_v10  ;;  %v4769_v4 = vmul.f32 %v4749_v13, %v7327_v19 }
 0x94d   :  { %v4563_v58 = vmax.f32 %v4555_v60, 0.0  ;;  %v4731_v1 = vsub.f32 %v7342_v41, %v4723_v2  ;;  %v4781_v27 = vrot.slane %v4730_v44, %v6387_v31  ;;  %v4469_v17 = vadd.f32 %v4468_v6, %v4467_v48 }
 0x94e   :  { %v4540_v35 = vmul.f32 0.125, %v4519_v33  ;;  %v4524_v49 = vrot.slane %v4523_v21, 1  ;;  %v4785_v0 = vrot.slane %v4730_v44, %v6393_v38  ;;  %5999 = vrsqrt.f32 %v4570_v46 }
 0x94f   :  { %v4571_v63 = vadd.f32 1e-05, %v4563_v58  ;;  %v4789_v15 = vrot.slane %v4731_v1, %v6387_v31  ;;  %v4793_v23 = vrot.slane %v4731_v1, %v6393_v38  ;;  %v4533_v25 = vmul.f32 0.125, %v4469_v17 }
 0x950   :  { %v4556_v18 = vsub.f32 %v4540_v35, %v4548_v50  ;;  %v4525_v45 = vadd.f32 %v4524_v49, %v4523_v21  ;;  %v4825_v19 = vrot.slane %v4785_v0, %v6387_v31  ;;  %v4766_v47 = vmul.f32 %v4737_v11, %v7310_v62 }
 0x951   :  { %6001 = vrsqrt.f32 %v4571_v63  ;;  %v4833_v13 = vrot.slane %v4793_v23, %v6387_v31  ;;  %v4821_v37 = vrot.slane %v4781_v27, %v6387_v31  ;;  %v4549_v59 = vmul.f32 %v4533_v25, %v4533_v25 }
 0x952   :  { %v4564_v36 = vmax.f32 %v4556_v18, 0.0  ;;  %v4541_v54 = vmul.f32 0.125, %v4525_v45  ;;  %v4851_v5 = vadd.f32 %v4825_v19, %v7380_v39  ;;  %v4768_v10 = vmul.f32 %v4745_v42, %v7321_v9 }
 0x953   :  { %v4853_v34 = vadd.f32 %v4833_v13, %v4769_v4  ;;  %v4829_v12 = vrot.slane %v4789_v15, %v6387_v31  ;;  %v4850_v53 = vadd.f32 %v4821_v37, %v4766_v47 }
 0x954   :  { %v4557_v51 = vsub.f32 %v4541_v54, %v4549_v59  ;;  %v4572_v40 = vadd.f32 1e-05, %v4564_v36  ;;  %v4859_v29 = vmax.f32 %v4851_v5, 0.0 }
 0x955   :  { %v4861_v62 = vmax.f32 %v4853_v34, 0.0  ;;  %v4852_v11 = vadd.f32 %v4829_v12, %v4768_v10  ;;  %v4858_v61 = vmax.f32 %v4850_v53, 0.0 }
 0x956   :  { %v4565_v14 = vmax.f32 %v4557_v51, 0.0  ;;  %6003 = vrsqrt.f32 %v4572_v40 }
 0x957   :  { %v4900_v48 = vpack.c.bf16 %v4861_v62, %v4859_v29  ;;  %v4860_v46 = vmax.f32 %v4852_v11, 0.0 }
 0x958   :  { %v4573_v60 = vadd.f32 1e-05, %v4565_v14 }
 0x959   :  { %5031 = vmatprep.mubr.bf16.mxu0 %v4900_v48  ;;  %v4899_v39 = vpack.c.bf16 %v4860_v46, %v4858_v61 }
 0x95a   :  { %6005 = vrsqrt.f32 %v4573_v60 }
 0x95b   :  { %5032 = vmatmul.mubr.bf16.vlgmr.msra.gmra.mxu0 %v4899_v39  ;;  %v6000_v7 = vpop.eup %5999 }
 0x95e   :  { %v6002_v9 = vpop.eup %6001 }
 0x95f   :  { %v4606_v42 = vcombine.low %v6000_v7, %v6002_v9 }
 0x961   :  { %v4613_v2 = vrot.slane %v4606_v42, %v6486_v20 }
 0x963   :  { %v4628_v44 = vmul.f32 %v4613_v2, %v7342_v41  ;;  %v6004_v6 = vpop.eup %6003 }
 0x965   :  { %v4653_v33 = vrot.slane %v4628_v44, %v6383_v26  ;;  %v4657_v50 = vrot.slane %v4628_v44, %v6390_v32 }
 0x967   :  { %v6006_v21 = vpop.eup %6005  ;;  %v4678_v4 = vmul.f32 %v4653_v33, %v7389_v55  ;;  %v4679_v58 = vmul.f32 %v4657_v50, %v7396_v16  ;;  %v4757_v47 = vrot.slane %v4657_v50, %v6383_v26  ;;  %v4753_v36 = vrot.slane %v4653_v33, %v6383_v26 }
 0x968   :  { %v4614_v1 = vcombine.low %v6004_v6, %v6006_v21 }
 0x969   :  { %v4706_v27 = vcombine.low %v4678_v4, %v4679_v58  ;;  %v4770_v10 = vmul.f32 %v4753_v36, %v7345_v52 }
 0x96a   :  { %v4621_v35 = vrot.slane %v4614_v1, %v6486_v20 }
 0x96b   :  { %v4713_v17 = vrot.slane %v4706_v27, %v6486_v20 }
 0x96c   :  { %v4629_v49 = vmul.f32 %v4621_v35, %v7342_v41 }
 0x96d   :  { %v4724_v0 = vrot.slane %v4713_v17, 7 }
 0x96e   :  { %v4661_v63 = vrot.slane %v4629_v49, %v6383_v26  ;;  %v4665_v15 = vrot.slane %v4629_v49, %v6390_v32 }
 0x96f   :  { %v4732_v55 = vsub.f32 %v7342_v41, %v4724_v0 }
 0x970   :  { %v4680_v23 = vmul.f32 %v4661_v63, %v7403_v56  ;;  %v4681_v18 = vmul.f32 %v4665_v15, %v4533_v25  ;;  %v4765_v54 = vrot.slane %v4665_v15, %v6383_v26  ;;  %v4761_v59 = vrot.slane %v4661_v63, %v6383_v26 }
 0x971   :  { %v4801_v19 = vrot.slane %v4732_v55, %v6393_v38  ;;  %v4797_v13 = vrot.slane %v4732_v55, %v6387_v31 }
 0x972   :  { %v4714_v45 = vcombine.low %v4680_v23, %v4681_v18  ;;  %v4773_v53 = vmul.f32 %v4765_v54, %v7386_v57  ;;  %v4772_v51 = vmul.f32 %v4761_v59, %v7363_v3 }
 0x973   :  { %v4841_v25 = vrot.slane %v4801_v19, %v6387_v31  ;;  %v4837_v5 = vrot.slane %v4797_v13, %v6387_v31 }
 0x974   :  { %v4721_v16 = vrot.slane %v4714_v45, %v6486_v20  ;;  %v4771_v20 = vmul.f32 %v4757_v47, %v7351_v30 }
 0x975   :  { %v4854_v62 = vadd.f32 %v4837_v5, %v4770_v10 }
 0x976   :  { %v4725_v37 = vrot.slane %v4721_v16, 7  ;;  %v4855_v29 = vadd.f32 %v4841_v25, %v4771_v20 }
 0x977   :  { %v4862_v61 = vmax.f32 %v4854_v62, 0.0 }
 0x978   :  { %v4733_v56 = vsub.f32 %v7342_v41, %v4725_v37  ;;  %v4863_v48 = vmax.f32 %v4855_v29, 0.0  ;;  %v7464_v29 = vld [vmem:[#allocation13 + $0x4] sm:$0x3] }
 0x97a   :  { %v4809_v34 = vrot.slane %v4733_v56, %v6393_v38  ;;  %v4805_v12 = vrot.slane %v4733_v56, %v6387_v31 }
 0x97c   :  { %v4849_v40 = vrot.slane %v4809_v34, %v6387_v31  ;;  %v4845_v41 = vrot.slane %v4805_v12, %v6387_v31 }
 0x97e   :  { %v4857_v11 = vadd.f32 %v4849_v40, %v4773_v53  ;;  %v4856_v14 = vadd.f32 %v4845_v41, %v4772_v51 }
 0x980   :  { %v4865_v30 = vmax.f32 %v4857_v11, 0.0  ;;  %v4864_v46 = vmax.f32 %v4856_v14, 0.0 }
 0x982   :  { %v4902_v60 = vpack.c.bf16 %v4865_v30, %v4863_v48  ;;  %v4901_v52 = vpack.c.bf16 %v4864_v46, %v4862_v61 }
 0x984   :  { %5039 = vmatprep.mubr.bf16.mxu0 %v4902_v60 }
 0x985   :  { %5040 = vmatmul.mubr.bf16.gmra.mxu0 %v4901_v52 }
 0xa1b   :  { %v5585_v39 = vpop.f32.mrf.mxu0 }
 0xa1d   :  { %v5586_v57 = vpop.f32.mrf.mxu0 }
 0xa1e   :  { %v5587_v7 = vadd.f32 %v5586_v57, %v5585_v39 }
 0xa1f   :  { %v5588_v3 = vpop.f32.mrf.mxu0 }
 0xa20   :  { %v5050_v9 = vrot.slane %v5587_v7, 4  ;;  %v5074_v42 = vmul.f32 %v5587_v7, %v5587_v7 }
 0xa21   :  { %v5589_v2 = vpop.f32.mrf.mxu0 }
 0xa22   :  { %v5051_v44 = vadd.f32 %v5587_v7, %v5050_v9  ;;  %v5078_v33 = vrot.slane %v5074_v42, 4  ;;  %v7458_v50 = vadd.f32 %v5589_v2, %v5588_v3 }
 0xa24   :  { %v5052_v6 = vrot.slane %v5051_v44, 2  ;;  %v5079_v21 = vadd.f32 %v5078_v33, %v5074_v42  ;;  %v5056_v4 = vrot.slane %v7458_v50, 4  ;;  %v5075_v58 = vmul.f32 %v7458_v50, %v7458_v50  ;;  %v5202_v33 = vld [vmem:[#allocation15] sm:$0xf] }
 0xa26   :  { %v5053_v1 = vadd.f32 %v5052_v6, %v5051_v44  ;;  %v5080_v27 = vrot.slane %v5079_v21, 2  ;;  %v5057_v35 = vadd.f32 %v7458_v50, %v5056_v4  ;;  %v5084_v17 = vrot.slane %v5075_v58, 4 }
 0xa28   :  { %v5054_v49 = vrot.slane %v5053_v1, 1  ;;  %v5081_v0 = vadd.f32 %v5080_v27, %v5079_v21  ;;  %v5058_v63 = vrot.slane %v5057_v35, 2  ;;  %v5085_v15 = vadd.f32 %v5084_v17, %v5075_v58 }
 0xa2a   :  { %v5055_v23 = vadd.f32 %v5054_v49, %v5053_v1  ;;  %v5082_v18 = vrot.slane %v5081_v0, 1  ;;  %v5059_v55 = vadd.f32 %v5058_v63, %v5057_v35  ;;  %v5086_v45 = vrot.slane %v5085_v15, 2 }
 0xa2c   :  { %v5083_v16 = vadd.f32 %v5082_v18, %v5081_v0  ;;  %v5102_v19 = vmul.f32 0.125, %v5055_v23  ;;  %v5060_v13 = vrot.slane %v5059_v55, 1  ;;  %v5087_v47 = vadd.f32 %v5086_v45, %v5085_v15 }
 0xa2d   :  { %v7488_v23 = vrot.slane %v5202_v33, %v6383_v26 }
 0xa2e   :  { %v5106_v37 = vmul.f32 0.125, %v5083_v16  ;;  %v5110_v36 = vmul.f32 %v5102_v19, %v5102_v19  ;;  %v5061_v54 = vadd.f32 %v5060_v13, %v5059_v55  ;;  %v5088_v59 = vrot.slane %v5087_v47, 1 }
 0xa30   :  { %v5114_v56 = vsub.f32 %v5106_v37, %v5110_v36  ;;  %v5089_v25 = vadd.f32 %v5088_v59, %v5087_v47  ;;  %v5103_v5 = vmul.f32 0.125, %v5061_v54 }
 0xa32   :  { %v5118_v20 = vmax.f32 %v5114_v56, 0.0  ;;  %v5107_v34 = vmul.f32 0.125, %v5089_v25  ;;  %v5111_v10 = vmul.f32 %v5103_v5, %v5103_v5 }
 0xa34   :  { %v5122_v12 = vadd.f32 1e-05, %v5118_v20  ;;  %v5115_v53 = vsub.f32 %v5107_v34, %v5111_v10 }
 0xa36   :  { %6007 = vrsqrt.f32 %v5122_v12  ;;  %v5119_v51 = vmax.f32 %v5115_v53, 0.0 }
 0xa38   :  { %v5123_v40 = vadd.f32 1e-05, %v5119_v51 }
 0xa3a   :  { %6009 = vrsqrt.f32 %v5123_v40 }
 0xa43   :  { %v6008_v41 = vpop.eup %6007 }
 0xa44   :  { %v5130_v62 = vmul.f32 %v6008_v41, %v7464_v29 }
 0xa45   :  { %v5591_v11 = vpop.f32.mrf.mxu0 }
 0xa46   :  { %v5134_v14 = vmul.f32 %v5130_v62, %v5102_v19  ;;  %v5157_v30 = vrot.slane %v5130_v62, %v6383_v26 }
 0xa47   :  { %v6010_v48 = vpop.eup %6009  ;;  %v5592_v61 = vpop.f32.mrf.mxu0 }
 0xa48   :  { %v5142_v46 = vrot.slane %v5134_v14, 7  ;;  %v5131_v60 = vmul.f32 %v6010_v48, %v7464_v29  ;;  %v7469_v52 = vadd.f32 %v5592_v61, %v5591_v11  ;;  %v5170_v42 = vmul.f32 %v5587_v7, %v5157_v30 }
 0xa49   :  { %v5594_v39 = vpop.f32.mrf.mxu0  ;;  %v7482_v7 = vrot.slane %v5202_v33, %v6387_v31  ;;  %v5271_v30 = vrot.slane %v5202_v33, %v6393_v38 }
 0xa4a   :  { %v5150_v57 = vsub.f32 %v7464_v29, %v5142_v46  ;;  %v5135_v3 = vmul.f32 %v5131_v60, %v5103_v5  ;;  %v5062_v9 = vrot.slane %v7469_v52, 4  ;;  %v5076_v2 = vmul.f32 %v7469_v52, %v7469_v52 }
 0xa4b   :  { %v5595_v44 = vpop.f32.mrf.mxu0  ;;  %v5161_v4 = vrot.slane %v5131_v60, %v6383_v26  ;;  %v7495_v5 = vrot.slane %v5202_v33, %v6390_v32 }
 0xa4c   :  { %v5177_v6 = vrot.slane %v5150_v57, %v6387_v31  ;;  %v5143_v21 = vrot.slane %v5135_v3, 7  ;;  %v5063_v58 = vadd.f32 %v7469_v52, %v5062_v9  ;;  %v5090_v1 = vrot.slane %v5076_v2, 4 }
 0xa4d   :  { %v7478_v27 = vadd.f32 %v5595_v44, %v5594_v39  ;;  %v5171_v55 = vmul.f32 %v7458_v50, %v5161_v4 }
 0xa4e   :  { %v5190_v35 = vadd.f32 %v5177_v6, %v5170_v42  ;;  %v5151_v17 = vsub.f32 %v7464_v29, %v5143_v21  ;;  %v5064_v49 = vrot.slane %v5063_v58, 2  ;;  %v5091_v0 = vadd.f32 %v5090_v1, %v5076_v2 }
 0xa4f   :  { %v5068_v63 = vrot.slane %v7478_v27, 4  ;;  %v5077_v15 = vmul.f32 %v7478_v27, %v7478_v27 }
 0xa50   :  { %v5194_v18 = vmax.f32 %v5190_v35, 0.0  ;;  %v5181_v45 = vrot.slane %v5151_v17, %v6387_v31  ;;  %v5065_v16 = vadd.f32 %v5064_v49, %v5063_v58  ;;  %v5092_v19 = vrot.slane %v5091_v0, 2 }
 0xa51   :  { %v5069_v13 = vadd.f32 %v7478_v27, %v5068_v63  ;;  %v5096_v47 = vrot.slane %v5077_v15, 4 }
 0xa52   :  { %v5191_v37 = vadd.f32 %v5181_v45, %v5171_v55  ;;  %v5066_v36 = vrot.slane %v5065_v16, 1  ;;  %v5198_v54 = vadd.f32 %v5194_v18, %v7126_v28  ;;  %v5093_v59 = vadd.f32 %v5092_v19, %v5091_v0 }
 0xa53   :  { %v5070_v56 = vrot.slane %v5069_v13, 2  ;;  %v5097_v25 = vadd.f32 %v5096_v47, %v5077_v15 }
 0xa54   :  { %v5195_v20 = vmax.f32 %v5191_v37, 0.0  ;;  %v5067_v34 = vadd.f32 %v5066_v36, %v5065_v16  ;;  %v5230_v50 = vmul.f32 %v7482_v7, %v5198_v54  ;;  %v5209_v10 = vmul.f32 %v7488_v23, %v5198_v54 }
 0xa55   :  { %v5094_v12 = vrot.slane %v5093_v59, 1  ;;  %v5071_v53 = vadd.f32 %v5070_v56, %v5069_v13  ;;  %v5098_v51 = vrot.slane %v5097_v25, 2  ;;  %v5251_v32 = vmul.f32 %v7495_v5, %v5198_v54 }
 0xa56   :  { %v5104_v40 = vmul.f32 0.125, %v5067_v34  ;;  %5234 = vadd.xlane.f32.xlu1 %v5230_v50  ;;  %5213 = vadd.xlane.f32.xlu0 %v5209_v10  ;;  %v5199_v28 = vadd.f32 %v5195_v20, %v7129_v8  ;;  %v5272_v9 = vmul.f32 %v5271_v30, %v5198_v54 }
 0xa57   :  { %v5095_v41 = vadd.f32 %v5094_v12, %v5093_v59  ;;  %v5072_v62 = vrot.slane %v5071_v53, 1  ;;  %v5099_v11 = vadd.f32 %v5098_v51, %v5097_v25  ;;  %v5204_v12 = vand.u32 127, %v199_v24 }
 0xa58   :  { %v5112_v14 = vmul.f32 %v5104_v40, %v5104_v40  ;;  %v5231_v48 = vmul.f32 %v7482_v7, %v5199_v28  ;;  %v5252_v8 = vmul.f32 %v7495_v5, %v5199_v28  ;;  %v5210_v38 = vmul.f32 %v7488_v23, %v5199_v28 }
 0xa59   :  { %v5108_v61 = vmul.f32 0.125, %v5095_v41  ;;  %v5073_v46 = vadd.f32 %v5072_v62, %v5071_v53  ;;  %v5100_v60 = vrot.slane %v5099_v11, 1  ;;  %v5273_v33 = vmul.f32 %v5271_v30, %v5199_v28  ;;  %v5512_v28 = vld [vmem:[#allocation16] ss:$0 sm:$0xff] }
 0xa5a   :  { %5255 = vadd.xlane.f32.xlu1 %v5251_v32  ;;  %5236 = vadd.xlane.f32.xlu0 %v5231_v48  ;;  %vm5221_vm0 = vcmp.eq.s32.totalorder %v5204_v12, 0  ;;  %vm5242_vm1 = vcmp.eq.s32.totalorder %v5204_v12, 1  ;;  %vm5263_vm2 = vcmp.eq.s32.totalorder %v5204_v12, 2  ;;  %vm5284_vm3 = vcmp.eq.s32.totalorder %v5204_v12, 3 }
 0xa5b   :  { %v5116_v39 = vsub.f32 %v5108_v61, %v5112_v14  ;;  %v5101_v57 = vadd.f32 %v5100_v60, %v5099_v11  ;;  %v5105_v3 = vmul.f32 0.125, %v5073_v46  ;;  %v6023_v14 = vld [vmem:[%s7568_s0] sm:$0xff] }
 0xa5d   :  { %v5120_v42 = vmax.f32 %v5116_v39, 0.0  ;;  %v5109_v2 = vmul.f32 0.125, %v5101_v57  ;;  %v5113_v44 = vmul.f32 %v5105_v3, %v5105_v3 }
 0xa5e   :  { %5276 = vadd.xlane.f32.xlu1 %v5272_v9  ;;  %5257 = vadd.xlane.f32.xlu0 %v5252_v8 }
 0xa5f   :  { %v5124_v6 = vadd.f32 1e-05, %v5120_v42  ;;  %v5117_v21 = vsub.f32 %v5109_v2, %v5113_v44 }
 0xa61   :  { %6011 = vrsqrt.f32 %v5124_v6  ;;  %v5121_v4 = vmax.f32 %v5117_v21, 0.0 }
 0xa62   :  { %5215 = vadd.xlane.f32.xlu1 %v5210_v38  ;;  %5278 = vadd.xlane.f32.xlu0 %v5273_v33 }
 0xa63   :  { %v5125_v58 = vadd.f32 1e-05, %v5121_v4 }
 0xa65   :  { %6013 = vrsqrt.f32 %v5125_v58 }
 0xa6e   :  { %v6012_v1 = vpop.eup %6011 }
 0xa6f   :  { %v5132_v35 = vmul.f32 %v6012_v1, %v7464_v29 }
 0xa71   :  { %v5136_v17 = vmul.f32 %v5132_v35, %v5104_v40  ;;  %v5165_v63 = vrot.slane %v5132_v35, %v6383_v26  ;;  %v6025_v35 = vld [vmem:[%s7568_s0 + $0x10] sm:$0xff] }
 0xa72   :  { %v6014_v49 = vpop.eup %6013 }
 0xa73   :  { %v5144_v0 = vrot.slane %v5136_v17, 7  ;;  %v5133_v15 = vmul.f32 %v6014_v49, %v7464_v29  ;;  %v5172_v45 = vmul.f32 %v7469_v52, %v5165_v63 }
 0xa75   :  { %v5152_v18 = vsub.f32 %v7464_v29, %v5144_v0  ;;  %v5137_v55 = vmul.f32 %v5133_v15, %v5105_v3  ;;  %v5169_v13 = vrot.slane %v5133_v15, %v6383_v26  ;;  %v6024_v3 = vld [vmem:[%s7568_s0 + $0x8] sm:$0xff] }
 0xa77   :  { %v5185_v16 = vrot.slane %v5152_v18, %v6387_v31  ;;  %v5145_v19 = vrot.slane %v5137_v55, 7  ;;  %v5173_v54 = vmul.f32 %v7478_v27, %v5169_v13 }
 0xa79   :  { %v5192_v47 = vadd.f32 %v5185_v16, %v5172_v45  ;;  %v5153_v37 = vsub.f32 %v7464_v29, %v5145_v19  ;;  %v6026_v16 = vld [vmem:[%s7568_s0 + $0x18] sm:$0xff] }
 0xa7b   :  { %v5196_v36 = vmax.f32 %v5192_v47, 0.0  ;;  %v5189_v59 = vrot.slane %v5153_v37, %v6387_v31 }
 0xa7d   :  { %v5193_v56 = vadd.f32 %v5189_v59, %v5173_v54  ;;  %v5200_v25 = vadd.f32 %v5196_v36, %v7151_v43 }
 0xa7f   :  { %v5197_v20 = vmax.f32 %v5193_v56, 0.0  ;;  %v5232_v34 = vmul.f32 %v7482_v7, %v5200_v25  ;;  %v5211_v52 = vmul.f32 %v7488_v23, %v5200_v25  ;;  %v5253_v50 = vmul.f32 %v7495_v5, %v5200_v25 }
 0xa80   :  { %v5274_v27 = vmul.f32 %v5271_v30, %v5200_v25 }
 0xa81   :  { %5238 = vadd.xlane.f32.xlu1 %v5232_v34  ;;  %5217 = vadd.xlane.f32.xlu0 %v5211_v52  ;;  %v5201_v26 = vadd.f32 %v5197_v20, %v7154_v22 }
 0xa83   :  { %v5212_v29 = vmul.f32 %v7488_v23, %v5201_v26  ;;  %v5233_v31 = vmul.f32 %v7482_v7, %v5201_v26  ;;  %v5254_v43 = vmul.f32 %v7495_v5, %v5201_v26  ;;  %v5275_v10 = vmul.f32 %v5271_v30, %v5201_v26 }
 0xa85   :  { %5259 = vadd.xlane.f32.xlu1 %v5253_v50  ;;  %5219 = vadd.xlane.f32.xlu0 %v5212_v29 }
 0xa89   :  { %5280 = vadd.xlane.f32.xlu1 %v5274_v27  ;;  %5240 = vadd.xlane.f32.xlu0 %v5233_v31 }
 0xa8d   :  { %5261 = vadd.xlane.f32.xlu0 %v5254_v43 }
 0xa91   :  { %5282 = vadd.xlane.f32.xlu0 %v5275_v10 }
 0xadf   :  { %v5235_v53 = vpop.xlane.xlu1 %5234  ;;  %v5214_v22 = vpop.xlane.xlu0 %5213 }
 0xae0   :  { %v5222_v23 = vsel %vm5221_vm0, %v5214_v22, 0.0 }
 0xae1   :  { %v5243_v7 = vsel %vm5242_vm1, %v5235_v53, %v5222_v23 }
 0xae3   :  { %v5256_v51 = vpop.xlane.xlu1 %5255  ;;  %v5237_v40 = vpop.xlane.xlu0 %5236 }
 0xae4   :  { %v5264_v5 = vsel %vm5263_vm2, %v5256_v51, %v5243_v7 }
 0xae7   :  { %v5277_v41 = vpop.xlane.xlu1 %5276  ;;  %v5258_v11 = vpop.xlane.xlu0 %5257 }
 0xae8   :  { %v5285_v62 = vsel %vm5284_vm3, %v5277_v41, %v5264_v5 }
 0xae9   :  { %v5296_v24 = vadd.f32 %v5512_v28, %v5285_v62 }
 0xaeb   :  { %v5300_v32 = vsub.f32 %v5296_v24, %v6023_v14  ;;  %v5216_v48 = vpop.xlane.xlu1 %5215  ;;  %v5279_v60 = vpop.xlane.xlu0 %5278 }
 0xaec   :  { %v5223_v30 = vsel %vm5221_vm0, %v5216_v48, 0.0 }
 0xaed   :  { %5305 = vst.msk [vmem:[%s7580_s12] sm:$0xff] %vm5304_vm4, %v5300_v32  ;;  %v5244_v61 = vsel %vm5242_vm1, %v5237_v40, %v5223_v30 }
 0xaee   :  { %v5265_v46 = vsel %vm5263_vm2, %v5258_v11, %v5244_v61 }
 0xaef   :  { %v5286_v39 = vsel %vm5284_vm3, %v5279_v60, %v5265_v46 }
 0xaf0   :  { %v5297_v57 = vadd.f32 %v5512_v28, %v5286_v39 }
 0xaf2   :  { %v5301_v9 = vsub.f32 %v5297_v57, %v6024_v3 }
 0xaf4   :  { %5306 = vst.msk [vmem:[%s7580_s12 + $0x8] sm:$0xff] %vm5304_vm4, %v5301_v9 }
 0xb0a   :  { %v5239_v8 = vpop.xlane.xlu1 %5238  ;;  %v5218_v42 = vpop.xlane.xlu0 %5217 }
 0xb0b   :  { %v5224_v2 = vsel %vm5221_vm0, %v5218_v42, 0.0 }
 0xb0c   :  { %v5245_v21 = vsel %vm5242_vm1, %v5239_v8, %v5224_v2 }
 0xb0e   :  { %v5260_v44 = vpop.xlane.xlu1 %5259  ;;  %v5220_v6 = vpop.xlane.xlu0 %5219 }
 0xb0f   :  { %v5266_v38 = vsel %vm5263_vm2, %v5260_v44, %v5245_v21  ;;  %v5225_v0 = vsel %vm5221_vm0, %v5220_v6, 0.0 }
 0xb12   :  { %v5281_v33 = vpop.xlane.xlu1 %5280  ;;  %v5241_v4 = vpop.xlane.xlu0 %5240 }
 0xb13   :  { %v5287_v58 = vsel %vm5284_vm3, %v5281_v33, %v5266_v38  ;;  %v5246_v63 = vsel %vm5242_vm1, %v5241_v4, %v5225_v0 }
 0xb14   :  { %v5298_v1 = vadd.f32 %v5512_v28, %v5287_v58 }
 0xb16   :  { %v5302_v17 = vsub.f32 %v5298_v1, %v6025_v35  ;;  %v5262_v49 = vpop.xlane.xlu0 %5261 }
 0xb17   :  { %v5267_v15 = vsel %vm5263_vm2, %v5262_v49, %v5246_v63 }
 0xb18   :  { %5307 = vst.msk [vmem:[%s7580_s12 + $0x10] sm:$0xff] %vm5304_vm4, %v5302_v17 }
 0xb1a   :  { %v5283_v18 = vpop.xlane.xlu0 %5282 }
 0xb1b   :  { %v5288_v55 = vsel %vm5284_vm3, %v5283_v18, %v5267_v15 }
 0xb1c   :  { %v5299_v45 = vadd.f32 %v5512_v28, %v5288_v55 }
 0xb1e   :  { %v5303_v19 = vsub.f32 %v5299_v45, %v6026_v16 }
 0xb20   :  { %5308 = vst.msk [vmem:[%s7580_s12 + $0x18] sm:$0xff] %vm5304_vm4, %v5303_v19 }
 0xb21   :  { %5313 = vsyncpa [#allocation3], 1 }
 0xb22   :  { %5314 = vsyncpa [#allocation5], 1 }
 0xb23   :  { %5315 = vsyncpa [#allocation8], 1 }
 0xb24   :  { %5316 = vsyncpa [#allocation11], 1 }
 0xb25   :  { %5317 = vsyncpa [#allocation14], 1 }
 0xb26   :  { %5318 = vsyncpa [#allocation17], 1 }

</bundles_post_ra>
